<compile_context>
chip_gen: v7x
topology: tpu7x:2x2x1
jax: 0.10.0
libtpu: 0.0.40
codegen_flags: <defaults>
</compile_context>

<pallas_src>
import functools

import jax
import jax.numpy as jnp
import numpy as np
from jax import lax
from jax.experimental import pallas as pl
from jax.experimental.pallas import tpu as pltpu


def _round_up(x, m):
    return ((x + m - 1) // m) * m


def _bf16_valu_ok():
    # v6e / v7x have a bf16 VALU; v5e (and older) do not — there the big
    # select/add chain stays f32 and only the finished S tile is cast to bf16.
    try:
        kind = jax.devices()[0].device_kind.lower()
    except Exception:
        return False
    return ("v6" in kind) or ("v7" in kind)


# ----------------------------------------------------------------------------
# In-kernel helper: bilinear interpolation matrix chunk S[hw_len, P]
# (lane-dense point axis; HW on sublanes) reproducing
# F.grid_sample(feat, 2*pts-1, mode='bilinear', padding_mode='zeros',
# align_corners=False), so that  sampled[C, P] = feat[C, HW] @ S[HW, P].
# ----------------------------------------------------------------------------
def _interp_matrix(px, py, H, W, hw_start, hw_len, build_dtype):
    P = px.shape[1]
    fx = px * W - 0.5            # [1, P]  x -> width
    fy = py * H - 0.5            # [1, P]  y -> height
    x0f = jnp.floor(fx)
    y0f = jnp.floor(fy)
    wx1 = fx - x0f
    wx0 = 1.0 - wx1
    wy1 = fy - y0f
    wy0 = 1.0 - wy1
    x0 = x0f.astype(jnp.int32)
    y0 = y0f.astype(jnp.int32)
    x1 = x0 + 1
    y1 = y0 + 1
    vx0 = (x0 >= 0) & (x0 <= W - 1)
    vx1 = (x1 >= 0) & (x1 <= W - 1)
    vy0 = (y0 >= 0) & (y0 <= H - 1)
    vy1 = (y1 >= 0) & (y1 <= H - 1)
    # zero-padding validity folded into the per-corner weights ([1, P], tiny)
    w00 = jnp.where(vx0 & vy0, wx0 * wy0, 0.0).astype(build_dtype)
    w10 = jnp.where(vx1 & vy0, wx1 * wy0, 0.0).astype(build_dtype)
    w01 = jnp.where(vx0 & vy1, wx0 * wy1, 0.0).astype(build_dtype)
    w11 = jnp.where(vx1 & vy1, wx1 * wy1, 0.0).astype(build_dtype)
    # unclipped flat indices: any out-of-range corner already has weight 0, so
    # a wrapped / out-of-range index can never contribute
    f00 = y0 * W + x0
    f10 = y0 * W + x1
    f01 = y1 * W + x0
    f11 = y1 * W + x1
    row = lax.broadcasted_iota(jnp.int32, (hw_len, P), 0) + hw_start
    return (jnp.where(row == f00, w00, 0.0)
            + jnp.where(row == f10, w10, 0.0)
            + jnp.where(row == f01, w01, 0.0)
            + jnp.where(row == f11, w11, 0.0))


# ----------------------------------------------------------------------------
# Pallas kernel.  grid = (B, K): one batch element per b-step, the fine (res2-
# derived) path tiled over HW2 in `chunk`-wide lane... sublane chunks with an
# f32 VMEM accumulator.  Coarse path + bias done once at k==0.
# ----------------------------------------------------------------------------
def _point_head_kernel(ac_ref, af_ref, pts_ref, b_ref, rend_ref, acc_ref,
                       *, H, W, H2, W2, chunk, build_dtype):
    k = pl.program_id(1)
    pts = pts_ref[0]                    # [2, P]  f32
    px = pts[0:1, :]                    # [1, P]  lane-dense
    py = pts[1:2, :]

    @pl.when(k == 0)
    def _():
        s_c = _interp_matrix(px, py, H, W, 0, H * W, build_dtype)
        s_c = s_c.astype(jnp.bfloat16)                      # [HW, P]
        acc_ref[...] = (jnp.dot(ac_ref[0], s_c,
                                preferred_element_type=jnp.float32)
                        + b_ref[...])                       # [NC, P] + [NC, 1]

    s_f = _interp_matrix(px, py, H2, W2, k * chunk, chunk, build_dtype)
    s_f = s_f.astype(jnp.bfloat16)                          # [chunk, P]
    acc_ref[...] += jnp.dot(af_ref[0], s_f,
                            preferred_element_type=jnp.float32)

    @pl.when(k == pl.num_programs(1) - 1)
    def _():
        rend_ref[0] = acc_ref[...]


def point_head_rend(out, res2, points, w, b, *, chunk_hw2=2048):
    """rend = Conv1d(w,b)(cat([point_sample(out,pts), point_sample(res2,pts)]))."""
    B, C_out, H, W = out.shape
    _, C_res2, H2, W2 = res2.shape
    P = points.shape[1]
    NC = w.shape[0]
    HWc = H * W
    HW2 = H2 * W2
    P_pad = _round_up(max(P, 128), 128)      # lane-dense point axis

    w = w.astype(jnp.float32)
    b = b.astype(jnp.float32)

    # Algebraic conv fusion:  W @ (feat·S) == (W @ feat)·S.  Pre-mix the 1x1
    # conv into the feature maps as plain streaming XLA matmuls, bf16 for the
    # in-kernel MXU contraction (f32 accumulate inside the kernel).
    a_c = jnp.einsum("oc,bcx->box", w[:, :C_out],
                     out.reshape(B, C_out, HWc).astype(jnp.float32)
                     ).astype(jnp.bfloat16)                       # [B, NC, HWc]
    a_f = jnp.einsum("oc,bcx->box", w[:, C_out:],
                     res2.reshape(B, C_res2, HW2).astype(jnp.float32)
                     ).astype(jnp.bfloat16)                       # [B, NC, HW2]

    # Tile the fine path over HW2 (mandatory at production res2 sizes).
    chunk = min(_round_up(HW2, 128), _round_up(chunk_hw2, 128))
    HW2_pad = _round_up(HW2, chunk)
    if HW2_pad != HW2:
        a_f = jnp.pad(a_f, ((0, 0), (0, 0), (0, HW2_pad - HW2)))
    n_k = HW2_pad // chunk

    # points -> (B, 2, P_pad): per-point math and all matmul N dims lane-dense.
    pts = jnp.transpose(points.astype(jnp.float32), (0, 2, 1))
    if P_pad != P:
        pts = jnp.concatenate(
            [pts, jnp.full((B, 2, P_pad - P), 0.5, jnp.float32)], axis=2)

    b2d = b.reshape(NC, 1)

    build_dtype = jnp.bfloat16 if _bf16_valu_ok() else jnp.float32
    kernel = functools.partial(_point_head_kernel, H=H, W=W, H2=H2, W2=W2,
                               chunk=chunk, build_dtype=build_dtype)

    # TODO(synk): for extremely large HW2 the dense S contraction could be
    # replaced by a scalar-prefetched per-point DMA gather of the 4 corner
    # values; the chunked dense form is kept here for simplicity.
    rend_pad = pl.pallas_call(
        kernel,
        out_shape=jax.ShapeDtypeStruct((B, NC, P_pad), jnp.float32),
        grid=(B, n_k),
        in_specs=[
            pl.BlockSpec((1, NC, HWc), lambda bi, ki: (bi, 0, 0)),
            pl.BlockSpec((1, NC, chunk), lambda bi, ki: (bi, 0, ki)),
            pl.BlockSpec((1, 2, P_pad), lambda bi, ki: (bi, 0, 0)),
            pl.BlockSpec((NC, 1), lambda bi, ki: (0, 0)),
        ],
        out_specs=pl.BlockSpec((1, NC, P_pad), lambda bi, ki: (bi, 0, 0)),
        scratch_shapes=[pltpu.VMEM((NC, P_pad), jnp.float32)],
        compiler_params=pltpu.CompilerParams(
            dimension_semantics=("parallel", "arbitrary")),
    )(a_c, a_f, pts, b2d)
    return rend_pad[:, :, :P]


# ----------------------------------------------------------------------------
# Plain-JAX glue: point_sample reference (grid_sample, align_corners=False,
# zero padding) and sampling_points (training branch).
# ----------------------------------------------------------------------------
def point_sample_ref(feat, points):
    B, C, H, W = feat.shape
    px = points[..., 0] * W - 0.5   # [B, P]
    py = points[..., 1] * H - 0.5
    x0 = jnp.floor(px)
    y0 = jnp.floor(py)
    x1 = x0 + 1.0
    y1 = y0 + 1.0
    wx1 = px - x0
    wx0 = 1.0 - wx1
    wy1 = py - y0
    wy0 = 1.0 - wy1
    featf = feat.reshape(B, C, H * W)

    def corner(xf, yf, w):
        valid = ((xf >= 0) & (xf <= W - 1) & (yf >= 0) & (yf <= H - 1)
                 ).astype(feat.dtype)
        xi = jnp.clip(xf, 0, W - 1).astype(jnp.int32)
        yi = jnp.clip(yf, 0, H - 1).astype(jnp.int32)
        idx = yi * W + xi
        vals = jnp.take_along_axis(featf, idx[:, None, :], axis=2)  # [B, C, P]
        return vals * (w * valid)[:, None, :]

    return (corner(x0, y0, wx0 * wy0) + corner(x1, y0, wx1 * wy0)
            + corner(x0, y1, wx0 * wy1) + corner(x1, y1, wx1 * wy1))


# TODO(synk): sampling_points (RNG, channel-wise sort and top-k point selection)
# and the inference-branch iterative subdivision/scatter have no clean Pallas
# equivalent; the training-branch point selection is kept in plain JAX glue.
def sampling_points_train(key, mask, N, k=3, beta=0.75):
    B, C, H, W = mask.shape
    # channels 0,1 of the descending sort == per-pixel top-2 class scores
    top2 = jax.lax.top_k(jnp.transpose(mask, (0, 2, 3, 1)), 2)[0]   # [B,H,W,2]
    top2 = jnp.transpose(top2, (0, 3, 1, 2))                        # [B,2,H,W]
    k_over, k_cov = jax.random.split(key)
    over_gen = jax.random.uniform(k_over, (B, k * N, 2), dtype=jnp.float32)
    og_map = point_sample_ref(top2, over_gen)                       # [B,2,k*N]
    uncertainty = -(og_map[:, 0] - og_map[:, 1])                    # [B, k*N]
    n_imp = int(beta * N)
    _, idx = jax.lax.top_k(uncertainty, n_imp)                      # [B, n_imp]
    importance = jnp.take_along_axis(over_gen, idx[..., None], axis=1)
    coverage = jax.random.uniform(k_cov, (B, N - n_imp, 2), dtype=jnp.float32)
    return jnp.concatenate([importance, coverage], axis=1)          # [B, N, 2]


def point_head_forward(params, key, x, res2, out, k=3, beta=0.75):
    N = x.shape[-1] // 16
    points = sampling_points_train(key, out, N, k, beta)
    rend = point_head_rend(out, res2, points, params["w"], params["b"])
    return {"rend": rend, "points": points}


# ----------------------------------------------------------------------------
if __name__ == "__main__":
    key = jax.random.PRNGKey(0)
    kx, kr, ko, kw, kb, ks = jax.random.split(key, 6)

    B = 2
    num_classes = 8          # channels of `out` (coarse prediction)
    c_res2 = 24              # channels of `res2` (fine features)
    in_c = num_classes + c_res2

    x = jax.random.normal(kx, (B, 3, 128, 128), dtype=jnp.float32)   # -> P = 8
    res2 = jax.random.normal(kr, (B, c_res2, 32, 32), dtype=jnp.float32)
    out = jax.random.normal(ko, (B, num_classes, 16, 16), dtype=jnp.float32)

    # deterministic Conv1d(in_c, num_classes, 1) parameters
    w = 0.1 * jax.random.normal(kw, (num_classes, in_c), dtype=jnp.float32)
    b = 0.01 * jax.random.normal(kb, (num_classes,), dtype=jnp.float32)
    params = {"w": w, "b": b}

    result = point_head_forward(params, ks, x, res2, out)
    rend = jax.block_until_ready(result["rend"])
    points = jax.block_until_ready(result["points"])

    # pure-JAX f32 reference of the hot path (point_sample + concat + 1x1 conv);
    # the kernel runs the sampling contraction in bf16 (f32 accumulate), so the
    # tolerance is relaxed accordingly.
    coarse_ref = point_sample_ref(out, points)
    fine_ref = point_sample_ref(res2, points)
    feat_ref = jnp.concatenate([coarse_ref, fine_ref], axis=1)       # [B,in_c,P]
    rend_ref = jnp.einsum("oc,bcp->bop", w, feat_ref) + b[None, :, None]

    assert rend.shape == (B, num_classes, x.shape[-1] // 16)
    assert points.shape == (B, x.shape[-1] // 16, 2)
    np.testing.assert_allclose(np.asarray(rend), np.asarray(rend_ref),
                               rtol=5e-2, atol=5e-2)
    print("KERNEL_OK")
</pallas_src>

<mosaic_0001>
module attributes {stable_mosaic.version = 11 : i64} {
  func.func @_point_head_kernel(%arg0: i32, %arg1: i32, %arg2: memref<1x8x256xbf16, #tpu.memory_space<vmem>>, %arg3: memref<1x8x1024xbf16, #tpu.memory_space<vmem>>, %arg4: memref<1x2x128xf32, #tpu.memory_space<vmem>>, %arg5: memref<8x1xf32, #tpu.memory_space<vmem>>, %arg6: memref<1x8x128xf32, #tpu.memory_space<vmem>>, %arg7: memref<8x128xf32, #tpu.memory_space<vmem>>) attributes {dimension_semantics = [#tpu.dimension_semantics<parallel>, #tpu.dimension_semantics<arbitrary>], iteration_bounds = array<i64: 2, 1>, scalar_prefetch = 0 : i64, scratch_operands = 1 : i64, tpu.core_type = #tpu.core_type<tc>, window_params = [{transform_indices = @transform_0, window_bounds = array<i64: 1, 8, 256>}, {transform_indices = @transform_1, window_bounds = array<i64: 1, 8, 1024>}, {transform_indices = @transform_2, window_bounds = array<i64: 1, 2, 128>}, {pipeline_mode = #tpu.pipeline_mode<synchronous>, transform_indices = @transform_3, window_bounds = array<i64: 8, 1>}, {transform_indices = @transform_4, window_bounds = array<i64: 1, 8, 128>}]} {
    %c0 = arith.constant 0 : index
    %c0_0 = arith.constant 0 : index
    %c0_1 = arith.constant 0 : index
    %0 = vector.load %arg4[%c0, %c0_0, %c0_1] : memref<1x2x128xf32, #tpu.memory_space<vmem>>, vector<1x2x128xf32>
    %1 = vector.shape_cast %0 : vector<1x2x128xf32> to vector<2x128xf32>
    %2 = vector.extract_strided_slice %1 {offsets = [0, 0], sizes = [1, 128], strides = [1, 1]} : vector<2x128xf32> to vector<1x128xf32>
    %3 = vector.extract_strided_slice %1 {offsets = [1, 0], sizes = [1, 128], strides = [1, 1]} : vector<2x128xf32> to vector<1x128xf32>
    %c0_i32 = arith.constant 0 : i32
    %4 = arith.cmpi eq, %arg1, %c0_i32 : i32
    %5 = arith.extui %4 : i1 to i32
    %c0_i32_2 = arith.constant 0 : i32
    %6 = arith.cmpi ne, %5, %c0_i32_2 : i32
    scf.if %6 {
      %cst_37 = arith.constant 1.600000e+01 : f32
      %118 = vector.broadcast %cst_37 : f32 to vector<1x128xf32>
      %119 = arith.mulf %2, %118 : vector<1x128xf32>
      %cst_38 = arith.constant 5.000000e-01 : f32
      %120 = vector.broadcast %cst_38 : f32 to vector<1x128xf32>
      %121 = arith.subf %119, %120 : vector<1x128xf32>
      %cst_39 = arith.constant 1.600000e+01 : f32
      %122 = vector.broadcast %cst_39 : f32 to vector<1x128xf32>
      %123 = arith.mulf %3, %122 : vector<1x128xf32>
      %cst_40 = arith.constant 5.000000e-01 : f32
      %124 = vector.broadcast %cst_40 : f32 to vector<1x128xf32>
      %125 = arith.subf %123, %124 : vector<1x128xf32>
      %126 = math.floor %121 : vector<1x128xf32>
      %127 = math.floor %125 : vector<1x128xf32>
      %128 = arith.subf %121, %126 : vector<1x128xf32>
      %cst_41 = arith.constant 1.000000e+00 : f32
      %129 = vector.broadcast %cst_41 : f32 to vector<1x128xf32>
      %130 = arith.subf %129, %128 : vector<1x128xf32>
      %131 = arith.subf %125, %127 : vector<1x128xf32>
      %cst_42 = arith.constant 1.000000e+00 : f32
      %132 = vector.broadcast %cst_42 : f32 to vector<1x128xf32>
      %133 = arith.subf %132, %131 : vector<1x128xf32>
      %134 = arith.fptosi %126 : vector<1x128xf32> to vector<1x128xi32>
      %135 = arith.fptosi %127 : vector<1x128xf32> to vector<1x128xi32>
      %c1_i32_43 = arith.constant 1 : i32
      %136 = vector.broadcast %c1_i32_43 : i32 to vector<1x128xi32>
      %137 = arith.addi %134, %136 : vector<1x128xi32>
      %c1_i32_44 = arith.constant 1 : i32
      %138 = vector.broadcast %c1_i32_44 : i32 to vector<1x128xi32>
      %139 = arith.addi %135, %138 : vector<1x128xi32>
      %c0_i32_45 = arith.constant 0 : i32
      %140 = vector.broadcast %c0_i32_45 : i32 to vector<1x128xi32>
      %141 = arith.cmpi sge, %134, %140 : vector<1x128xi32>
      %c15_i32 = arith.constant 15 : i32
      %142 = vector.broadcast %c15_i32 : i32 to vector<1x128xi32>
      %143 = arith.cmpi sle, %134, %142 : vector<1x128xi32>
      %144 = arith.andi %141, %143 : vector<1x128xi1>
      %c0_i32_46 = arith.constant 0 : i32
      %145 = vector.broadcast %c0_i32_46 : i32 to vector<1x128xi32>
      %146 = arith.cmpi sge, %137, %145 : vector<1x128xi32>
      %c15_i32_47 = arith.constant 15 : i32
      %147 = vector.broadcast %c15_i32_47 : i32 to vector<1x128xi32>
      %148 = arith.cmpi sle, %137, %147 : vector<1x128xi32>
      %149 = arith.andi %146, %148 : vector<1x128xi1>
      %c0_i32_48 = arith.constant 0 : i32
      %150 = vector.broadcast %c0_i32_48 : i32 to vector<1x128xi32>
      %151 = arith.cmpi sge, %135, %150 : vector<1x128xi32>
      %c15_i32_49 = arith.constant 15 : i32
      %152 = vector.broadcast %c15_i32_49 : i32 to vector<1x128xi32>
      %153 = arith.cmpi sle, %135, %152 : vector<1x128xi32>
      %154 = arith.andi %151, %153 : vector<1x128xi1>
      %c0_i32_50 = arith.constant 0 : i32
      %155 = vector.broadcast %c0_i32_50 : i32 to vector<1x128xi32>
      %156 = arith.cmpi sge, %139, %155 : vector<1x128xi32>
      %c15_i32_51 = arith.constant 15 : i32
      %157 = vector.broadcast %c15_i32_51 : i32 to vector<1x128xi32>
      %158 = arith.cmpi sle, %139, %157 : vector<1x128xi32>
      %159 = arith.andi %156, %158 : vector<1x128xi1>
      %160 = arith.andi %144, %154 : vector<1x128xi1>
      %161 = arith.mulf %130, %133 : vector<1x128xf32>
      %cst_52 = arith.constant 0.000000e+00 : f32
      %162 = vector.broadcast %cst_52 : f32 to vector<1x128xf32>
      %163 = arith.select %160, %161, %162 : vector<1x128xi1>, vector<1x128xf32>
      %164 = arith.andi %149, %154 : vector<1x128xi1>
      %165 = arith.mulf %128, %133 : vector<1x128xf32>
      %cst_53 = arith.constant 0.000000e+00 : f32
      %166 = vector.broadcast %cst_53 : f32 to vector<1x128xf32>
      %167 = arith.select %164, %165, %166 : vector<1x128xi1>, vector<1x128xf32>
      %168 = arith.andi %144, %159 : vector<1x128xi1>
      %169 = arith.mulf %130, %131 : vector<1x128xf32>
      %cst_54 = arith.constant 0.000000e+00 : f32
      %170 = vector.broadcast %cst_54 : f32 to vector<1x128xf32>
      %171 = arith.select %168, %169, %170 : vector<1x128xi1>, vector<1x128xf32>
      %172 = arith.andi %149, %159 : vector<1x128xi1>
      %173 = arith.mulf %128, %131 : vector<1x128xf32>
      %cst_55 = arith.constant 0.000000e+00 : f32
      %174 = vector.broadcast %cst_55 : f32 to vector<1x128xf32>
      %175 = arith.select %172, %173, %174 : vector<1x128xi1>, vector<1x128xf32>
      %c16_i32 = arith.constant 16 : i32
      %176 = vector.broadcast %c16_i32 : i32 to vector<1x128xi32>
      %177 = arith.muli %135, %176 : vector<1x128xi32>
      %178 = arith.addi %177, %134 : vector<1x128xi32>
      %c16_i32_56 = arith.constant 16 : i32
      %179 = vector.broadcast %c16_i32_56 : i32 to vector<1x128xi32>
      %180 = arith.muli %135, %179 : vector<1x128xi32>
      %181 = arith.addi %180, %137 : vector<1x128xi32>
      %c16_i32_57 = arith.constant 16 : i32
      %182 = vector.broadcast %c16_i32_57 : i32 to vector<1x128xi32>
      %183 = arith.muli %139, %182 : vector<1x128xi32>
      %184 = arith.addi %183, %134 : vector<1x128xi32>
      %c16_i32_58 = arith.constant 16 : i32
      %185 = vector.broadcast %c16_i32_58 : i32 to vector<1x128xi32>
      %186 = arith.muli %139, %185 : vector<1x128xi32>
      %187 = arith.addi %186, %137 : vector<1x128xi32>
      %188 = tpu.iota {dimensions = array<i32: 0>} : vector<256x128xi32>
      %c0_i32_59 = arith.constant 0 : i32
      %189 = vector.broadcast %c0_i32_59 : i32 to vector<256x128xi32>
      %190 = arith.addi %188, %189 : vector<256x128xi32>
      %191 = vector.broadcast %178 : vector<1x128xi32> to vector<256x128xi32>
      %192 = arith.cmpi eq, %190, %191 : vector<256x128xi32>
      %cst_60 = arith.constant 0.000000e+00 : f32
      %193 = vector.shape_cast %163 : vector<1x128xf32> to vector<1x128xf32>
      %194 = vector.broadcast %193 : vector<1x128xf32> to vector<256x128xf32>
      %195 = vector.broadcast %cst_60 : f32 to vector<256x128xf32>
      %196 = arith.select %192, %194, %195 : vector<256x128xi1>, vector<256x128xf32>
      %197 = vector.broadcast %181 : vector<1x128xi32> to vector<256x128xi32>
      %198 = arith.cmpi eq, %190, %197 : vector<256x128xi32>
      %cst_61 = arith.constant 0.000000e+00 : f32
      %199 = vector.shape_cast %167 : vector<1x128xf32> to vector<1x128xf32>
      %200 = vector.broadcast %199 : vector<1x128xf32> to vector<256x128xf32>
      %201 = vector.broadcast %cst_61 : f32 to vector<256x128xf32>
      %202 = arith.select %198, %200, %201 : vector<256x128xi1>, vector<256x128xf32>
      %203 = arith.addf %196, %202 : vector<256x128xf32>
      %204 = vector.broadcast %184 : vector<1x128xi32> to vector<256x128xi32>
      %205 = arith.cmpi eq, %190, %204 : vector<256x128xi32>
      %cst_62 = arith.constant 0.000000e+00 : f32
      %206 = vector.shape_cast %171 : vector<1x128xf32> to vector<1x128xf32>
      %207 = vector.broadcast %206 : vector<1x128xf32> to vector<256x128xf32>
      %208 = vector.broadcast %cst_62 : f32 to vector<256x128xf32>
      %209 = arith.select %205, %207, %208 : vector<256x128xi1>, vector<256x128xf32>
      %210 = arith.addf %203, %209 : vector<256x128xf32>
      %211 = vector.broadcast %187 : vector<1x128xi32> to vector<256x128xi32>
      %212 = arith.cmpi eq, %190, %211 : vector<256x128xi32>
      %cst_63 = arith.constant 0.000000e+00 : f32
      %213 = vector.shape_cast %175 : vector<1x128xf32> to vector<1x128xf32>
      %214 = vector.broadcast %213 : vector<1x128xf32> to vector<256x128xf32>
      %215 = vector.broadcast %cst_63 : f32 to vector<256x128xf32>
      %216 = arith.select %212, %214, %215 : vector<256x128xi1>, vector<256x128xf32>
      %217 = arith.addf %210, %216 : vector<256x128xf32>
      %218 = arith.truncf %217 : vector<256x128xf32> to vector<256x128xbf16>
      %c0_64 = arith.constant 0 : index
      %c0_65 = arith.constant 0 : index
      %c0_66 = arith.constant 0 : index
      %219 = vector.load %arg2[%c0_64, %c0_65, %c0_66] : memref<1x8x256xbf16, #tpu.memory_space<vmem>>, vector<1x8x256xbf16>
      %220 = vector.shape_cast %219 : vector<1x8x256xbf16> to vector<8x256xbf16>
      %cst_67 = arith.constant dense<0.000000e+00> : vector<8x128xf32>
      %221 = tpu.matmul %220, %218, %cst_67 {dimension_numbers = #tpu.dot_dimension_numbers<[1], [0], [0], [1], [0, 0, 1, 1], [], []>} : vector<8x256xbf16>, vector<256x128xbf16>, vector<8x128xf32> -> vector<8x128xf32>
      %c0_68 = arith.constant 0 : index
      %c0_69 = arith.constant 0 : index
      %222 = vector.load %arg5[%c0_68, %c0_69] : memref<8x1xf32, #tpu.memory_space<vmem>>, vector<8x1xf32>
      %223 = vector.broadcast %222 : vector<8x1xf32> to vector<8x128xf32>
      %224 = arith.addf %221, %223 : vector<8x128xf32>
      %c0_70 = arith.constant 0 : index
      %c0_71 = arith.constant 0 : index
      %225 = vector.load %arg7[%c0_70, %c0_71] : memref<8x128xf32, #tpu.memory_space<vmem>>, vector<8x128xf32>
      tpu.vector_store %arg7[%c0_70, %c0_71], %224 {strides = array<i32>} : memref<8x128xf32, #tpu.memory_space<vmem>>, vector<8x128xf32>,
    } else {
    }
    %c1024_i32 = arith.constant 1024 : i32
    %7 = arith.muli %arg1, %c1024_i32 : i32
    %cst = arith.constant 3.200000e+01 : f32
    %8 = vector.broadcast %cst : f32 to vector<1x128xf32>
    %9 = arith.mulf %2, %8 : vector<1x128xf32>
    %cst_3 = arith.constant 5.000000e-01 : f32
    %10 = vector.broadcast %cst_3 : f32 to vector<1x128xf32>
    %11 = arith.subf %9, %10 : vector<1x128xf32>
    %cst_4 = arith.constant 3.200000e+01 : f32
    %12 = vector.broadcast %cst_4 : f32 to vector<1x128xf32>
    %13 = arith.mulf %3, %12 : vector<1x128xf32>
    %cst_5 = arith.constant 5.000000e-01 : f32
    %14 = vector.broadcast %cst_5 : f32 to vector<1x128xf32>
    %15 = arith.subf %13, %14 : vector<1x128xf32>
    %16 = math.floor %11 : vector<1x128xf32>
    %17 = math.floor %15 : vector<1x128xf32>
    %18 = arith.subf %11, %16 : vector<1x128xf32>
    %cst_6 = arith.constant 1.000000e+00 : f32
    %19 = vector.broadcast %cst_6 : f32 to vector<1x128xf32>
    %20 = arith.subf %19, %18 : vector<1x128xf32>
    %21 = arith.subf %15, %17 : vector<1x128xf32>
    %cst_7 = arith.constant 1.000000e+00 : f32
    %22 = vector.broadcast %cst_7 : f32 to vector<1x128xf32>
    %23 = arith.subf %22, %21 : vector<1x128xf32>
    %24 = arith.fptosi %16 : vector<1x128xf32> to vector<1x128xi32>
    %25 = arith.fptosi %17 : vector<1x128xf32> to vector<1x128xi32>
    %c1_i32 = arith.constant 1 : i32
    %26 = vector.broadcast %c1_i32 : i32 to vector<1x128xi32>
    %27 = arith.addi %24, %26 : vector<1x128xi32>
    %c1_i32_8 = arith.constant 1 : i32
    %28 = vector.broadcast %c1_i32_8 : i32 to vector<1x128xi32>
    %29 = arith.addi %25, %28 : vector<1x128xi32>
    %c0_i32_9 = arith.constant 0 : i32
    %30 = vector.broadcast %c0_i32_9 : i32 to vector<1x128xi32>
    %31 = arith.cmpi sge, %24, %30 : vector<1x128xi32>
    %c31_i32 = arith.constant 31 : i32
    %32 = vector.broadcast %c31_i32 : i32 to vector<1x128xi32>
    %33 = arith.cmpi sle, %24, %32 : vector<1x128xi32>
    %34 = arith.andi %31, %33 : vector<1x128xi1>
    %c0_i32_10 = arith.constant 0 : i32
    %35 = vector.broadcast %c0_i32_10 : i32 to vector<1x128xi32>
    %36 = arith.cmpi sge, %27, %35 : vector<1x128xi32>
    %c31_i32_11 = arith.constant 31 : i32
    %37 = vector.broadcast %c31_i32_11 : i32 to vector<1x128xi32>
    %38 = arith.cmpi sle, %27, %37 : vector<1x128xi32>
    %39 = arith.andi %36, %38 : vector<1x128xi1>
    %c0_i32_12 = arith.constant 0 : i32
    %40 = vector.broadcast %c0_i32_12 : i32 to vector<1x128xi32>
    %41 = arith.cmpi sge, %25, %40 : vector<1x128xi32>
    %c31_i32_13 = arith.constant 31 : i32
    %42 = vector.broadcast %c31_i32_13 : i32 to vector<1x128xi32>
    %43 = arith.cmpi sle, %25, %42 : vector<1x128xi32>
    %44 = arith.andi %41, %43 : vector<1x128xi1>
    %c0_i32_14 = arith.constant 0 : i32
    %45 = vector.broadcast %c0_i32_14 : i32 to vector<1x128xi32>
    %46 = arith.cmpi sge, %29, %45 : vector<1x128xi32>
    %c31_i32_15 = arith.constant 31 : i32
    %47 = vector.broadcast %c31_i32_15 : i32 to vector<1x128xi32>
    %48 = arith.cmpi sle, %29, %47 : vector<1x128xi32>
    %49 = arith.andi %46, %48 : vector<1x128xi1>
    %50 = arith.andi %34, %44 : vector<1x128xi1>
    %51 = arith.mulf %20, %23 : vector<1x128xf32>
    %cst_16 = arith.constant 0.000000e+00 : f32
    %52 = vector.broadcast %cst_16 : f32 to vector<1x128xf32>
    %53 = arith.select %50, %51, %52 : vector<1x128xi1>, vector<1x128xf32>
    %54 = arith.andi %39, %44 : vector<1x128xi1>
    %55 = arith.mulf %18, %23 : vector<1x128xf32>
    %cst_17 = arith.constant 0.000000e+00 : f32
    %56 = vector.broadcast %cst_17 : f32 to vector<1x128xf32>
    %57 = arith.select %54, %55, %56 : vector<1x128xi1>, vector<1x128xf32>
    %58 = arith.andi %34, %49 : vector<1x128xi1>
    %59 = arith.mulf %20, %21 : vector<1x128xf32>
    %cst_18 = arith.constant 0.000000e+00 : f32
    %60 = vector.broadcast %cst_18 : f32 to vector<1x128xf32>
    %61 = arith.select %58, %59, %60 : vector<1x128xi1>, vector<1x128xf32>
    %62 = arith.andi %39, %49 : vector<1x128xi1>
    %63 = arith.mulf %18, %21 : vector<1x128xf32>
    %cst_19 = arith.constant 0.000000e+00 : f32
    %64 = vector.broadcast %cst_19 : f32 to vector<1x128xf32>
    %65 = arith.select %62, %63, %64 : vector<1x128xi1>, vector<1x128xf32>
    %c32_i32 = arith.constant 32 : i32
    %66 = vector.broadcast %c32_i32 : i32 to vector<1x128xi32>
    %67 = arith.muli %25, %66 : vector<1x128xi32>
    %68 = arith.addi %67, %24 : vector<1x128xi32>
    %c32_i32_20 = arith.constant 32 : i32
    %69 = vector.broadcast %c32_i32_20 : i32 to vector<1x128xi32>
    %70 = arith.muli %25, %69 : vector<1x128xi32>
    %71 = arith.addi %70, %27 : vector<1x128xi32>
    %c32_i32_21 = arith.constant 32 : i32
    %72 = vector.broadcast %c32_i32_21 : i32 to vector<1x128xi32>
    %73 = arith.muli %29, %72 : vector<1x128xi32>
    %74 = arith.addi %73, %24 : vector<1x128xi32>
    %c32_i32_22 = arith.constant 32 : i32
    %75 = vector.broadcast %c32_i32_22 : i32 to vector<1x128xi32>
    %76 = arith.muli %29, %75 : vector<1x128xi32>
    %77 = arith.addi %76, %27 : vector<1x128xi32>
    %78 = tpu.iota {dimensions = array<i32: 0>} : vector<1024x128xi32>
    %79 = vector.broadcast %7 : i32 to vector<1024x128xi32>
    %80 = arith.addi %78, %79 : vector<1024x128xi32>
    %81 = vector.broadcast %68 : vector<1x128xi32> to vector<1024x128xi32>
    %82 = arith.cmpi eq, %80, %81 : vector<1024x128xi32>
    %cst_23 = arith.constant 0.000000e+00 : f32
    %83 = vector.shape_cast %53 : vector<1x128xf32> to vector<1x128xf32>
    %84 = vector.broadcast %83 : vector<1x128xf32> to vector<1024x128xf32>
    %85 = vector.broadcast %cst_23 : f32 to vector<1024x128xf32>
    %86 = arith.select %82, %84, %85 : vector<1024x128xi1>, vector<1024x128xf32>
    %87 = vector.broadcast %71 : vector<1x128xi32> to vector<1024x128xi32>
    %88 = arith.cmpi eq, %80, %87 : vector<1024x128xi32>
    %cst_24 = arith.constant 0.000000e+00 : f32
    %89 = vector.shape_cast %57 : vector<1x128xf32> to vector<1x128xf32>
    %90 = vector.broadcast %89 : vector<1x128xf32> to vector<1024x128xf32>
    %91 = vector.broadcast %cst_24 : f32 to vector<1024x128xf32>
    %92 = arith.select %88, %90, %91 : vector<1024x128xi1>, vector<1024x128xf32>
    %93 = arith.addf %86, %92 : vector<1024x128xf32>
    %94 = vector.broadcast %74 : vector<1x128xi32> to vector<1024x128xi32>
    %95 = arith.cmpi eq, %80, %94 : vector<1024x128xi32>
    %cst_25 = arith.constant 0.000000e+00 : f32
    %96 = vector.shape_cast %61 : vector<1x128xf32> to vector<1x128xf32>
    %97 = vector.broadcast %96 : vector<1x128xf32> to vector<1024x128xf32>
    %98 = vector.broadcast %cst_25 : f32 to vector<1024x128xf32>
    %99 = arith.select %95, %97, %98 : vector<1024x128xi1>, vector<1024x128xf32>
    %100 = arith.addf %93, %99 : vector<1024x128xf32>
    %101 = vector.broadcast %77 : vector<1x128xi32> to vector<1024x128xi32>
    %102 = arith.cmpi eq, %80, %101 : vector<1024x128xi32>
    %cst_26 = arith.constant 0.000000e+00 : f32
    %103 = vector.shape_cast %65 : vector<1x128xf32> to vector<1x128xf32>
    %104 = vector.broadcast %103 : vector<1x128xf32> to vector<1024x128xf32>
    %105 = vector.broadcast %cst_26 : f32 to vector<1024x128xf32>
    %106 = arith.select %102, %104, %105 : vector<1024x128xi1>, vector<1024x128xf32>
    %107 = arith.addf %100, %106 : vector<1024x128xf32>
    %108 = arith.truncf %107 : vector<1024x128xf32> to vector<1024x128xbf16>
    %c0_27 = arith.constant 0 : index
    %c0_28 = arith.constant 0 : index
    %109 = vector.load %arg7[%c0_27, %c0_28] : memref<8x128xf32, #tpu.memory_space<vmem>>, vector<8x128xf32>
    %c0_29 = arith.constant 0 : index
    %c0_30 = arith.constant 0 : index
    %c0_31 = arith.constant 0 : index
    %110 = vector.load %arg3[%c0_29, %c0_30, %c0_31] : memref<1x8x1024xbf16, #tpu.memory_space<vmem>>, vector<1x8x1024xbf16>
    %111 = vector.shape_cast %110 : vector<1x8x1024xbf16> to vector<8x1024xbf16>
    %cst_32 = arith.constant dense<0.000000e+00> : vector<8x128xf32>
    %112 = tpu.matmul %111, %108, %cst_32 {dimension_numbers = #tpu.dot_dimension_numbers<[1], [0], [0], [1], [0, 0, 1, 1], [], []>} : vector<8x1024xbf16>, vector<1024x128xbf16>, vector<8x128xf32> -> vector<8x128xf32>
    %113 = arith.addf %109, %112 : vector<8x128xf32>
    %c0_33 = arith.constant 0 : index
    %c0_34 = arith.constant 0 : index
    %114 = vector.load %arg7[%c0_33, %c0_34] : memref<8x128xf32, #tpu.memory_space<vmem>>, vector<8x128xf32>
    tpu.vector_store %arg7[%c0_33, %c0_34], %113 {strides = array<i32>} : memref<8x128xf32, #tpu.memory_space<vmem>>, vector<8x128xf32>,
    %c0_i32_35 = arith.constant 0 : i32
    %115 = arith.cmpi eq, %arg1, %c0_i32_35 : i32
    %116 = arith.extui %115 : i1 to i32
    %c0_i32_36 = arith.constant 0 : i32
    %117 = arith.cmpi ne, %116, %c0_i32_36 : i32
    scf.if %117 {
      %c0_37 = arith.constant 0 : index
      %c0_38 = arith.constant 0 : index
      %118 = vector.load %arg7[%c0_37, %c0_38] : memref<8x128xf32, #tpu.memory_space<vmem>>, vector<8x128xf32>
      %c0_39 = arith.constant 0 : index
      %c0_40 = arith.constant 0 : index
      %c0_41 = arith.constant 0 : index
      %119 = vector.load %arg6[%c0_39, %c0_40, %c0_41] : memref<1x8x128xf32, #tpu.memory_space<vmem>>, vector<1x8x128xf32>
      %120 = vector.shape_cast %119 : vector<1x8x128xf32> to vector<8x128xf32>
      %121 = vector.shape_cast %118 : vector<8x128xf32> to vector<1x8x128xf32>
      tpu.vector_store %arg6[%c0_39, %c0_40, %c0_41], %121 {strides = array<i32>} : memref<1x8x128xf32, #tpu.memory_space<vmem>>, vector<1x8x128xf32>,
    } else {
    }
    return
  }
  func.func @transform_0(%arg0: i32, %arg1: i32) -> (i32, i32, i32) {
    %c0_i32 = arith.constant 0 : i32
    %c0_i32_0 = arith.constant 0 : i32
    %c0_i32_1 = arith.constant 0 : i32
    return %arg0, %c0_i32, %c0_i32_0 : i32, i32, i32
  }
  func.func @transform_1(%arg0: i32, %arg1: i32) -> (i32, i32, i32) {
    %c0_i32 = arith.constant 0 : i32
    %c0_i32_0 = arith.constant 0 : i32
    return %arg0, %c0_i32, %arg1 : i32, i32, i32
  }
  func.func @transform_2(%arg0: i32, %arg1: i32) -> (i32, i32, i32) {
    %c0_i32 = arith.constant 0 : i32
    %c0_i32_0 = arith.constant 0 : i32
    %c0_i32_1 = arith.constant 0 : i32
    return %arg0, %c0_i32, %c0_i32_0 : i32, i32, i32
  }
  func.func @transform_3(%arg0: i32, %arg1: i32) -> (i32, i32) {
    %c0_i32 = arith.constant 0 : i32
    %c0_i32_0 = arith.constant 0 : i32
    %c0_i32_1 = arith.constant 0 : i32
    return %c0_i32, %c0_i32_0 : i32, i32
  }
  func.func @transform_4(%arg0: i32, %arg1: i32) -> (i32, i32, i32) {
    %c0_i32 = arith.constant 0 : i32
    %c0_i32_0 = arith.constant 0 : i32
    %c0_i32_1 = arith.constant 0 : i32
    return %arg0, %c0_i32, %c0_i32_0 : i32, i32, i32
  }
}

</mosaic_0001>

<bundles_post_ra>
// kernel: tpu_custom_call.1
= control target key start
LH: loop header
LB: loop body
LE: loop exit
PB: predicated region body
PF: predicated region fallthrough
CT: control target
= control target key end

     0   :  { %9 = vsyncpa [#allocation4], 0  ;;  %s5500_s0 = inlined_call_operand.hbm [shape: bf16[2,8,256], index: 0, kind: input, shape index: {}]   ;;  %s5501_s1 = inlined_call_operand.hbm [shape: bf16[2,8,1024], index: 1, kind: input, shape index: {}]   ;;  %s5502_s2 = inlined_call_operand.vmem [shape: f32[2,2,128], index: 2, kind: input, shape index: {}]   ;;  %s5503_s3 = inlined_call_operand.vmem [shape: f32[8,1], index: 3, kind: input, shape index: {}]   ;;  %s5504_s4 = inlined_call_operand.hbm [shape: f32[2,8,128], index: 4, kind: output, shape index: {}]  }
   0x1   :  { %11 = vsyncpa [#allocation4 + $0x1], 0 }
   0x2   :  { %12 = vsyncpa [#allocation7], 0 }
   0x3   :  { %14 = vsyncpa [#allocation7 + $0x1], 0 }
   0x4   :  { %15 = vsyncpa [#allocation5], 0 }
   0x5   :  { %17 = vsyncpa [#allocation5 + $0x1], 0  ;;  %s3366_s15 = smov 0   ;;  %s3368_s16 = smov 0  }
   0x6   :  { %s3370_s17 = smov 0   ;;  %s3372_s18 = smov 0  }
   0x7   :  { %s3374_s19 = smov 0   ;;  %s3376_s20 = smov 0  }
   0x8 LB: > { %s2963_s21 = sadd.s32 4294967295, %s3335_s20   ;;  %s2964_s22 = sadd.s32 4294967294, %s3335_s20   ;;  %s3335_s20 = sphi %s3376_s20, %s23_s20   ;;  %s3331_s19 = sphi %s3374_s19, %s5534_s19   ;;  %s3327_s18 = sphi %s3372_s18, %s5533_s18   ;;  %s3323_s17 = sphi %s3370_s17, %s5532_s17   ;;  %s3319_s16 = sphi %s3368_s16, %s5531_s16   ;;  %s3315_s15 = sphi %s3366_s15, %s5530_s15  }
   0x9   : > { %s35_s23 = sadd.s32 1, %s3331_s19  ;;  %s42_s24 = sadd.s32 1, %s3323_s17 }
   0xa   : > { %p37_p0 = scmp.ge.s32.totalorder %s35_s23, 2  ;;  %p49_p1 = scmp.ne.s32.totalorder %s3323_s17, %s3319_s16 }
   0xb   : > { %p50_p2 = scmp.eq.s32.totalorder %s3335_s20, 0  ;;  %p55_p3 = scmp.ne.s32.totalorder %s3319_s16, %s3315_s15 }
   0xc   : > { %s5536_s23 = smov (%p37_p0, %s35_s23), 0  ;;  %p56_p5 = scmp.eq.s32.totalorder %s2963_s21, 0 }
   0xd   : > { %p3407_p4 = por %p50_p2, %p49_p1  ;;  %s39_s26 = ssub.s32 %s3331_s19, %s5536_s23 }
   0xe   : > { %p154_p6 = scmp.eq.s32.totalorder %s2963_s21, 1  ;;  %p40_p7 = scmp.eq.s32.totalorder %s39_s26, 0 }
   0xf   : > { %p3413_p8 = por %p56_p5, %p55_p3  ;;  %p160_p10 = scmp.eq.s32.totalorder %s2964_s22, 1 }
  0x10   : > { %p3417_p9 = por %p154_p6, %p49_p1  ;;  %p3127_p13 = scmp.lt.s32.totalorder %s3335_s20, 2 }
  0x11   : > { %s5508_s27 = scalar_select %p3413_p8, 1, 0 }
  0x12   : > { %s5509_s28 = scalar_select %p3417_p9, 1, 0 }
  0x13   : > { %s3422_s29 = scalar_select %p40_p7, %s3323_s17, %s42_s24  }
  0x14   : > { %p3424_p11 = por %p160_p10, %p55_p3  ;;  %s3431_s5 = sand.u32 1, %s3323_s17  }
  0x15   : > { %s2967_s6 = sshll.u32 %s3431_s5, 3  ;;  %s2994_s7 = sshll.u32 %s3331_s19, 7 }
  0x16   : > { %s5510_s30 = scalar_select %p3424_p11, 1, 0 }
  0x17   : > { %s3438_s10 = scalar_lea.hbm %s5500_s0, %s2994_s7  ;;  %s187_s11 = scalar_lea.vmem [#allocation3], %s2967_s6 }
  0x18   : > { %s195_s12 = sshll.u32 %s187_s11, 4  ;;  %p3444_p0 = pnand %p3127_p13, %p3407_p4  ;;  %s3440_s12 = int_to_ptr.vmem [resolvable:$true] %s195_s12 }
  0x19   : > { %s184_s14 = scalar_lea.sflag [#allocation4], %s3431_s5  ;;  %s3189_s21 = scalar_lea.hbm %s3438_s10, 128 }
  0x1a   : > { %p3190_p3 = scmp.ne.s32.totalorder %s3438_s10, %s3189_s21  ;;  %p3191_p5 = pneg %p3444_p0 }
  0x1b   : > { %s3194_s25 = scalar_lea.hbm %s5500_s0, 256  ;;  %p3195_p4 = scmp.lt.u32.totalorder %s3438_s10, %s5500_s0 }
  0x1c   : > { %p3192_p6 = pnand %p3191_p5, %p3190_p3  ;;  %p3196_p10 = scmp.lt.u32.totalorder %s3194_s25, %s3189_s21 }
  0x1d   : > { %p3198_p12 = scmp.lt.u32.totalorder %s3189_s21, %s3438_s10 }
  0x1e   : > { %p3193_p7 = pneg %p3192_p6  ;;  %p3197_p13 = por %p3196_p10, %p3195_p4 }
  0x20   : > { %p3199_p1 = por %p3198_p12, %p3197_p13 }
  0x22   : > { %p3200_p2 = pnand %p3199_p1, %p3193_p7 }
  0x24   : > { %3203 = shalt.err (!%p3200_p2)
}
  0x25   : > { %s3204_s7 = scalar_lea.vmem %s3440_s12, 128  ;;  %s3337_s8 = smov [#allocation3]  }
  0x26   : > { %p3205_p3 = scmp.ne.s32.totalorder %s3440_s12, %s3204_s7  ;;  %s3209_s9 = sshll.u32 %s3337_s8, 4  ;;  %s3210_s9 = int_to_ptr.vmem [resolvable:$false] %s3209_s9 }
  0x27   : > { %s3211_s11 = scalar_lea.vmem %s3210_s9, 256  ;;  %p3212_p9 = scmp.lt.s32.totalorder %s3440_s12, %s3210_s9 }
  0x28   : > { %p3207_p6 = pnand %p3205_p3, %p3191_p5  ;;  %p3213_p4 = scmp.lt.s32.totalorder %s3211_s11, %s3204_s7 }
  0x2a   : > { %p3208_p11 = pneg %p3207_p6  ;;  %p3214_p10 = por %p3213_p4, %p3212_p9 }
  0x2c   : > { %p3215_p12 = pnand %p3214_p10, %p3208_p11 }
  0x2e   : > { %3218 = shalt.err (!%p3215_p12)
}
  0x2f   : > { %3119 = dma.hbm_to_vmem [thread:$0]  (!%p3444_p0), %s3438_s10, 128, %s3440_s12, %s184_s14  }
  0x30   : > { %p5512_p1 = scmp.lt.s32.totalorder %s3335_s20, 3  ;;  %p5513_p2 = scmp.ge.s32.totalorder %s3335_s20, 1 }
  0x31   : > { %s2970_s22 = sshll.u32 %s3431_s5, 5  ;;  %s2995_s24 = sshll.u32 %s3331_s19, 9 }
  0x32   : > { %p3480_p7 = pnand %p5513_p2, %p5512_p1  ;;  %s3489_s6 = scalar_lea.hbm %s5501_s1, %s2995_s24 }
  0x33   : > { %s206_s7 = scalar_lea.vmem [#allocation6], %s2970_s22  ;;  %s203_s10 = scalar_lea.sflag [#allocation7], %s3431_s5 }
  0x34   : > { %s5514_s21 = scalar_select %p3480_p7, 1, 0 }
  0x35   : > { %s216_s8 = sshll.u32 %s206_s7, 4  ;;  %s3219_s12 = scalar_lea.hbm %s3489_s6, 512  ;;  %s217_s8 = int_to_ptr.vmem [resolvable:$true] %s216_s8 }
  0x36   : > { %p3220_p9 = scmp.ne.s32.totalorder %s3489_s6, %s3219_s12  ;;  %s3224_s11 = scalar_lea.hbm %s5501_s1, 1024 }
  0x37   : > { %p3225_p3 = scmp.lt.u32.totalorder %s3489_s6, %s5501_s1  ;;  %p3226_p6 = scmp.lt.u32.totalorder %s3224_s11, %s3219_s12 }
  0x38   : > { %p3222_p11 = pnand %p3220_p9, %p3191_p5  ;;  %p3228_p10 = scmp.lt.u32.totalorder %s3219_s12, %s3489_s6 }
  0x39   : > { %p3227_p4 = por %p3226_p6, %p3225_p3 }
  0x3a   : > { %p3223_p13 = pneg %p3222_p11 }
  0x3b   : > { %p3229_p12 = por %p3228_p10, %p3227_p4 }
  0x3d   : > { %p3230_p1 = pnand %p3229_p12, %p3223_p13 }
  0x3f   : > { %3233 = shalt.err (!%p3230_p1)
}
  0x40   : > { %s3234_s5 = scalar_lea.vmem %s217_s8, 512  ;;  %s3338_s22 = smov [#allocation6]  }
  0x41   : > { %p3235_p2 = scmp.ne.s32.totalorder %s217_s8, %s3234_s5  ;;  %s3239_s26 = sshll.u32 %s3338_s22, 4  ;;  %s3240_s26 = int_to_ptr.vmem [resolvable:$false] %s3239_s26 }
  0x42   : > { %s3241_s7 = scalar_lea.vmem %s3240_s26, 1024  ;;  %p3242_p8 = scmp.lt.s32.totalorder %s217_s8, %s3240_s26 }
  0x43   : > { %p3237_p9 = pnand %p3235_p2, %p3191_p5  ;;  %p3243_p7 = scmp.lt.s32.totalorder %s3241_s7, %s3234_s5 }
  0x45   : > { %p3238_p11 = pneg %p3237_p9  ;;  %p3244_p3 = por %p3243_p7, %p3242_p8 }
  0x47   : > { %p3245_p6 = pnand %p3244_p3, %p3238_p11 }
  0x49   : > { %3248 = shalt.err (!%p3245_p6)
}
  0x4a   : > { %3122 = dma.hbm_to_vmem [thread:$0]  (!%p3444_p0), %s3489_s6, 512, %s217_s8, %s203_s10  }
  0x4b   : > { %p5515_p13 = scmp.ne.s32.totalorder %s5514_s21, 0 }
  0x4c   : > { %s3514_s12 = sand.u32 (!%p5515_p13), 1, %s3319_s16   ;;  %p5516_p8 = scmp.ne.s32.totalorder (!%p5515_p13), %s5508_s27, 0 }
  0x4d   : > { %232 = sbr.rel (%p5515_p13) target bundleno = 852 (0x354), region = 36  ;;  %s2974_s14 = sshll.u32 (!%p5515_p13), %s3514_s12, 3 }
  0x4e   : > { %s235_s9 = scalar_lea.sflag (!%p5515_p13), [#allocation4], %s3514_s12  ;;  %s3520_s11 = scalar_lea.vmem (!%p5515_p13), [#allocation3], %s2974_s14 }
  0x54   : > { %3302 = dma.done.wait (%p5516_p8), %s235_s9, 128  }
  0x55   : > { %3304 = vsyncadd (%p5516_p8), %s235_s9, 4294967168  ;;  %s2975_s13 = sshll.u32 %s3514_s12, 5  ;;  %s244_s21 = scalar_lea.sflag [#allocation7], %s3514_s12 }
  0x56   : > { %s3528_s6 = scalar_lea.vmem [#allocation6], %s2975_s13 }
  0x57   : > { %3306 = dma.done.wait (%p5516_p8), %s244_s21, 512  }
  0x58   : > { %3308 = vsyncadd (%p5516_p8), %s244_s21, 4294966784  ;;  %p282_p0 = scmp.lt.s32.totalorder %s3327_s18, 1  ;;  %v337_v0 = vlaneseq  ;;  %v3339_v1 = vmov 0   ;;  %s2991_s26 = sshll.u32 %s3327_s18, 7 }
  0x59   : > { %3178 = vset.pattern.permute.xlu0 %v3339_v1  ;;  %s280_s7 = scalar_lea.vmem [#allocation8], %s2974_s14  ;;  %s5451_s21 = scalar_lea.hbm %s5504_s4, %s2991_s26 }
  0x5a   : > { %s283_s8 = scalar_select %p282_p0, %s3327_s18, 1  ;;  %v3537_v2 = vshrl.u32 %v337_v0, 7 }
  0x5b   : > { %s2847_s9 = sshll.u32 %s280_s7, 4  ;;  %p5527_p7 = scmp.ne.s32.totalorder %s5509_s28, 0  ;;  %s5453_s9 = int_to_ptr.vmem [resolvable:$true] %s2847_s9 }
  0x5c   : > { %s2977_s10 = sshll.u32 %s283_s8, 1  ;;  %v3543_v5 = vsub.s32 1, %v3537_v2  ;;  %v3546_v7 = vsub.s32 0, %v3537_v2  ;;  %v3549_v8 = vadd.s32 128, %v3537_v2  ;;  %v3552_v9 = vadd.s32 136, %v3537_v2  ;;  %s3249_s8 = scalar_lea.vmem %s5453_s9, 128 }
  0x5d   : > { %s285_s5 = scalar_lea.vmem %s5502_s2, %s2977_s10  ;;  %v3555_v10 = vadd.s32 8, %v3537_v2  ;;  %v3558_v13 = vadd.s32 144, %v3537_v2  ;;  %v3561_v14 = vadd.s32 152, %v3537_v2  ;;  %v3564_v15 = vadd.s32 16, %v3537_v2  ;;  %p3250_p5 = scmp.ne.s32.totalorder %s5453_s9, %s3249_s8 }
  0x5e   : > { %v287_v3 = vld [vmem:[%s285_s5] sm:$0x3]  ;;  %v3567_v16 = vadd.s32 24, %v3537_v2  ;;  %v3570_v17 = vadd.s32 160, %v3537_v2  ;;  %v3573_v18 = vadd.s32 168, %v3537_v2  ;;  %v3576_v21 = vadd.s32 32, %v3537_v2 }
  0x5f   : > { %v292_v4 = vmul.f32 16.0, %v287_v3  ;;  %v826_v6 = vmul.f32 32.0, %v287_v3  ;;  %v3579_v22 = vadd.s32 40, %v3537_v2  ;;  %v3582_v23 = vadd.s32 176, %v3537_v2  ;;  %p3251_p4 = pnand %p3250_p5, %p5527_p7  ;;  %s3340_s18 = smov [#allocation8]  }
  0x60   : > { %v3585_v24 = vadd.s32 184, %v3537_v2  ;;  %v3588_v25 = vadd.s32 48, %v3537_v2  ;;  %v3591_v26 = vadd.s32 56, %v3537_v2  ;;  %v3596_v31 = vadd.s32 192, %v3537_v2  ;;  %s3253_s14 = sshll.u32 %s3340_s18, 4  ;;  %s3254_s14 = int_to_ptr.vmem [resolvable:$false] %s3253_s14 }
  0x61   : > { %v2978_v11 = vadd.f32 -0.5, %v292_v4  ;;  %v2981_v12 = vadd.f32 -0.5, %v826_v6  ;;  %v3599_v32 = vadd.s32 200, %v3537_v2  ;;  %v3602_v33 = vadd.s32 64, %v3537_v2  ;;  %p3252_p10 = pneg %p3251_p4  ;;  %s3255_s10 = scalar_lea.vmem %s3254_s14, 256 }
  0x62   : > { %v3605_v34 = vadd.s32 72, %v3537_v2  ;;  %v3612_v41 = vadd.s32 208, %v3537_v2  ;;  %v3615_v42 = vadd.s32 216, %v3537_v2  ;;  %p3256_p12 = scmp.lt.s32.totalorder %s5453_s9, %s3254_s14  ;;  %p3257_p1 = scmp.lt.s32.totalorder %s3255_s10, %s3249_s8 }
  0x63   : > { %v294_v19 = vfloor.f32 %v2978_v11  ;;  %v828_v20 = vfloor.f32 %v2981_v12 }
  0x64   : > { %p3258_p2 = por %p3257_p1, %p3256_p12 }
  0x65   : > { %v295_v27 = vsub.f32 %v2978_v11, %v294_v19  ;;  %v3106_v28 = vtrunc.f32 %v294_v19  ;;  %v3593_v29 = vsub.f32 %v2981_v12, %v828_v20  ;;  %v3108_v30 = vtrunc.f32 %v828_v20 }
  0x66   : > { %p3259_p9 = pnand %p3258_p2, %p3252_p10 }
  0x67   : > { %v296_v35 = vsub.f32 1.0, %v295_v27  ;;  %v3107_v36 = vcvt.f32.s32 %v3106_v28  ;;  %v322_v37 = vrot.slane %v295_v27, 1  ;;  %v830_v38 = vsub.f32 1.0, %v3593_v29 }
  0x68   : > { %v3608_v39 = vcvt.f32.s32 %v3108_v30  ;;  %v856_v40 = vrot.slane %v3593_v29, 1 }
  0x69   : > { %v298_v43 = vadd.s32 1, %v3107_v36  ;;  %vm299_vm0 = vcmp.ge.s32.totalorder %v3107_v36, 0  ;;  %vm300_vm1 = vcmp.le.s32.totalorder %v3107_v36, 15  ;;  %v310_v44 = vrot.slane %v296_v35, 1 }
  0x6a   : > { %vm3617_vm2 = vmand %vm299_vm0, %vm300_vm1  ;;  %v324_v46 = vmul.f32 %v322_v37, %v296_v35  ;;  %v327_v47 = vmul.f32 %v322_v37, %v295_v27  ;;  %v329_v48 = vmul.u32 16, %v3107_v36  ;;  %v330_v49 = vrot.slane %v3107_v36, 7 }
  0x6b   : > { %vm302_vm3 = vcmp.ge.s32.totalorder %v298_v43, 0  ;;  %vm303_vm4 = vcmp.le.s32.totalorder %v298_v43, 15  ;;  %v305_v50 = vsel %vm3617_vm2, 1, %v3339_v1  ;;  %v312_v51 = vmul.f32 %v310_v44, %v296_v35 }
  0x6c   : > { %vm3624_vm5 = vmand %vm302_vm3, %vm303_vm4  ;;  %v306_v53 = vrot.slane %v305_v50, 1  ;;  %v315_v54 = vmul.f32 %v310_v44, %v295_v27  ;;  %v331_v55 = vadd.s32 %v330_v49, %v329_v48  ;;  %v332_v56 = vrot.slane %v298_v43, 7 }
  0x6d   : > { %v317_v57 = vsel %vm3624_vm5, 1, %v3339_v1  ;;  %v334_v58 = vmul.u32 16, %v298_v43  ;;  %v832_v59 = vadd.s32 1, %v3608_v39  ;;  %vm833_vm6 = vcmp.ge.s32.totalorder %v3608_v39, 0 }
  0x6e   : > { %vm307_vm7 = vcmp.ne.s32.totalorder %v306_v53, 0  ;;  %v318_v60 = vrot.slane %v317_v57, 1  ;;  %v333_v61 = vadd.s32 %v332_v56, %v329_v48  ;;  %v3634_v62 = vrot.slane %v331_v55, %v3543_v5 }
  0x6f   : > { %vm308_vm8 = vmand %vm3617_vm2, %vm307_vm7  ;;  %v335_v63 = vadd.s32 %v334_v58, %v330_v49  ;;  %v336_v0 = vadd.s32 %v334_v58, %v332_v56  ;;  %vm834_vm9 = vcmp.le.s32.totalorder %v3608_v39, 31  ;;  %vm836_vm10 = vcmp.ge.s32.totalorder %v832_v59, 0 }
  0x70   : > { %v313_v3 = vsel %vm308_vm8, %v312_v51, 0.0  ;;  %vm314_vm11 = vmand %vm3624_vm5, %vm307_vm7  ;;  %vm319_vm12 = vcmp.ne.s32.totalorder %v318_v60, 0  ;;  %v3642_v4 = vrot.slane %v333_v61, %v3543_v5  ;;  %vm837_vm13 = vcmp.le.s32.totalorder %v832_v59, 31 }
  0x71   : > { %v316_v6 = vsel %vm314_vm11, %v315_v54, 0.0  ;;  %vm320_vm14 = vmand %vm3617_vm2, %vm319_vm12  ;;  %v3647_v11 = vrot.slane %v313_v3, %v3546_v7  ;;  %v3650_v12 = vrot.slane %v335_v63, %v3543_v5  ;;  %v3653_v19 = vrot.slane %v336_v0, %v3543_v5 }
  0x72   : > { %v325_v20 = vsel %vm320_vm14, %v324_v46, 0.0  ;;  %vm326_vm15 = vmand %vm3624_vm5, %vm319_vm12  ;;  %v3658_v27 = vrot.slane %v316_v6, %v3546_v7  ;;  %v844_v28 = vrot.slane %v830_v38, 1  ;;  %v858_v30 = vmul.f32 %v856_v40, %v830_v38 }
  0x73   : > { %v328_v35 = vsel %vm326_vm15, %v327_v47, 0.0  ;;  %v3661_v36 = vrot.slane %v325_v20, %v3546_v7  ;;  %vm3667_vm0 = vmand %vm833_vm6, %vm834_vm9  ;;  %v861_v43 = vmul.f32 %v856_v40, %v3593_v29  ;;  %v863_v44 = vmul.u32 32, %v3608_v39 }
  0x74   : > { %v3674_v45 = vrot.slane %v328_v35, %v3546_v7  ;;  %vm3678_vm1 = vmand %vm836_vm10, %vm837_vm13  ;;  %v839_v47 = vsel %vm3667_vm0, 1, %v3339_v1  ;;  %v846_v48 = vmul.f32 %v844_v28, %v830_v38  ;;  %v849_v49 = vmul.f32 %v844_v28, %v3593_v29 }
  0x75   : > { %v840_v50 = vrot.slane %v839_v47, 1  ;;  %v851_v40 = vsel %vm3678_vm1, 1, %v3339_v1  ;;  %v864_v51 = vrot.slane %v3608_v39, 7  ;;  %v866_v52 = vrot.slane %v832_v59, 7 }
  0x76   : > { %v852_v53 = vrot.slane %v851_v40, 1  ;;  %v868_v54 = vmul.u32 32, %v832_v59  ;;  %vm390_vm2 = vcmp.eq.s32.totalorder %v3549_v8, %v3634_v62  ;;  %vm391_vm3 = vcmp.eq.s32.totalorder %v3552_v9, %v3634_v62 }
  0x77   : > { %vm841_vm4 = vcmp.ne.s32.totalorder %v840_v50, 0  ;;  %v865_v38 = vadd.s32 %v864_v51, %v863_v44  ;;  %v867_v55 = vadd.s32 %v866_v52, %v863_v44  ;;  %v426_v29 = vsel %vm390_vm2, %v3647_v11, 0.0 }
  0x78   : > { %vm842_vm5 = vmand %vm3667_vm0, %vm841_vm4  ;;  %vm3697_vm6 = vcmp.ne.s32.totalorder %v852_v53, 0  ;;  %v869_v39 = vadd.s32 %v868_v54, %v864_v51  ;;  %v870_v56 = vadd.s32 %v868_v54, %v866_v52  ;;  %v427_v57 = vsel %vm391_vm3, %v3647_v11, 0.0 }
  0x79   : > { %v847_v58 = vsel %vm842_vm5, %v846_v48, 0.0  ;;  %vm848_vm7 = vmand %vm3678_vm1, %vm841_vm4  ;;  %v3705_v59 = vrot.slane %v865_v38, %v3543_v5  ;;  %v3708_v60 = vrot.slane %v867_v55, %v3543_v5  ;;  %vm462_vm8 = vcmp.eq.s32.totalorder %v3549_v8, %v3642_v4 }
  0x7a   : > { %v850_v61 = vsel %vm848_vm7, %v849_v49, 0.0  ;;  %vm854_vm9 = vmand %vm3667_vm0, %vm3697_vm6  ;;  %v3717_v63 = vrot.slane %v847_v58, %v3546_v7  ;;  %v3720_v0 = vrot.slane %v869_v39, %v3543_v5  ;;  %v3723_v3 = vrot.slane %v870_v56, %v3543_v5 }
  0x7b   : > { %v859_v6 = vsel %vm854_vm9, %v858_v30, 0.0  ;;  %vm860_vm10 = vmand %vm3678_vm1, %vm3697_vm6  ;;  %v3730_v20 = vrot.slane %v850_v61, %v3546_v7  ;;  %vm463_vm11 = vcmp.eq.s32.totalorder %v3552_v9, %v3642_v4  ;;  %v498_v28 = vsel %vm462_vm8, %v3658_v27, 0.0 }
  0x7c   : > { %v862_v35 = vsel %vm860_vm10, %v861_v43, 0.0  ;;  %v3736_v37 = vrot.slane %v859_v6, %v3546_v7  ;;  %v499_v5 = vsel %vm463_vm11, %v3658_v27, 0.0  ;;  %v530_v30 = vadd.f32 %v498_v28, %v426_v29 }
  0x7d   : > { %v3740_v44 = vrot.slane %v862_v35, %v3546_v7  ;;  %v531_v46 = vadd.f32 %v499_v5, %v427_v57  ;;  %vm566_vm12 = vcmp.eq.s32.totalorder %v3549_v8, %v3650_v12  ;;  %vm567_vm13 = vcmp.eq.s32.totalorder %v3552_v9, %v3650_v12 }
  0x7e   : > { %v602_v47 = vsel %vm566_vm12, %v3661_v36, 0.0  ;;  %v603_v43 = vsel %vm567_vm13, %v3661_v36, 0.0  ;;  %vm670_vm14 = vcmp.eq.s32.totalorder %v3549_v8, %v3653_v19  ;;  %vm671_vm15 = vcmp.eq.s32.totalorder %v3552_v9, %v3653_v19 }
  0x7f   : > { %v634_v48 = vadd.f32 %v602_v47, %v530_v30  ;;  %v635_v7 = vadd.f32 %v603_v43, %v531_v46  ;;  %v706_v49 = vsel %vm670_vm14, %v3674_v45, 0.0  ;;  %v707_v50 = vsel %vm671_vm15, %v3674_v45, 0.0 }
  0x80   : > { %vm374_vm0 = vcmp.eq.s32.totalorder %v3537_v2, %v3634_v62  ;;  %vm375_vm1 = vcmp.eq.s32.totalorder %v3555_v10, %v3634_v62  ;;  %vm446_vm2 = vcmp.eq.s32.totalorder %v3537_v2, %v3642_v4  ;;  %vm447_vm3 = vcmp.eq.s32.totalorder %v3555_v10, %v3642_v4 }
  0x81   : > { %v738_v40 = vadd.f32 %v706_v49, %v634_v48  ;;  %v739_v51 = vadd.f32 %v707_v50, %v635_v7  ;;  %v410_v52 = vsel %vm374_vm0, %v3647_v11, 0.0  ;;  %v411_v53 = vsel %vm375_vm1, %v3647_v11, 0.0 }
  0x82   : > { %v482_v54 = vsel %vm446_vm2, %v3658_v27, 0.0  ;;  %v483_v38 = vsel %vm447_vm3, %v3658_v27, 0.0  ;;  %vm550_vm4 = vcmp.eq.s32.totalorder %v3537_v2, %v3650_v12  ;;  %vm551_vm5 = vcmp.eq.s32.totalorder %v3555_v10, %v3650_v12 }
  0x83   : > { %v762_v55 = vpack.c.bf16 %v739_v51, %v738_v40  ;;  %v514_v29 = vadd.f32 %v482_v54, %v410_v52  ;;  %v515_v1 = vadd.f32 %v483_v38, %v411_v53  ;;  %v586_v39 = vsel %vm550_vm4, %v3661_v36, 0.0 }
  0x84   : > { %v587_v56 = vsel %vm551_vm5, %v3661_v36, 0.0  ;;  %vm654_vm6 = vcmp.eq.s32.totalorder %v3537_v2, %v3653_v19  ;;  %vm655_vm7 = vcmp.eq.s32.totalorder %v3555_v10, %v3653_v19  ;;  %vm1149_vm8 = vcmp.eq.s32.totalorder %v3549_v8, %v3705_v59 }
  0x85   : > { %2996 = vmatprep.subr.bf16.mxu0 %v762_v55  ;;  %v618_v57 = vadd.f32 %v586_v39, %v514_v29  ;;  %v619_v58 = vadd.f32 %v587_v56, %v515_v1  ;;  %v690_v61 = vsel %vm654_vm6, %v3674_v45, 0.0  ;;  %v691_v6 = vsel %vm655_vm7, %v3674_v45, 0.0 }
  0x86   : > { %vm1150_vm9 = vcmp.eq.s32.totalorder %v3552_v9, %v3705_v59  ;;  %v1281_v28 = vsel %vm1149_vm8, %v3717_v63, 0.0  ;;  %vm1413_vm10 = vcmp.eq.s32.totalorder %v3549_v8, %v3708_v60  ;;  %vm1414_vm11 = vcmp.eq.s32.totalorder %v3552_v9, %v3708_v60 }
  0x87   : > { %v722_v35 = vadd.f32 %v690_v61, %v618_v57  ;;  %v723_v5 = vadd.f32 %v691_v6, %v619_v58  ;;  %v1282_v30 = vsel %vm1150_vm9, %v3717_v63, 0.0  ;;  %v1545_v46 = vsel %vm1413_vm10, %v3730_v20, 0.0 }
  0x88   : > { %v1546_v47 = vsel %vm1414_vm11, %v3730_v20, 0.0  ;;  %v1673_v43 = vadd.f32 %v1545_v46, %v1281_v28  ;;  %vm1805_vm12 = vcmp.eq.s32.totalorder %v3549_v8, %v3720_v0  ;;  %vm1806_vm13 = vcmp.eq.s32.totalorder %v3552_v9, %v3720_v0 }
  0x89   : > { %v754_v48 = vpack.c.bf16 %v723_v5, %v722_v35  ;;  %v1674_v7 = vadd.f32 %v1546_v47, %v1282_v30  ;;  %v1937_v49 = vsel %vm1805_vm12, %v3736_v37, 0.0  ;;  %v1938_v50 = vsel %vm1806_vm13, %v3736_v37, 0.0 }
  0x8a   : > { %v2065_v40 = vadd.f32 %v1937_v49, %v1673_v43  ;;  %vm2197_vm14 = vcmp.eq.s32.totalorder %v3549_v8, %v3723_v3  ;;  %vm2198_vm15 = vcmp.eq.s32.totalorder %v3552_v9, %v3723_v3  ;;  %vm1133_vm0 = vcmp.eq.s32.totalorder %v3537_v2, %v3705_v59 }
  0x8b   : > { %2997 = vmatpush3.bf16.msra.mxu0 %v754_v48  ;;  %v2066_v51 = vadd.f32 %v1938_v50, %v1674_v7  ;;  %v2329_v52 = vsel %vm2197_vm14, %v3740_v44, 0.0  ;;  %v2330_v53 = vsel %vm2198_vm15, %v3740_v44, 0.0  ;;  %vm1134_vm1 = vcmp.eq.s32.totalorder %v3555_v10, %v3705_v59 }
  0x8c   : > { %v2457_v54 = vadd.f32 %v2329_v52, %v2065_v40  ;;  %v1265_v38 = vsel %vm1133_vm0, %v3717_v63, 0.0  ;;  %v1266_v8 = vsel %vm1134_vm1, %v3717_v63, 0.0  ;;  %vm1397_vm2 = vcmp.eq.s32.totalorder %v3537_v2, %v3708_v60 }
  0x8d   : > { %v2458_v9 = vadd.f32 %v2330_v53, %v2066_v51  ;;  %vm1398_vm3 = vcmp.eq.s32.totalorder %v3555_v10, %v3708_v60  ;;  %v1529_v55 = vsel %vm1397_vm2, %v3730_v20, 0.0  ;;  %vm1789_vm4 = vcmp.eq.s32.totalorder %v3537_v2, %v3720_v0 }
  0x8e   : > { %v1530_v29 = vsel %vm1398_vm3, %v3730_v20, 0.0  ;;  %v1657_v1 = vadd.f32 %v1529_v55, %v1265_v38  ;;  %vm1790_vm5 = vcmp.eq.s32.totalorder %v3555_v10, %v3720_v0  ;;  %v1921_v39 = vsel %vm1789_vm4, %v3736_v37, 0.0 }
  0x8f   : > { %v2577_v56 = vpack.c.bf16 %v2458_v9, %v2457_v54  ;;  %v1658_v57 = vadd.f32 %v1530_v29, %v1266_v8  ;;  %v1922_v58 = vsel %vm1790_vm5, %v3736_v37, 0.0  ;;  %vm2181_vm6 = vcmp.eq.s32.totalorder %v3537_v2, %v3723_v3 }
  0x90   : > { %v2049_v61 = vadd.f32 %v1921_v39, %v1657_v1  ;;  %vm2182_vm7 = vcmp.eq.s32.totalorder %v3555_v10, %v3723_v3  ;;  %v2313_v6 = vsel %vm2181_vm6, %v3740_v44, 0.0  ;;  %vm392_vm8 = vcmp.eq.s32.totalorder %v3558_v13, %v3634_v62 }
  0x91   : > { %3018 = vmatprep.subr.bf16.mxu1 %v2577_v56  ;;  %v2050_v28 = vadd.f32 %v1922_v58, %v1658_v57  ;;  %v2314_v35 = vsel %vm2182_vm7, %v3740_v44, 0.0  ;;  %vm393_vm9 = vcmp.eq.s32.totalorder %v3561_v14, %v3634_v62  ;;  %v428_v5 = vsel %vm392_vm8, %v3647_v11, 0.0 }
  0x92   : > { %v2441_v30 = vadd.f32 %v2313_v6, %v2049_v61  ;;  %v429_v46 = vsel %vm393_vm9, %v3647_v11, 0.0  ;;  %vm464_vm10 = vcmp.eq.s32.totalorder %v3558_v13, %v3642_v4  ;;  %vm465_vm11 = vcmp.eq.s32.totalorder %v3561_v14, %v3642_v4 }
  0x93   : > { %v2442_v10 = vadd.f32 %v2314_v35, %v2050_v28  ;;  %v500_v47 = vsel %vm464_vm10, %v3658_v27, 0.0  ;;  %v501_v43 = vsel %vm465_vm11, %v3658_v27, 0.0  ;;  %vm568_vm12 = vcmp.eq.s32.totalorder %v3558_v13, %v3650_v12 }
  0x94   : > { %v532_v48 = vadd.f32 %v500_v47, %v428_v5  ;;  %v533_v7 = vadd.f32 %v501_v43, %v429_v46  ;;  %vm569_vm13 = vcmp.eq.s32.totalorder %v3561_v14, %v3650_v12  ;;  %v604_v49 = vsel %vm568_vm12, %v3661_v36, 0.0 }
  0x95   : > { %v2569_v50 = vpack.c.bf16 %v2442_v10, %v2441_v30  ;;  %v605_v40 = vsel %vm569_vm13, %v3661_v36, 0.0  ;;  %vm672_vm14 = vcmp.eq.s32.totalorder %v3558_v13, %v3653_v19  ;;  %vm673_vm15 = vcmp.eq.s32.totalorder %v3561_v14, %v3653_v19 }
  0x96   : > { %v636_v51 = vadd.f32 %v604_v49, %v532_v48  ;;  %v637_v52 = vadd.f32 %v605_v40, %v533_v7  ;;  %v708_v53 = vsel %vm672_vm14, %v3674_v45, 0.0  ;;  %v709_v54 = vsel %vm673_vm15, %v3674_v45, 0.0 }
  0x97   : > { %3019 = vmatpush3.bf16.msra.mxu1 %v2569_v50  ;;  %vm376_vm0 = vcmp.eq.s32.totalorder %v3564_v15, %v3634_v62  ;;  %vm377_vm1 = vcmp.eq.s32.totalorder %v3567_v16, %v3634_v62  ;;  %vm448_vm2 = vcmp.eq.s32.totalorder %v3564_v15, %v3642_v4  ;;  %vm449_vm3 = vcmp.eq.s32.totalorder %v3567_v16, %v3642_v4 }
  0x98   : > { %v740_v38 = vadd.f32 %v708_v53, %v636_v51  ;;  %v741_v8 = vadd.f32 %v709_v54, %v637_v52  ;;  %v412_v9 = vsel %vm376_vm0, %v3647_v11, 0.0  ;;  %v413_v55 = vsel %vm377_vm1, %v3647_v11, 0.0 }
  0x99   : > { %v484_v29 = vsel %vm448_vm2, %v3658_v27, 0.0  ;;  %v485_v1 = vsel %vm449_vm3, %v3658_v27, 0.0  ;;  %vm552_vm4 = vcmp.eq.s32.totalorder %v3564_v15, %v3650_v12  ;;  %vm553_vm5 = vcmp.eq.s32.totalorder %v3567_v16, %v3650_v12 }
  0x9a   : > { %v763_v39 = vpack.c.bf16 %v741_v8, %v740_v38  ;;  %v516_v56 = vadd.f32 %v484_v29, %v412_v9  ;;  %v517_v57 = vadd.f32 %v485_v1, %v413_v55  ;;  %v588_v58 = vsel %vm552_vm4, %v3661_v36, 0.0 }
  0x9b   : > { %v589_v61 = vsel %vm553_vm5, %v3661_v36, 0.0  ;;  %vm656_vm6 = vcmp.eq.s32.totalorder %v3564_v15, %v3653_v19  ;;  %vm657_vm7 = vcmp.eq.s32.totalorder %v3567_v16, %v3653_v19  ;;  %vm1151_vm8 = vcmp.eq.s32.totalorder %v3558_v13, %v3705_v59 }
  0x9c   : > { %2998 = vmatprep.subr.bf16.mxu0 %v763_v39  ;;  %v620_v6 = vadd.f32 %v588_v58, %v516_v56  ;;  %v621_v28 = vadd.f32 %v589_v61, %v517_v57  ;;  %v692_v35 = vsel %vm656_vm6, %v3674_v45, 0.0  ;;  %v693_v5 = vsel %vm657_vm7, %v3674_v45, 0.0 }
  0x9d   : > { %vm1152_vm9 = vcmp.eq.s32.totalorder %v3561_v14, %v3705_v59  ;;  %v1283_v30 = vsel %vm1151_vm8, %v3717_v63, 0.0  ;;  %vm1415_vm10 = vcmp.eq.s32.totalorder %v3558_v13, %v3708_v60  ;;  %vm1416_vm11 = vcmp.eq.s32.totalorder %v3561_v14, %v3708_v60 }
  0x9e   : > { %v724_v46 = vadd.f32 %v692_v35, %v620_v6  ;;  %v725_v10 = vadd.f32 %v693_v5, %v621_v28  ;;  %v1284_v47 = vsel %vm1152_vm9, %v3717_v63, 0.0  ;;  %v1547_v43 = vsel %vm1415_vm10, %v3730_v20, 0.0 }
  0x9f   : > { %v1548_v48 = vsel %vm1416_vm11, %v3730_v20, 0.0  ;;  %v1675_v7 = vadd.f32 %v1547_v43, %v1283_v30  ;;  %vm1807_vm12 = vcmp.eq.s32.totalorder %v3558_v13, %v3720_v0  ;;  %vm1808_vm13 = vcmp.eq.s32.totalorder %v3561_v14, %v3720_v0 }
  0xa0   : > { %v755_v49 = vpack.c.bf16 %v725_v10, %v724_v46  ;;  %v1676_v50 = vadd.f32 %v1548_v48, %v1284_v47  ;;  %v1939_v40 = vsel %vm1807_vm12, %v3736_v37, 0.0  ;;  %v1940_v51 = vsel %vm1808_vm13, %v3736_v37, 0.0 }
  0xa1   : > { %v2067_v52 = vadd.f32 %v1939_v40, %v1675_v7  ;;  %vm2199_vm14 = vcmp.eq.s32.totalorder %v3558_v13, %v3723_v3  ;;  %vm2200_vm15 = vcmp.eq.s32.totalorder %v3561_v14, %v3723_v3  ;;  %vm1135_vm0 = vcmp.eq.s32.totalorder %v3564_v15, %v3705_v59 }
  0xa2   : > { %2999 = vmatpush3.bf16.msra.mxu0 %v755_v49  ;;  %v2068_v53 = vadd.f32 %v1940_v51, %v1676_v50  ;;  %v2331_v54 = vsel %vm2199_vm14, %v3740_v44, 0.0  ;;  %v2332_v38 = vsel %vm2200_vm15, %v3740_v44, 0.0  ;;  %vm1136_vm1 = vcmp.eq.s32.totalorder %v3567_v16, %v3705_v59 }
  0xa3   : > { %v2459_v8 = vadd.f32 %v2331_v54, %v2067_v52  ;;  %v1267_v9 = vsel %vm1135_vm0, %v3717_v63, 0.0  ;;  %v1268_v13 = vsel %vm1136_vm1, %v3717_v63, 0.0  ;;  %vm1399_vm2 = vcmp.eq.s32.totalorder %v3564_v15, %v3708_v60 }
  0xa4   : > { %v2460_v14 = vadd.f32 %v2332_v38, %v2068_v53  ;;  %vm1400_vm3 = vcmp.eq.s32.totalorder %v3567_v16, %v3708_v60  ;;  %v1531_v55 = vsel %vm1399_vm2, %v3730_v20, 0.0  ;;  %vm1791_vm4 = vcmp.eq.s32.totalorder %v3564_v15, %v3720_v0 }
  0xa5   : > { %v1532_v29 = vsel %vm1400_vm3, %v3730_v20, 0.0  ;;  %v1659_v1 = vadd.f32 %v1531_v55, %v1267_v9  ;;  %vm1792_vm5 = vcmp.eq.s32.totalorder %v3567_v16, %v3720_v0  ;;  %v1923_v39 = vsel %vm1791_vm4, %v3736_v37, 0.0 }
  0xa6   : > { %v2578_v56 = vpack.c.bf16 %v2460_v14, %v2459_v8  ;;  %v1660_v57 = vadd.f32 %v1532_v29, %v1268_v13  ;;  %v1924_v58 = vsel %vm1792_vm5, %v3736_v37, 0.0  ;;  %vm2183_vm6 = vcmp.eq.s32.totalorder %v3564_v15, %v3723_v3 }
  0xa7   : > { %v2051_v61 = vadd.f32 %v1923_v39, %v1659_v1  ;;  %vm2184_vm7 = vcmp.eq.s32.totalorder %v3567_v16, %v3723_v3  ;;  %v2315_v6 = vsel %vm2183_vm6, %v3740_v44, 0.0  ;;  %vm394_vm8 = vcmp.eq.s32.totalorder %v3570_v17, %v3634_v62 }
  0xa8   : > { %3020 = vmatprep.subr.bf16.mxu1 %v2578_v56  ;;  %v2052_v28 = vadd.f32 %v1924_v58, %v1660_v57  ;;  %v2316_v35 = vsel %vm2184_vm7, %v3740_v44, 0.0  ;;  %vm395_vm9 = vcmp.eq.s32.totalorder %v3573_v18, %v3634_v62  ;;  %v430_v5 = vsel %vm394_vm8, %v3647_v11, 0.0 }
  0xa9   : > { %v2443_v30 = vadd.f32 %v2315_v6, %v2051_v61  ;;  %v431_v15 = vsel %vm395_vm9, %v3647_v11, 0.0  ;;  %vm466_vm10 = vcmp.eq.s32.totalorder %v3570_v17, %v3642_v4  ;;  %vm467_vm11 = vcmp.eq.s32.totalorder %v3573_v18, %v3642_v4 }
  0xaa   : > { %v2444_v16 = vadd.f32 %v2316_v35, %v2052_v28  ;;  %v502_v46 = vsel %vm466_vm10, %v3658_v27, 0.0  ;;  %v503_v10 = vsel %vm467_vm11, %v3658_v27, 0.0  ;;  %vm570_vm12 = vcmp.eq.s32.totalorder %v3570_v17, %v3650_v12 }
  0xab   : > { %v534_v47 = vadd.f32 %v502_v46, %v430_v5  ;;  %v535_v43 = vadd.f32 %v503_v10, %v431_v15  ;;  %vm571_vm13 = vcmp.eq.s32.totalorder %v3573_v18, %v3650_v12  ;;  %v606_v48 = vsel %vm570_vm12, %v3661_v36, 0.0 }
  0xac   : > { %v2570_v7 = vpack.c.bf16 %v2444_v16, %v2443_v30  ;;  %v607_v49 = vsel %vm571_vm13, %v3661_v36, 0.0  ;;  %vm674_vm14 = vcmp.eq.s32.totalorder %v3570_v17, %v3653_v19  ;;  %vm675_vm15 = vcmp.eq.s32.totalorder %v3573_v18, %v3653_v19 }
  0xad   : > { %v638_v50 = vadd.f32 %v606_v48, %v534_v47  ;;  %v639_v40 = vadd.f32 %v607_v49, %v535_v43  ;;  %v710_v51 = vsel %vm674_vm14, %v3674_v45, 0.0  ;;  %v711_v52 = vsel %vm675_vm15, %v3674_v45, 0.0 }
  0xae   : > { %3021 = vmatpush3.bf16.msra.mxu1 %v2570_v7  ;;  %vm378_vm0 = vcmp.eq.s32.totalorder %v3576_v21, %v3634_v62  ;;  %vm379_vm1 = vcmp.eq.s32.totalorder %v3579_v22, %v3634_v62  ;;  %vm450_vm2 = vcmp.eq.s32.totalorder %v3576_v21, %v3642_v4  ;;  %vm451_vm3 = vcmp.eq.s32.totalorder %v3579_v22, %v3642_v4 }
  0xaf   : > { %v742_v53 = vadd.f32 %v710_v51, %v638_v50  ;;  %v743_v54 = vadd.f32 %v711_v52, %v639_v40  ;;  %v414_v38 = vsel %vm378_vm0, %v3647_v11, 0.0  ;;  %v415_v8 = vsel %vm379_vm1, %v3647_v11, 0.0 }
  0xb0   : > { %v486_v9 = vsel %vm450_vm2, %v3658_v27, 0.0  ;;  %v487_v13 = vsel %vm451_vm3, %v3658_v27, 0.0  ;;  %vm554_vm4 = vcmp.eq.s32.totalorder %v3576_v21, %v3650_v12  ;;  %vm555_vm5 = vcmp.eq.s32.totalorder %v3579_v22, %v3650_v12 }
  0xb1   : > { %v764_v14 = vpack.c.bf16 %v743_v54, %v742_v53  ;;  %v518_v55 = vadd.f32 %v486_v9, %v414_v38  ;;  %v519_v29 = vadd.f32 %v487_v13, %v415_v8  ;;  %v590_v1 = vsel %vm554_vm4, %v3661_v36, 0.0 }
  0xb2   : > { %v591_v39 = vsel %vm555_vm5, %v3661_v36, 0.0  ;;  %vm658_vm6 = vcmp.eq.s32.totalorder %v3576_v21, %v3653_v19  ;;  %vm659_vm7 = vcmp.eq.s32.totalorder %v3579_v22, %v3653_v19  ;;  %vm1153_vm8 = vcmp.eq.s32.totalorder %v3570_v17, %v3705_v59 }
  0xb3   : > { %3000 = vmatprep.subr.bf16.mxu0 %v764_v14  ;;  %v622_v56 = vadd.f32 %v590_v1, %v518_v55  ;;  %v623_v57 = vadd.f32 %v591_v39, %v519_v29  ;;  %v694_v58 = vsel %vm658_vm6, %v3674_v45, 0.0  ;;  %v695_v61 = vsel %vm659_vm7, %v3674_v45, 0.0 }
  0xb4   : > { %vm1154_vm9 = vcmp.eq.s32.totalorder %v3573_v18, %v3705_v59  ;;  %v1285_v6 = vsel %vm1153_vm8, %v3717_v63, 0.0  ;;  %vm1417_vm10 = vcmp.eq.s32.totalorder %v3570_v17, %v3708_v60  ;;  %vm1418_vm11 = vcmp.eq.s32.totalorder %v3573_v18, %v3708_v60 }
  0xb5   : > { %v726_v28 = vadd.f32 %v694_v58, %v622_v56  ;;  %v727_v35 = vadd.f32 %v695_v61, %v623_v57  ;;  %v1286_v5 = vsel %vm1154_vm9, %v3717_v63, 0.0  ;;  %v1549_v30 = vsel %vm1417_vm10, %v3730_v20, 0.0 }
  0xb6   : > { %v1550_v15 = vsel %vm1418_vm11, %v3730_v20, 0.0  ;;  %v1677_v16 = vadd.f32 %v1549_v30, %v1285_v6  ;;  %vm1809_vm12 = vcmp.eq.s32.totalorder %v3570_v17, %v3720_v0  ;;  %vm1810_vm13 = vcmp.eq.s32.totalorder %v3573_v18, %v3720_v0 }
  0xb7   : > { %v756_v46 = vpack.c.bf16 %v727_v35, %v726_v28  ;;  %v1678_v10 = vadd.f32 %v1550_v15, %v1286_v5  ;;  %v1941_v47 = vsel %vm1809_vm12, %v3736_v37, 0.0  ;;  %v1942_v43 = vsel %vm1810_vm13, %v3736_v37, 0.0 }
  0xb8   : > { %v2069_v48 = vadd.f32 %v1941_v47, %v1677_v16  ;;  %vm2201_vm14 = vcmp.eq.s32.totalorder %v3570_v17, %v3723_v3  ;;  %vm2202_vm15 = vcmp.eq.s32.totalorder %v3573_v18, %v3723_v3  ;;  %vm1137_vm0 = vcmp.eq.s32.totalorder %v3576_v21, %v3705_v59 }
  0xb9   : > { %3001 = vmatpush3.bf16.msra.mxu0 %v756_v46  ;;  %v2070_v7 = vadd.f32 %v1942_v43, %v1678_v10  ;;  %v2333_v49 = vsel %vm2201_vm14, %v3740_v44, 0.0  ;;  %v2334_v50 = vsel %vm2202_vm15, %v3740_v44, 0.0  ;;  %vm1138_vm1 = vcmp.eq.s32.totalorder %v3579_v22, %v3705_v59 }
  0xba   : > { %v2461_v40 = vadd.f32 %v2333_v49, %v2069_v48  ;;  %v1269_v51 = vsel %vm1137_vm0, %v3717_v63, 0.0  ;;  %v1270_v17 = vsel %vm1138_vm1, %v3717_v63, 0.0  ;;  %vm1401_vm2 = vcmp.eq.s32.totalorder %v3576_v21, %v3708_v60 }
  0xbb   : > { %v2462_v18 = vadd.f32 %v2334_v50, %v2070_v7  ;;  %vm1402_vm3 = vcmp.eq.s32.totalorder %v3579_v22, %v3708_v60  ;;  %v1533_v52 = vsel %vm1401_vm2, %v3730_v20, 0.0  ;;  %vm1793_vm4 = vcmp.eq.s32.totalorder %v3576_v21, %v3720_v0 }
  0xbc   : > { %v1534_v53 = vsel %vm1402_vm3, %v3730_v20, 0.0  ;;  %v1661_v54 = vadd.f32 %v1533_v52, %v1269_v51  ;;  %vm1794_vm5 = vcmp.eq.s32.totalorder %v3579_v22, %v3720_v0  ;;  %v1925_v38 = vsel %vm1793_vm4, %v3736_v37, 0.0 }
  0xbd   : > { %v2579_v8 = vpack.c.bf16 %v2462_v18, %v2461_v40  ;;  %v1662_v9 = vadd.f32 %v1534_v53, %v1270_v17  ;;  %v1926_v13 = vsel %vm1794_vm5, %v3736_v37, 0.0  ;;  %vm2185_vm6 = vcmp.eq.s32.totalorder %v3576_v21, %v3723_v3 }
  0xbe   : > { %v2053_v14 = vadd.f32 %v1925_v38, %v1661_v54  ;;  %vm2186_vm7 = vcmp.eq.s32.totalorder %v3579_v22, %v3723_v3  ;;  %v2317_v55 = vsel %vm2185_vm6, %v3740_v44, 0.0  ;;  %vm396_vm8 = vcmp.eq.s32.totalorder %v3582_v23, %v3634_v62 }
  0xbf   : > { %3022 = vmatprep.subr.bf16.mxu1 %v2579_v8  ;;  %v2054_v29 = vadd.f32 %v1926_v13, %v1662_v9  ;;  %v2318_v1 = vsel %vm2186_vm7, %v3740_v44, 0.0  ;;  %vm397_vm9 = vcmp.eq.s32.totalorder %v3585_v24, %v3634_v62  ;;  %v432_v39 = vsel %vm396_vm8, %v3647_v11, 0.0 }
  0xc0   : > { %v2445_v56 = vadd.f32 %v2317_v55, %v2053_v14  ;;  %v433_v21 = vsel %vm397_vm9, %v3647_v11, 0.0  ;;  %vm468_vm10 = vcmp.eq.s32.totalorder %v3582_v23, %v3642_v4  ;;  %vm469_vm11 = vcmp.eq.s32.totalorder %v3585_v24, %v3642_v4 }
  0xc1   : > { %v2446_v22 = vadd.f32 %v2318_v1, %v2054_v29  ;;  %v504_v57 = vsel %vm468_vm10, %v3658_v27, 0.0  ;;  %v505_v58 = vsel %vm469_vm11, %v3658_v27, 0.0  ;;  %vm572_vm12 = vcmp.eq.s32.totalorder %v3582_v23, %v3650_v12 }
  0xc2   : > { %v536_v61 = vadd.f32 %v504_v57, %v432_v39  ;;  %v537_v6 = vadd.f32 %v505_v58, %v433_v21  ;;  %vm573_vm13 = vcmp.eq.s32.totalorder %v3585_v24, %v3650_v12  ;;  %v608_v28 = vsel %vm572_vm12, %v3661_v36, 0.0 }
  0xc3   : > { %v2571_v35 = vpack.c.bf16 %v2446_v22, %v2445_v56  ;;  %v609_v5 = vsel %vm573_vm13, %v3661_v36, 0.0  ;;  %vm676_vm14 = vcmp.eq.s32.totalorder %v3582_v23, %v3653_v19  ;;  %vm677_vm15 = vcmp.eq.s32.totalorder %v3585_v24, %v3653_v19 }
  0xc4   : > { %v640_v30 = vadd.f32 %v608_v28, %v536_v61  ;;  %v641_v15 = vadd.f32 %v609_v5, %v537_v6  ;;  %v712_v16 = vsel %vm676_vm14, %v3674_v45, 0.0  ;;  %v713_v46 = vsel %vm677_vm15, %v3674_v45, 0.0 }
  0xc5   : > { %3023 = vmatpush3.bf16.msra.mxu1 %v2571_v35  ;;  %vm380_vm0 = vcmp.eq.s32.totalorder %v3588_v25, %v3634_v62  ;;  %vm381_vm1 = vcmp.eq.s32.totalorder %v3591_v26, %v3634_v62  ;;  %vm452_vm2 = vcmp.eq.s32.totalorder %v3588_v25, %v3642_v4  ;;  %vm453_vm3 = vcmp.eq.s32.totalorder %v3591_v26, %v3642_v4 }
  0xc6   : > { %v744_v10 = vadd.f32 %v712_v16, %v640_v30  ;;  %v745_v47 = vadd.f32 %v713_v46, %v641_v15  ;;  %v416_v43 = vsel %vm380_vm0, %v3647_v11, 0.0  ;;  %v417_v48 = vsel %vm381_vm1, %v3647_v11, 0.0 }
  0xc7   : > { %v488_v7 = vsel %vm452_vm2, %v3658_v27, 0.0  ;;  %v489_v49 = vsel %vm453_vm3, %v3658_v27, 0.0  ;;  %vm556_vm4 = vcmp.eq.s32.totalorder %v3588_v25, %v3650_v12  ;;  %vm557_vm5 = vcmp.eq.s32.totalorder %v3591_v26, %v3650_v12 }
  0xc8   : > { %v765_v50 = vpack.c.bf16 %v745_v47, %v744_v10  ;;  %v520_v40 = vadd.f32 %v488_v7, %v416_v43  ;;  %v521_v51 = vadd.f32 %v489_v49, %v417_v48  ;;  %v592_v17 = vsel %vm556_vm4, %v3661_v36, 0.0 }
  0xc9   : > { %v593_v18 = vsel %vm557_vm5, %v3661_v36, 0.0  ;;  %vm660_vm6 = vcmp.eq.s32.totalorder %v3588_v25, %v3653_v19  ;;  %vm661_vm7 = vcmp.eq.s32.totalorder %v3591_v26, %v3653_v19  ;;  %vm1155_vm8 = vcmp.eq.s32.totalorder %v3582_v23, %v3705_v59 }
  0xca   : > { %3002 = vmatprep.subr.bf16.mxu0 %v765_v50  ;;  %v624_v52 = vadd.f32 %v592_v17, %v520_v40  ;;  %v625_v53 = vadd.f32 %v593_v18, %v521_v51  ;;  %v696_v54 = vsel %vm660_vm6, %v3674_v45, 0.0  ;;  %v697_v38 = vsel %vm661_vm7, %v3674_v45, 0.0 }
  0xcb   : > { %vm1156_vm9 = vcmp.eq.s32.totalorder %v3585_v24, %v3705_v59  ;;  %v1287_v8 = vsel %vm1155_vm8, %v3717_v63, 0.0  ;;  %vm1419_vm10 = vcmp.eq.s32.totalorder %v3582_v23, %v3708_v60  ;;  %vm1420_vm11 = vcmp.eq.s32.totalorder %v3585_v24, %v3708_v60 }
  0xcc   : > { %v728_v9 = vadd.f32 %v696_v54, %v624_v52  ;;  %v729_v13 = vadd.f32 %v697_v38, %v625_v53  ;;  %v1288_v14 = vsel %vm1156_vm9, %v3717_v63, 0.0  ;;  %v1551_v55 = vsel %vm1419_vm10, %v3730_v20, 0.0 }
  0xcd   : > { %v1552_v29 = vsel %vm1420_vm11, %v3730_v20, 0.0  ;;  %v1679_v1 = vadd.f32 %v1551_v55, %v1287_v8  ;;  %vm1811_vm12 = vcmp.eq.s32.totalorder %v3582_v23, %v3720_v0  ;;  %vm1812_vm13 = vcmp.eq.s32.totalorder %v3585_v24, %v3720_v0 }
  0xce   : > { %v757_v39 = vpack.c.bf16 %v729_v13, %v728_v9  ;;  %v1680_v56 = vadd.f32 %v1552_v29, %v1288_v14  ;;  %v1943_v21 = vsel %vm1811_vm12, %v3736_v37, 0.0  ;;  %v1944_v22 = vsel %vm1812_vm13, %v3736_v37, 0.0 }
  0xcf   : > { %v2071_v57 = vadd.f32 %v1943_v21, %v1679_v1  ;;  %vm2203_vm14 = vcmp.eq.s32.totalorder %v3582_v23, %v3723_v3  ;;  %vm2204_vm15 = vcmp.eq.s32.totalorder %v3585_v24, %v3723_v3  ;;  %vm1139_vm0 = vcmp.eq.s32.totalorder %v3588_v25, %v3705_v59 }
  0xd0   : > { %3003 = vmatpush3.bf16.msra.mxu0 %v757_v39  ;;  %v2072_v58 = vadd.f32 %v1944_v22, %v1680_v56  ;;  %v2335_v61 = vsel %vm2203_vm14, %v3740_v44, 0.0  ;;  %v2336_v6 = vsel %vm2204_vm15, %v3740_v44, 0.0  ;;  %vm1140_vm1 = vcmp.eq.s32.totalorder %v3591_v26, %v3705_v59 }
  0xd1   : > { %v2463_v28 = vadd.f32 %v2335_v61, %v2071_v57  ;;  %v1271_v35 = vsel %vm1139_vm0, %v3717_v63, 0.0  ;;  %v1272_v23 = vsel %vm1140_vm1, %v3717_v63, 0.0  ;;  %vm1403_vm2 = vcmp.eq.s32.totalorder %v3588_v25, %v3708_v60 }
  0xd2   : > { %v2464_v24 = vadd.f32 %v2336_v6, %v2072_v58  ;;  %vm1404_vm3 = vcmp.eq.s32.totalorder %v3591_v26, %v3708_v60  ;;  %v1535_v5 = vsel %vm1403_vm2, %v3730_v20, 0.0  ;;  %vm1795_vm4 = vcmp.eq.s32.totalorder %v3588_v25, %v3720_v0 }
  0xd3   : > { %v1536_v30 = vsel %vm1404_vm3, %v3730_v20, 0.0  ;;  %v1663_v15 = vadd.f32 %v1535_v5, %v1271_v35  ;;  %vm1796_vm5 = vcmp.eq.s32.totalorder %v3591_v26, %v3720_v0  ;;  %v1927_v16 = vsel %vm1795_vm4, %v3736_v37, 0.0 }
  0xd4   : > { %v2580_v46 = vpack.c.bf16 %v2464_v24, %v2463_v28  ;;  %v1664_v10 = vadd.f32 %v1536_v30, %v1272_v23  ;;  %v1928_v47 = vsel %vm1796_vm5, %v3736_v37, 0.0  ;;  %vm2187_vm6 = vcmp.eq.s32.totalorder %v3588_v25, %v3723_v3 }
  0xd5   : > { %v2055_v43 = vadd.f32 %v1927_v16, %v1663_v15  ;;  %vm2188_vm7 = vcmp.eq.s32.totalorder %v3591_v26, %v3723_v3  ;;  %v2319_v48 = vsel %vm2187_vm6, %v3740_v44, 0.0  ;;  %vm398_vm8 = vcmp.eq.s32.totalorder %v3596_v31, %v3634_v62 }
  0xd6   : > { %3024 = vmatprep.subr.bf16.mxu1 %v2580_v46  ;;  %v2056_v7 = vadd.f32 %v1928_v47, %v1664_v10  ;;  %v2320_v49 = vsel %vm2188_vm7, %v3740_v44, 0.0  ;;  %vm399_vm9 = vcmp.eq.s32.totalorder %v3599_v32, %v3634_v62  ;;  %v434_v50 = vsel %vm398_vm8, %v3647_v11, 0.0 }
  0xd7   : > { %v2447_v40 = vadd.f32 %v2319_v48, %v2055_v43  ;;  %v435_v25 = vsel %vm399_vm9, %v3647_v11, 0.0  ;;  %vm470_vm10 = vcmp.eq.s32.totalorder %v3596_v31, %v3642_v4  ;;  %vm471_vm11 = vcmp.eq.s32.totalorder %v3599_v32, %v3642_v4 }
  0xd8   : > { %v2448_v26 = vadd.f32 %v2320_v49, %v2056_v7  ;;  %v506_v51 = vsel %vm470_vm10, %v3658_v27, 0.0  ;;  %v507_v17 = vsel %vm471_vm11, %v3658_v27, 0.0  ;;  %vm574_vm12 = vcmp.eq.s32.totalorder %v3596_v31, %v3650_v12 }
  0xd9   : > { %v538_v18 = vadd.f32 %v506_v51, %v434_v50  ;;  %v539_v52 = vadd.f32 %v507_v17, %v435_v25  ;;  %vm575_vm13 = vcmp.eq.s32.totalorder %v3599_v32, %v3650_v12  ;;  %v610_v53 = vsel %vm574_vm12, %v3661_v36, 0.0 }
  0xda   : > { %v2572_v54 = vpack.c.bf16 %v2448_v26, %v2447_v40  ;;  %v611_v38 = vsel %vm575_vm13, %v3661_v36, 0.0  ;;  %vm678_vm14 = vcmp.eq.s32.totalorder %v3596_v31, %v3653_v19  ;;  %vm679_vm15 = vcmp.eq.s32.totalorder %v3599_v32, %v3653_v19 }
  0xdb   : > { %v642_v8 = vadd.f32 %v610_v53, %v538_v18  ;;  %v643_v9 = vadd.f32 %v611_v38, %v539_v52  ;;  %v714_v13 = vsel %vm678_vm14, %v3674_v45, 0.0  ;;  %v715_v14 = vsel %vm679_vm15, %v3674_v45, 0.0 }
  0xdc   : > { %3025 = vmatpush3.bf16.msra.mxu1 %v2572_v54  ;;  %vm382_vm0 = vcmp.eq.s32.totalorder %v3602_v33, %v3634_v62  ;;  %vm383_vm1 = vcmp.eq.s32.totalorder %v3605_v34, %v3634_v62  ;;  %vm454_vm2 = vcmp.eq.s32.totalorder %v3602_v33, %v3642_v4  ;;  %vm455_vm3 = vcmp.eq.s32.totalorder %v3605_v34, %v3642_v4 }
  0xdd   : > { %v746_v55 = vadd.f32 %v714_v13, %v642_v8  ;;  %v747_v29 = vadd.f32 %v715_v14, %v643_v9  ;;  %v418_v1 = vsel %vm382_vm0, %v3647_v11, 0.0  ;;  %v419_v39 = vsel %vm383_vm1, %v3647_v11, 0.0 }
  0xde   : > { %v490_v56 = vsel %vm454_vm2, %v3658_v27, 0.0  ;;  %v491_v21 = vsel %vm455_vm3, %v3658_v27, 0.0  ;;  %vm558_vm4 = vcmp.eq.s32.totalorder %v3602_v33, %v3650_v12  ;;  %vm559_vm5 = vcmp.eq.s32.totalorder %v3605_v34, %v3650_v12 }
  0xdf   : > { %v766_v22 = vpack.c.bf16 %v747_v29, %v746_v55  ;;  %v522_v57 = vadd.f32 %v490_v56, %v418_v1  ;;  %v523_v58 = vadd.f32 %v491_v21, %v419_v39  ;;  %v594_v61 = vsel %vm558_vm4, %v3661_v36, 0.0 }
  0xe0   : > { %v595_v6 = vsel %vm559_vm5, %v3661_v36, 0.0  ;;  %vm662_vm6 = vcmp.eq.s32.totalorder %v3602_v33, %v3653_v19  ;;  %vm663_vm7 = vcmp.eq.s32.totalorder %v3605_v34, %v3653_v19  ;;  %vm1157_vm8 = vcmp.eq.s32.totalorder %v3596_v31, %v3705_v59 }
  0xe1   : > { %3004 = vmatprep.subr.bf16.mxu0 %v766_v22  ;;  %v626_v28 = vadd.f32 %v594_v61, %v522_v57  ;;  %v627_v35 = vadd.f32 %v595_v6, %v523_v58  ;;  %v698_v23 = vsel %vm662_vm6, %v3674_v45, 0.0  ;;  %v699_v24 = vsel %vm663_vm7, %v3674_v45, 0.0 }
  0xe2   : > { %vm1158_vm9 = vcmp.eq.s32.totalorder %v3599_v32, %v3705_v59  ;;  %v1289_v5 = vsel %vm1157_vm8, %v3717_v63, 0.0  ;;  %vm1421_vm10 = vcmp.eq.s32.totalorder %v3596_v31, %v3708_v60  ;;  %vm1422_vm11 = vcmp.eq.s32.totalorder %v3599_v32, %v3708_v60 }
  0xe3   : > { %v730_v30 = vadd.f32 %v698_v23, %v626_v28  ;;  %v731_v15 = vadd.f32 %v699_v24, %v627_v35  ;;  %v1290_v16 = vsel %vm1158_vm9, %v3717_v63, 0.0  ;;  %v1553_v46 = vsel %vm1421_vm10, %v3730_v20, 0.0 }
  0xe4   : > { %v1554_v10 = vsel %vm1422_vm11, %v3730_v20, 0.0  ;;  %v1681_v47 = vadd.f32 %v1553_v46, %v1289_v5  ;;  %vm1813_vm12 = vcmp.eq.s32.totalorder %v3596_v31, %v3720_v0  ;;  %vm1814_vm13 = vcmp.eq.s32.totalorder %v3599_v32, %v3720_v0 }
  0xe5   : > { %v758_v43 = vpack.c.bf16 %v731_v15, %v730_v30  ;;  %v1682_v48 = vadd.f32 %v1554_v10, %v1290_v16  ;;  %v1945_v7 = vsel %vm1813_vm12, %v3736_v37, 0.0  ;;  %v1946_v49 = vsel %vm1814_vm13, %v3736_v37, 0.0 }
  0xe6   : > { %v2073_v50 = vadd.f32 %v1945_v7, %v1681_v47  ;;  %vm2205_vm14 = vcmp.eq.s32.totalorder %v3596_v31, %v3723_v3  ;;  %vm2206_vm15 = vcmp.eq.s32.totalorder %v3599_v32, %v3723_v3  ;;  %vm1141_vm0 = vcmp.eq.s32.totalorder %v3602_v33, %v3705_v59 }
  0xe7   : > { %3005 = vmatpush3.bf16.msra.mxu0 %v758_v43  ;;  %v2074_v40 = vadd.f32 %v1946_v49, %v1682_v48  ;;  %v2337_v25 = vsel %vm2205_vm14, %v3740_v44, 0.0  ;;  %v2338_v26 = vsel %vm2206_vm15, %v3740_v44, 0.0  ;;  %vm1142_vm1 = vcmp.eq.s32.totalorder %v3605_v34, %v3705_v59 }
  0xe8   : > { %v2465_v51 = vadd.f32 %v2337_v25, %v2073_v50  ;;  %v1273_v17 = vsel %vm1141_vm0, %v3717_v63, 0.0  ;;  %v1274_v31 = vsel %vm1142_vm1, %v3717_v63, 0.0  ;;  %vm1405_vm2 = vcmp.eq.s32.totalorder %v3602_v33, %v3708_v60 }
  0xe9   : > { %v2466_v32 = vadd.f32 %v2338_v26, %v2074_v40  ;;  %vm1406_vm3 = vcmp.eq.s32.totalorder %v3605_v34, %v3708_v60  ;;  %v1537_v18 = vsel %vm1405_vm2, %v3730_v20, 0.0  ;;  %vm1797_vm4 = vcmp.eq.s32.totalorder %v3602_v33, %v3720_v0 }
  0xea   : > { %v1538_v52 = vsel %vm1406_vm3, %v3730_v20, 0.0  ;;  %v1665_v53 = vadd.f32 %v1537_v18, %v1273_v17  ;;  %vm1798_vm5 = vcmp.eq.s32.totalorder %v3605_v34, %v3720_v0  ;;  %v1929_v54 = vsel %vm1797_vm4, %v3736_v37, 0.0 }
  0xeb   : > { %v2581_v38 = vpack.c.bf16 %v2466_v32, %v2465_v51  ;;  %v1666_v8 = vadd.f32 %v1538_v52, %v1274_v31  ;;  %v1930_v9 = vsel %vm1798_vm5, %v3736_v37, 0.0  ;;  %vm2189_vm6 = vcmp.eq.s32.totalorder %v3602_v33, %v3723_v3 }
  0xec   : > { %v2057_v13 = vadd.f32 %v1929_v54, %v1665_v53  ;;  %vm2190_vm7 = vcmp.eq.s32.totalorder %v3605_v34, %v3723_v3  ;;  %v2321_v14 = vsel %vm2189_vm6, %v3740_v44, 0.0  ;;  %vm400_vm8 = vcmp.eq.s32.totalorder %v3612_v41, %v3634_v62 }
  0xed   : > { %3026 = vmatprep.subr.bf16.mxu1 %v2581_v38  ;;  %v2058_v55 = vadd.f32 %v1930_v9, %v1666_v8  ;;  %v2322_v29 = vsel %vm2190_vm7, %v3740_v44, 0.0  ;;  %vm401_vm9 = vcmp.eq.s32.totalorder %v3615_v42, %v3634_v62  ;;  %v436_v1 = vsel %vm400_vm8, %v3647_v11, 0.0 }
  0xee   : > { %v2449_v39 = vadd.f32 %v2321_v14, %v2057_v13  ;;  %v437_v33 = vsel %vm401_vm9, %v3647_v11, 0.0  ;;  %vm472_vm10 = vcmp.eq.s32.totalorder %v3612_v41, %v3642_v4  ;;  %vm473_vm11 = vcmp.eq.s32.totalorder %v3615_v42, %v3642_v4 }
  0xef   : > { %v2450_v34 = vadd.f32 %v2322_v29, %v2058_v55  ;;  %v508_v56 = vsel %vm472_vm10, %v3658_v27, 0.0  ;;  %v509_v21 = vsel %vm473_vm11, %v3658_v27, 0.0  ;;  %vm576_vm12 = vcmp.eq.s32.totalorder %v3612_v41, %v3650_v12 }
  0xf0   : > { %v540_v22 = vadd.f32 %v508_v56, %v436_v1  ;;  %v541_v57 = vadd.f32 %v509_v21, %v437_v33  ;;  %vm577_vm13 = vcmp.eq.s32.totalorder %v3615_v42, %v3650_v12  ;;  %v612_v58 = vsel %vm576_vm12, %v3661_v36, 0.0 }
  0xf1   : > { %v2573_v61 = vpack.c.bf16 %v2450_v34, %v2449_v39  ;;  %v613_v6 = vsel %vm577_vm13, %v3661_v36, 0.0  ;;  %vm680_vm14 = vcmp.eq.s32.totalorder %v3612_v41, %v3653_v19  ;;  %vm681_vm15 = vcmp.eq.s32.totalorder %v3615_v42, %v3653_v19 }
  0xf2   : > { %v644_v28 = vadd.f32 %v612_v58, %v540_v22  ;;  %v645_v35 = vadd.f32 %v613_v6, %v541_v57  ;;  %v716_v23 = vsel %vm680_vm14, %v3674_v45, 0.0  ;;  %v717_v24 = vsel %vm681_vm15, %v3674_v45, 0.0 }
  0xf3   : > { %3027 = vmatpush3.bf16.msra.mxu1 %v2573_v61  ;;  %v4235_v5 = vadd.s32 80, %v3537_v2  ;;  %v4238_v30 = vadd.s32 88, %v3537_v2  ;;  %vm1159_vm0 = vcmp.eq.s32.totalorder %v3612_v41, %v3705_v59  ;;  %vm1160_vm1 = vcmp.eq.s32.totalorder %v3615_v42, %v3705_v59 }
  0xf4   : > { %v748_v15 = vadd.f32 %v716_v23, %v644_v28  ;;  %v749_v16 = vadd.f32 %v717_v24, %v645_v35  ;;  %v1291_v46 = vsel %vm1159_vm0, %v3717_v63, 0.0  ;;  %v1292_v10 = vsel %vm1160_vm1, %v3717_v63, 0.0 }
  0xf5   : > { %vm384_vm2 = vcmp.eq.s32.totalorder %v4235_v5, %v3634_v62  ;;  %vm385_vm3 = vcmp.eq.s32.totalorder %v4238_v30, %v3634_v62  ;;  %vm456_vm4 = vcmp.eq.s32.totalorder %v4235_v5, %v3642_v4  ;;  %vm457_vm5 = vcmp.eq.s32.totalorder %v4238_v30, %v3642_v4 }
  0xf6   : > { %v767_v47 = vpack.c.bf16 %v749_v16, %v748_v15  ;;  %v420_v43 = vsel %vm384_vm2, %v3647_v11, 0.0  ;;  %v421_v48 = vsel %vm385_vm3, %v3647_v11, 0.0  ;;  %v492_v7 = vsel %vm456_vm4, %v3658_v27, 0.0 }
  0xf7   : > { %v493_v49 = vsel %vm457_vm5, %v3658_v27, 0.0  ;;  %v524_v50 = vadd.f32 %v492_v7, %v420_v43  ;;  %vm560_vm6 = vcmp.eq.s32.totalorder %v4235_v5, %v3650_v12  ;;  %vm561_vm7 = vcmp.eq.s32.totalorder %v4238_v30, %v3650_v12 }
  0xf8   : > { %3006 = vmatprep.subr.bf16.mxu0 %v767_v47  ;;  %v525_v40 = vadd.f32 %v493_v49, %v421_v48  ;;  %v596_v25 = vsel %vm560_vm6, %v3661_v36, 0.0  ;;  %v597_v26 = vsel %vm561_vm7, %v3661_v36, 0.0  ;;  %vm664_vm8 = vcmp.eq.s32.totalorder %v4235_v5, %v3653_v19 }
  0xf9   : > { %v628_v51 = vadd.f32 %v596_v25, %v524_v50  ;;  %vm665_vm9 = vcmp.eq.s32.totalorder %v4238_v30, %v3653_v19  ;;  %v700_v17 = vsel %vm664_vm8, %v3674_v45, 0.0  ;;  %vm1423_vm10 = vcmp.eq.s32.totalorder %v3612_v41, %v3708_v60 }
  0xfa   : > { %v629_v31 = vadd.f32 %v597_v26, %v525_v40  ;;  %v701_v32 = vsel %vm665_vm9, %v3674_v45, 0.0  ;;  %vm1424_vm11 = vcmp.eq.s32.totalorder %v3615_v42, %v3708_v60  ;;  %v1555_v18 = vsel %vm1423_vm10, %v3730_v20, 0.0 }
  0xfb   : > { %v732_v52 = vadd.f32 %v700_v17, %v628_v51  ;;  %v1556_v53 = vsel %vm1424_vm11, %v3730_v20, 0.0  ;;  %v1683_v54 = vadd.f32 %v1555_v18, %v1291_v46  ;;  %vm1815_vm12 = vcmp.eq.s32.totalorder %v3612_v41, %v3720_v0 }
  0xfc   : > { %v733_v38 = vadd.f32 %v701_v32, %v629_v31  ;;  %v1684_v8 = vadd.f32 %v1556_v53, %v1292_v10  ;;  %vm1816_vm13 = vcmp.eq.s32.totalorder %v3615_v42, %v3720_v0  ;;  %v1947_v9 = vsel %vm1815_vm12, %v3736_v37, 0.0 }
  0xfd   : > { %v1948_v13 = vsel %vm1816_vm13, %v3736_v37, 0.0  ;;  %v2075_v14 = vadd.f32 %v1947_v9, %v1683_v54  ;;  %vm2207_vm14 = vcmp.eq.s32.totalorder %v3612_v41, %v3723_v3  ;;  %vm2208_vm15 = vcmp.eq.s32.totalorder %v3615_v42, %v3723_v3 }
  0xfe   : > { %v759_v55 = vpack.c.bf16 %v733_v38, %v732_v52  ;;  %v2076_v29 = vadd.f32 %v1948_v13, %v1684_v8  ;;  %v2339_v1 = vsel %vm2207_vm14, %v3740_v44, 0.0  ;;  %v2340_v39 = vsel %vm2208_vm15, %v3740_v44, 0.0 }
  0xff   : > { %v2467_v33 = vadd.f32 %v2339_v1, %v2075_v14  ;;  %vm1143_vm0 = vcmp.eq.s32.totalorder %v4235_v5, %v3705_v59  ;;  %vm1144_vm1 = vcmp.eq.s32.totalorder %v4238_v30, %v3705_v59  ;;  %vm1407_vm2 = vcmp.eq.s32.totalorder %v4235_v5, %v3708_v60 }
 0x100   : > { %3007 = vmatpush3.bf16.msra.mxu0 %v759_v55  ;;  %v2468_v41 = vadd.f32 %v2340_v39, %v2076_v29  ;;  %v1275_v42 = vsel %vm1143_vm0, %v3717_v63, 0.0  ;;  %v1276_v34 = vsel %vm1144_vm1, %v3717_v63, 0.0  ;;  %vm1408_vm3 = vcmp.eq.s32.totalorder %v4238_v30, %v3708_v60 }
 0x101   : > { %v1539_v56 = vsel %vm1407_vm2, %v3730_v20, 0.0  ;;  %v1540_v21 = vsel %vm1408_vm3, %v3730_v20, 0.0  ;;  %vm1799_vm4 = vcmp.eq.s32.totalorder %v4235_v5, %v3720_v0  ;;  %vm1800_vm5 = vcmp.eq.s32.totalorder %v4238_v30, %v3720_v0 }
 0x102   : > { %v2582_v22 = vpack.c.bf16 %v2468_v41, %v2467_v33  ;;  %v1667_v57 = vadd.f32 %v1539_v56, %v1275_v42  ;;  %v1668_v58 = vadd.f32 %v1540_v21, %v1276_v34  ;;  %v1931_v61 = vsel %vm1799_vm4, %v3736_v37, 0.0 }
 0x103   : > { %v1932_v6 = vsel %vm1800_vm5, %v3736_v37, 0.0  ;;  %vm2191_vm6 = vcmp.eq.s32.totalorder %v4235_v5, %v3723_v3  ;;  %vm2192_vm7 = vcmp.eq.s32.totalorder %v4238_v30, %v3723_v3  ;;  %v4311_v28 = vadd.s32 224, %v3537_v2 }
 0x104   : > { %3028 = vmatprep.subr.bf16.mxu1 %v2582_v22  ;;  %v2059_v35 = vadd.f32 %v1931_v61, %v1667_v57  ;;  %v2060_v23 = vadd.f32 %v1932_v6, %v1668_v58  ;;  %v2323_v24 = vsel %vm2191_vm6, %v3740_v44, 0.0  ;;  %v2324_v15 = vsel %vm2192_vm7, %v3740_v44, 0.0 }
 0x105   : > { %v4316_v16 = vadd.s32 232, %v3537_v2  ;;  %vm402_vm8 = vcmp.eq.s32.totalorder %v4311_v28, %v3634_v62  ;;  %vm474_vm9 = vcmp.eq.s32.totalorder %v4311_v28, %v3642_v4  ;;  %vm578_vm10 = vcmp.eq.s32.totalorder %v4311_v28, %v3650_v12 }
 0x106   : > { %v2451_v5 = vadd.f32 %v2323_v24, %v2059_v35  ;;  %v2452_v30 = vadd.f32 %v2324_v15, %v2060_v23  ;;  %v438_v46 = vsel %vm402_vm8, %v3647_v11, 0.0  ;;  %v510_v10 = vsel %vm474_vm9, %v3658_v27, 0.0 }
 0x107   : > { %vm403_vm11 = vcmp.eq.s32.totalorder %v4316_v16, %v3634_v62  ;;  %vm475_vm12 = vcmp.eq.s32.totalorder %v4316_v16, %v3642_v4  ;;  %v542_v47 = vadd.f32 %v510_v10, %v438_v46  ;;  %vm579_vm13 = vcmp.eq.s32.totalorder %v4316_v16, %v3650_v12 }
 0x108   : > { %v2574_v43 = vpack.c.bf16 %v2452_v30, %v2451_v5  ;;  %v439_v48 = vsel %vm403_vm11, %v3647_v11, 0.0  ;;  %v511_v7 = vsel %vm475_vm12, %v3658_v27, 0.0  ;;  %v614_v49 = vsel %vm578_vm10, %v3661_v36, 0.0 }
 0x109   : > { %v543_v50 = vadd.f32 %v511_v7, %v439_v48  ;;  %v615_v40 = vsel %vm579_vm13, %v3661_v36, 0.0  ;;  %v646_v25 = vadd.f32 %v614_v49, %v542_v47  ;;  %vm682_vm14 = vcmp.eq.s32.totalorder %v4311_v28, %v3653_v19 }
 0x10a   : > { %3029 = vmatpush3.bf16.msra.mxu1 %v2574_v43  ;;  %vm683_vm15 = vcmp.eq.s32.totalorder %v4316_v16, %v3653_v19  ;;  %v718_v26 = vsel %vm682_vm14, %v3674_v45, 0.0  ;;  %v4342_v51 = vadd.s32 96, %v3537_v2  ;;  %v4345_v17 = vadd.s32 104, %v3537_v2 }
 0x10b   : > { %v647_v31 = vadd.f32 %v615_v40, %v543_v50  ;;  %v719_v32 = vsel %vm683_vm15, %v3674_v45, 0.0  ;;  %v750_v18 = vadd.f32 %v718_v26, %v646_v25  ;;  %vm1161_vm0 = vcmp.eq.s32.totalorder %v4311_v28, %v3705_v59 }
 0x10c   : > { %vm386_vm1 = vcmp.eq.s32.totalorder %v4342_v51, %v3634_v62  ;;  %vm387_vm2 = vcmp.eq.s32.totalorder %v4345_v17, %v3634_v62  ;;  %vm458_vm3 = vcmp.eq.s32.totalorder %v4342_v51, %v3642_v4  ;;  %vm459_vm4 = vcmp.eq.s32.totalorder %v4345_v17, %v3642_v4 }
 0x10d   : > { %v751_v52 = vadd.f32 %v719_v32, %v647_v31  ;;  %v422_v53 = vsel %vm386_vm1, %v3647_v11, 0.0  ;;  %v423_v54 = vsel %vm387_vm2, %v3647_v11, 0.0  ;;  %v494_v38 = vsel %vm458_vm3, %v3658_v27, 0.0 }
 0x10e   : > { %v495_v8 = vsel %vm459_vm4, %v3658_v27, 0.0  ;;  %v526_v9 = vadd.f32 %v494_v38, %v422_v53  ;;  %vm562_vm5 = vcmp.eq.s32.totalorder %v4342_v51, %v3650_v12  ;;  %vm563_vm6 = vcmp.eq.s32.totalorder %v4345_v17, %v3650_v12 }
 0x10f   : > { %v768_v13 = vpack.c.bf16 %v751_v52, %v750_v18  ;;  %v527_v14 = vadd.f32 %v495_v8, %v423_v54  ;;  %v598_v55 = vsel %vm562_vm5, %v3661_v36, 0.0  ;;  %v599_v29 = vsel %vm563_vm6, %v3661_v36, 0.0 }
 0x110   : > { %v630_v1 = vadd.f32 %v598_v55, %v526_v9  ;;  %vm666_vm7 = vcmp.eq.s32.totalorder %v4342_v51, %v3653_v19  ;;  %vm667_vm8 = vcmp.eq.s32.totalorder %v4345_v17, %v3653_v19  ;;  %vm1162_vm9 = vcmp.eq.s32.totalorder %v4316_v16, %v3705_v59 }
 0x111   : > { %3008 = vmatprep.subr.bf16.mxu0 %v768_v13  ;;  %v631_v39 = vadd.f32 %v599_v29, %v527_v14  ;;  %v702_v33 = vsel %vm666_vm7, %v3674_v45, 0.0  ;;  %v703_v41 = vsel %vm667_vm8, %v3674_v45, 0.0  ;;  %v1293_v42 = vsel %vm1161_vm0, %v3717_v63, 0.0 }
 0x112   : > { %v734_v34 = vadd.f32 %v702_v33, %v630_v1  ;;  %v1294_v56 = vsel %vm1162_vm9, %v3717_v63, 0.0  ;;  %vm1425_vm10 = vcmp.eq.s32.totalorder %v4311_v28, %v3708_v60  ;;  %vm1426_vm11 = vcmp.eq.s32.totalorder %v4316_v16, %v3708_v60 }
 0x113   : > { %v735_v21 = vadd.f32 %v703_v41, %v631_v39  ;;  %v1557_v22 = vsel %vm1425_vm10, %v3730_v20, 0.0  ;;  %v1558_v57 = vsel %vm1426_vm11, %v3730_v20, 0.0  ;;  %vm1817_vm12 = vcmp.eq.s32.totalorder %v4311_v28, %v3720_v0 }
 0x114   : > { %v1685_v58 = vadd.f32 %v1557_v22, %v1293_v42  ;;  %v1686_v61 = vadd.f32 %v1558_v57, %v1294_v56  ;;  %vm1818_vm13 = vcmp.eq.s32.totalorder %v4316_v16, %v3720_v0  ;;  %v1949_v6 = vsel %vm1817_vm12, %v3736_v37, 0.0 }
 0x115   : > { %v760_v35 = vpack.c.bf16 %v735_v21, %v734_v34  ;;  %v1950_v23 = vsel %vm1818_vm13, %v3736_v37, 0.0  ;;  %vm2209_vm14 = vcmp.eq.s32.totalorder %v4311_v28, %v3723_v3  ;;  %vm2210_vm15 = vcmp.eq.s32.totalorder %v4316_v16, %v3723_v3 }
 0x116   : > { %v2077_v24 = vadd.f32 %v1949_v6, %v1685_v58  ;;  %v2078_v15 = vadd.f32 %v1950_v23, %v1686_v61  ;;  %v2341_v5 = vsel %vm2209_vm14, %v3740_v44, 0.0  ;;  %v2342_v30 = vsel %vm2210_vm15, %v3740_v44, 0.0 }
 0x117   : > { %3009 = vmatpush3.bf16.msra.mxu0 %v760_v35  ;;  %vm1145_vm0 = vcmp.eq.s32.totalorder %v4342_v51, %v3705_v59  ;;  %vm1146_vm1 = vcmp.eq.s32.totalorder %v4345_v17, %v3705_v59  ;;  %vm1409_vm2 = vcmp.eq.s32.totalorder %v4342_v51, %v3708_v60  ;;  %vm1410_vm3 = vcmp.eq.s32.totalorder %v4345_v17, %v3708_v60 }
 0x118   : > { %v2469_v28 = vadd.f32 %v2341_v5, %v2077_v24  ;;  %v2470_v16 = vadd.f32 %v2342_v30, %v2078_v15  ;;  %v1277_v46 = vsel %vm1145_vm0, %v3717_v63, 0.0  ;;  %v1278_v10 = vsel %vm1146_vm1, %v3717_v63, 0.0 }
 0x119   : > { %v1541_v47 = vsel %vm1409_vm2, %v3730_v20, 0.0  ;;  %v1542_v43 = vsel %vm1410_vm3, %v3730_v20, 0.0  ;;  %vm1801_vm4 = vcmp.eq.s32.totalorder %v4342_v51, %v3720_v0  ;;  %vm1802_vm5 = vcmp.eq.s32.totalorder %v4345_v17, %v3720_v0 }
 0x11a   : > { %v2583_v48 = vpack.c.bf16 %v2470_v16, %v2469_v28  ;;  %v1669_v7 = vadd.f32 %v1541_v47, %v1277_v46  ;;  %v1670_v49 = vadd.f32 %v1542_v43, %v1278_v10  ;;  %v1933_v50 = vsel %vm1801_vm4, %v3736_v37, 0.0  ;;  %v770_v10 = vld [vmem:[%s3520_s11] sm:$0xff] }
 0x11b   : > { %v1934_v40 = vsel %vm1802_vm5, %v3736_v37, 0.0  ;;  %vm2193_vm6 = vcmp.eq.s32.totalorder %v4342_v51, %v3723_v3  ;;  %vm2194_vm7 = vcmp.eq.s32.totalorder %v4345_v17, %v3723_v3  ;;  %v4422_v25 = vadd.s32 240, %v3537_v2 }
 0x11c   : > { %3030 = vmatprep.subr.bf16.mxu1 %v2583_v48  ;;  %v2061_v26 = vadd.f32 %v1933_v50, %v1669_v7  ;;  %v2062_v31 = vadd.f32 %v1934_v40, %v1670_v49  ;;  %v2325_v32 = vsel %vm2193_vm6, %v3740_v44, 0.0  ;;  %v2326_v18 = vsel %vm2194_vm7, %v3740_v44, 0.0 }
 0x11d   : > { %v4427_v52 = vadd.s32 248, %v3537_v2  ;;  %vm404_vm8 = vcmp.eq.s32.totalorder %v4422_v25, %v3634_v62  ;;  %vm476_vm9 = vcmp.eq.s32.totalorder %v4422_v25, %v3642_v4  ;;  %vm580_vm10 = vcmp.eq.s32.totalorder %v4422_v25, %v3650_v12 }
 0x11e   : > { %v2453_v51 = vadd.f32 %v2325_v32, %v2061_v26  ;;  %v2454_v17 = vadd.f32 %v2326_v18, %v2062_v31  ;;  %v440_v53 = vsel %vm404_vm8, %v3647_v11, 0.0  ;;  %v512_v54 = vsel %vm476_vm9, %v3658_v27, 0.0 }
 0x11f   : > { %vm405_vm11 = vcmp.eq.s32.totalorder %v4427_v52, %v3634_v62  ;;  %vm477_vm12 = vcmp.eq.s32.totalorder %v4427_v52, %v3642_v4  ;;  %v544_v38 = vadd.f32 %v512_v54, %v440_v53  ;;  %vm581_vm13 = vcmp.eq.s32.totalorder %v4427_v52, %v3650_v12 }
 0x120   : > { %v2575_v8 = vpack.c.bf16 %v2454_v17, %v2453_v51  ;;  %v441_v9 = vsel %vm405_vm11, %v3647_v11, 0.0  ;;  %v513_v13 = vsel %vm477_vm12, %v3658_v27, 0.0  ;;  %v616_v14 = vsel %vm580_vm10, %v3661_v36, 0.0 }
 0x121   : > { %v545_v55 = vadd.f32 %v513_v13, %v441_v9  ;;  %v617_v29 = vsel %vm581_vm13, %v3661_v36, 0.0  ;;  %v648_v1 = vadd.f32 %v616_v14, %v544_v38  ;;  %vm684_vm14 = vcmp.eq.s32.totalorder %v4422_v25, %v3653_v19 }
 0x122   : > { %3031 = vmatpush3.bf16.msra.mxu1 %v2575_v8  ;;  %vm685_vm15 = vcmp.eq.s32.totalorder %v4427_v52, %v3653_v19  ;;  %v720_v39 = vsel %vm684_vm14, %v3674_v45, 0.0  ;;  %v4453_v33 = vadd.s32 112, %v3537_v2  ;;  %v4456_v41 = vadd.s32 120, %v3537_v2 }
 0x123   : > { %v649_v42 = vadd.f32 %v617_v29, %v545_v55  ;;  %v721_v34 = vsel %vm685_vm15, %v3674_v45, 0.0  ;;  %v752_v56 = vadd.f32 %v720_v39, %v648_v1  ;;  %vm1163_vm0 = vcmp.eq.s32.totalorder %v4422_v25, %v3705_v59 }
 0x124   : > { %vm388_vm1 = vcmp.eq.s32.totalorder %v4453_v33, %v3634_v62  ;;  %vm389_vm2 = vcmp.eq.s32.totalorder %v4456_v41, %v3634_v62  ;;  %vm460_vm3 = vcmp.eq.s32.totalorder %v4453_v33, %v3642_v4  ;;  %vm461_vm4 = vcmp.eq.s32.totalorder %v4456_v41, %v3642_v4 }
 0x125   : > { %v753_v21 = vadd.f32 %v721_v34, %v649_v42  ;;  %v424_v22 = vsel %vm388_vm1, %v3647_v11, 0.0  ;;  %v425_v57 = vsel %vm389_vm2, %v3647_v11, 0.0  ;;  %v496_v58 = vsel %vm460_vm3, %v3658_v27, 0.0 }
 0x126   : > { %v497_v61 = vsel %vm461_vm4, %v3658_v27, 0.0  ;;  %v528_v6 = vadd.f32 %v496_v58, %v424_v22  ;;  %vm564_vm5 = vcmp.eq.s32.totalorder %v4453_v33, %v3650_v12  ;;  %vm565_vm6 = vcmp.eq.s32.totalorder %v4456_v41, %v3650_v12 }
 0x127   : > { %v769_v62 = vpack.c.bf16 %v753_v21, %v752_v56  ;;  %v529_v35 = vadd.f32 %v497_v61, %v425_v57  ;;  %v600_v4 = vsel %vm564_vm5, %v3661_v36, 0.0  ;;  %v601_v23 = vsel %vm565_vm6, %v3661_v36, 0.0 }
 0x128   : > { %v632_v24 = vadd.f32 %v600_v4, %v528_v6  ;;  %vm668_vm7 = vcmp.eq.s32.totalorder %v4453_v33, %v3653_v19  ;;  %vm669_vm8 = vcmp.eq.s32.totalorder %v4456_v41, %v3653_v19  ;;  %vm1164_vm9 = vcmp.eq.s32.totalorder %v4427_v52, %v3705_v59 }
 0x129   : > { %3010 = vmatprep.subr.bf16.mxu0 %v769_v62  ;;  %v633_v11 = vadd.f32 %v601_v23, %v529_v35  ;;  %v704_v12 = vsel %vm668_vm7, %v3674_v45, 0.0  ;;  %v705_v27 = vsel %vm669_vm8, %v3674_v45, 0.0  ;;  %v1295_v36 = vsel %vm1163_vm0, %v3717_v63, 0.0 }
 0x12a   : > { %v736_v15 = vadd.f32 %v704_v12, %v632_v24  ;;  %v1296_v5 = vsel %vm1164_vm9, %v3717_v63, 0.0  ;;  %vm1427_vm10 = vcmp.eq.s32.totalorder %v4422_v25, %v3708_v60  ;;  %vm1428_vm11 = vcmp.eq.s32.totalorder %v4427_v52, %v3708_v60 }
 0x12b   : > { %v737_v19 = vadd.f32 %v705_v27, %v633_v11  ;;  %v1559_v30 = vsel %vm1427_vm10, %v3730_v20, 0.0  ;;  %v1560_v28 = vsel %vm1428_vm11, %v3730_v20, 0.0  ;;  %vm1819_vm12 = vcmp.eq.s32.totalorder %v4422_v25, %v3720_v0 }
 0x12c   : > { %v1687_v45 = vadd.f32 %v1559_v30, %v1295_v36  ;;  %v1688_v16 = vadd.f32 %v1560_v28, %v1296_v5  ;;  %vm1820_vm13 = vcmp.eq.s32.totalorder %v4427_v52, %v3720_v0  ;;  %v1951_v46 = vsel %vm1819_vm12, %v3736_v37, 0.0 }
 0x12d   : > { %v761_v47 = vpack.c.bf16 %v737_v19, %v736_v15  ;;  %v1952_v43 = vsel %vm1820_vm13, %v3736_v37, 0.0  ;;  %vm2211_vm14 = vcmp.eq.s32.totalorder %v4422_v25, %v3723_v3  ;;  %vm2212_vm15 = vcmp.eq.s32.totalorder %v4427_v52, %v3723_v3  ;;  %v2634_v15 = vld [vmem:[%s3528_s6] sm:$0xff] }
 0x12e   : > { %v2079_v48 = vadd.f32 %v1951_v46, %v1687_v45  ;;  %v2080_v7 = vadd.f32 %v1952_v43, %v1688_v16  ;;  %v2343_v49 = vsel %vm2211_vm14, %v3740_v44, 0.0  ;;  %v2344_v50 = vsel %vm2212_vm15, %v3740_v44, 0.0 }
 0x12f   : > { %3011 = vmatpush3.bf16.msra.mxu0 %v761_v47  ;;  %v2979_v40 = vcombine.low %v770_v10, %v770_v10  ;;  %v2980_v26 = vcombine.high %v770_v10, %v770_v10  ;;  %vm1147_vm0 = vcmp.eq.s32.totalorder %v4453_v33, %v3705_v59  ;;  %vm1148_vm1 = vcmp.eq.s32.totalorder %v4456_v41, %v3705_v59 }
 0x130   : > { %v2471_v31 = vadd.f32 %v2343_v49, %v2079_v48  ;;  %v2472_v25 = vadd.f32 %v2344_v50, %v2080_v7  ;;  %v1279_v32 = vsel %vm1147_vm0, %v3717_v63, 0.0  ;;  %v1280_v18 = vsel %vm1148_vm1, %v3717_v63, 0.0 }
 0x131   : > { %816 = vmatprep.mubr.bf16.mxu0 %v2980_v26  ;;  %vm1411_vm2 = vcmp.eq.s32.totalorder %v4453_v33, %v3708_v60  ;;  %vm1412_vm3 = vcmp.eq.s32.totalorder %v4456_v41, %v3708_v60  ;;  %vm1803_vm4 = vcmp.eq.s32.totalorder %v4453_v33, %v3720_v0  ;;  %vm1804_vm5 = vcmp.eq.s32.totalorder %v4456_v41, %v3720_v0 }
 0x132   : > { %v2584_v52 = vpack.c.bf16 %v2472_v25, %v2471_v31  ;;  %v1543_v51 = vsel %vm1411_vm2, %v3730_v20, 0.0  ;;  %v1544_v17 = vsel %vm1412_vm3, %v3730_v20, 0.0  ;;  %v1935_v53 = vsel %vm1803_vm4, %v3736_v37, 0.0  ;;  %817 = vmatmul.mubr.bf16.vlgmr.msra.gmra.mrb[0].mxu0 %v2979_v40 }
 0x133   : > { %v1671_v54 = vadd.f32 %v1543_v51, %v1279_v32  ;;  %v1672_v38 = vadd.f32 %v1544_v17, %v1280_v18  ;;  %v1936_v8 = vsel %vm1804_vm5, %v3736_v37, 0.0  ;;  %vm2195_vm6 = vcmp.eq.s32.totalorder %v4453_v33, %v3723_v3 }
 0x134   : > { %3032 = vmatprep.subr.bf16.mxu1 %v2584_v52  ;;  %vm2196_vm7 = vcmp.eq.s32.totalorder %v4456_v41, %v3723_v3  ;;  %v2327_v9 = vsel %vm2195_vm6, %v3740_v44, 0.0  ;;  %v920_v13 = vadd.s32 384, %v3537_v2  ;;  %v921_v14 = vadd.s32 392, %v3537_v2 }
 0x135   : > { %v2063_v55 = vadd.f32 %v1935_v53, %v1671_v54  ;;  %v2064_v29 = vadd.f32 %v1936_v8, %v1672_v38  ;;  %v2328_v1 = vsel %vm2196_vm7, %v3740_v44, 0.0  ;;  %v904_v39 = vadd.s32 256, %v3537_v2 }
 0x136   : > { %vm1181_vm8 = vcmp.eq.s32.totalorder %v920_v13, %v3705_v59  ;;  %vm1182_vm9 = vcmp.eq.s32.totalorder %v921_v14, %v3705_v59  ;;  %vm1445_vm10 = vcmp.eq.s32.totalorder %v920_v13, %v3708_v60  ;;  %vm1446_vm11 = vcmp.eq.s32.totalorder %v921_v14, %v3708_v60 }
 0x137   : > { %v2455_v33 = vadd.f32 %v2327_v9, %v2063_v55  ;;  %v2456_v41 = vadd.f32 %v2328_v1, %v2064_v29  ;;  %v1313_v42 = vsel %vm1181_vm8, %v3717_v63, 0.0  ;;  %v1314_v34 = vsel %vm1182_vm9, %v3717_v63, 0.0 }
 0x138   : > { %v1577_v56 = vsel %vm1445_vm10, %v3730_v20, 0.0  ;;  %v1578_v21 = vsel %vm1446_vm11, %v3730_v20, 0.0  ;;  %vm1837_vm12 = vcmp.eq.s32.totalorder %v920_v13, %v3720_v0  ;;  %vm1838_vm13 = vcmp.eq.s32.totalorder %v921_v14, %v3720_v0 }
 0x139   : > { %v2576_v22 = vpack.c.bf16 %v2456_v41, %v2455_v33  ;;  %v1705_v57 = vadd.f32 %v1577_v56, %v1313_v42  ;;  %v1706_v58 = vadd.f32 %v1578_v21, %v1314_v34  ;;  %v1969_v61 = vsel %vm1837_vm12, %v3736_v37, 0.0 }
 0x13a   : > { %v1970_v6 = vsel %vm1838_vm13, %v3736_v37, 0.0  ;;  %vm2229_vm14 = vcmp.eq.s32.totalorder %v920_v13, %v3723_v3  ;;  %vm2230_vm15 = vcmp.eq.s32.totalorder %v921_v14, %v3723_v3  ;;  %v905_v62 = vadd.s32 264, %v3537_v2 }
 0x13b   : > { %3033 = vmatpush3.bf16.msra.mxu1 %v2576_v22  ;;  %v2097_v35 = vadd.f32 %v1969_v61, %v1705_v57  ;;  %v2098_v4 = vadd.f32 %v1970_v6, %v1706_v58  ;;  %v2361_v23 = vsel %vm2229_vm14, %v3740_v44, 0.0  ;;  %v2362_v24 = vsel %vm2230_vm15, %v3740_v44, 0.0 }
 0x13c   : > { %vm1165_vm0 = vcmp.eq.s32.totalorder %v904_v39, %v3705_v59  ;;  %vm1166_vm1 = vcmp.eq.s32.totalorder %v905_v62, %v3705_v59  ;;  %vm1429_vm2 = vcmp.eq.s32.totalorder %v904_v39, %v3708_v60  ;;  %vm1430_vm3 = vcmp.eq.s32.totalorder %v905_v62, %v3708_v60 }
 0x13d   : > { %v2489_v11 = vadd.f32 %v2361_v23, %v2097_v35  ;;  %v2490_v12 = vadd.f32 %v2362_v24, %v2098_v4  ;;  %v1297_v27 = vsel %vm1165_vm0, %v3717_v63, 0.0  ;;  %v1298_v36 = vsel %vm1166_vm1, %v3717_v63, 0.0 }
 0x13e   : > { %v1561_v5 = vsel %vm1429_vm2, %v3730_v20, 0.0  ;;  %v1562_v19 = vsel %vm1430_vm3, %v3730_v20, 0.0  ;;  %vm1821_vm4 = vcmp.eq.s32.totalorder %v904_v39, %v3720_v0  ;;  %vm1822_vm5 = vcmp.eq.s32.totalorder %v905_v62, %v3720_v0 }
 0x13f   : > { %v2593_v30 = vpack.c.bf16 %v2490_v12, %v2489_v11  ;;  %v1689_v28 = vadd.f32 %v1561_v5, %v1297_v27  ;;  %v1690_v45 = vadd.f32 %v1562_v19, %v1298_v36  ;;  %v1953_v16 = vsel %vm1821_vm4, %v3736_v37, 0.0 }
 0x140   : > { %v1954_v46 = vsel %vm1822_vm5, %v3736_v37, 0.0  ;;  %vm2213_vm6 = vcmp.eq.s32.totalorder %v904_v39, %v3723_v3  ;;  %vm2214_vm7 = vcmp.eq.s32.totalorder %v905_v62, %v3723_v3  ;;  %v2982_v10 = vcombine.low %v2634_v15, %v2634_v15 }
 0x141   : > { %3040 = vmatprep.subr.bf16.mxu0 %v2593_v30  ;;  %v2081_v47 = vadd.f32 %v1953_v16, %v1689_v28  ;;  %v2082_v43 = vadd.f32 %v1954_v46, %v1690_v45  ;;  %v2345_v48 = vsel %vm2213_vm6, %v3740_v44, 0.0  ;;  %v2346_v7 = vsel %vm2214_vm7, %v3740_v44, 0.0 }
 0x142   : > { %v2983_v49 = vcombine.high %v2634_v15, %v2634_v15  ;;  %v952_v50 = vadd.s32 640, %v3537_v2  ;;  %v953_v40 = vadd.s32 648, %v3537_v2  ;;  %v936_v26 = vadd.s32 512, %v3537_v2 }
 0x143   : > { %v2473_v31 = vadd.f32 %v2345_v48, %v2081_v47  ;;  %v2474_v25 = vadd.f32 %v2346_v7, %v2082_v43  ;;  %v937_v32 = vadd.s32 520, %v3537_v2  ;;  %v4577_v18 = vadd.s32 400, %v3537_v2 }
 0x144   : > { %2698 = vmatprep.mubr.bf16.mxu1 %v2983_v49  ;;  %vm1213_vm8 = vcmp.eq.s32.totalorder %v952_v50, %v3705_v59  ;;  %vm1214_vm9 = vcmp.eq.s32.totalorder %v953_v40, %v3705_v59  ;;  %vm1477_vm10 = vcmp.eq.s32.totalorder %v952_v50, %v3708_v60  ;;  %vm1478_vm11 = vcmp.eq.s32.totalorder %v953_v40, %v3708_v60 }
 0x145   : > { %v2585_v52 = vpack.c.bf16 %v2474_v25, %v2473_v31  ;;  %v1345_v51 = vsel %vm1213_vm8, %v3717_v63, 0.0  ;;  %v1346_v17 = vsel %vm1214_vm9, %v3717_v63, 0.0  ;;  %v1609_v53 = vsel %vm1477_vm10, %v3730_v20, 0.0  ;;  %2699 = vmatmul.mubr.bf16.vlgmr.msra.gmra.mrb[0].mxu1 %v2982_v10 }
 0x146   : > { %v1610_v54 = vsel %vm1478_vm11, %v3730_v20, 0.0  ;;  %v1737_v38 = vadd.f32 %v1609_v53, %v1345_v51  ;;  %vm1869_vm12 = vcmp.eq.s32.totalorder %v952_v50, %v3720_v0  ;;  %vm1870_vm13 = vcmp.eq.s32.totalorder %v953_v40, %v3720_v0 }
 0x147   : > { %3041 = vmatpush3.bf16.msra.mxu0 %v2585_v52  ;;  %v1738_v8 = vadd.f32 %v1610_v54, %v1346_v17  ;;  %v2001_v9 = vsel %vm1869_vm12, %v3736_v37, 0.0  ;;  %v2002_v13 = vsel %vm1870_vm13, %v3736_v37, 0.0  ;;  %vm2261_vm14 = vcmp.eq.s32.totalorder %v952_v50, %v3723_v3 }
 0x148   : > { %v2129_v14 = vadd.f32 %v2001_v9, %v1737_v38  ;;  %vm2262_vm15 = vcmp.eq.s32.totalorder %v953_v40, %v3723_v3  ;;  %v2393_v55 = vsel %vm2261_vm14, %v3740_v44, 0.0  ;;  %vm1197_vm0 = vcmp.eq.s32.totalorder %v936_v26, %v3705_v59 }
 0x149   : > { %v2130_v29 = vadd.f32 %v2002_v13, %v1738_v8  ;;  %v2394_v1 = vsel %vm2262_vm15, %v3740_v44, 0.0  ;;  %vm1198_vm1 = vcmp.eq.s32.totalorder %v937_v32, %v3705_v59  ;;  %v1329_v39 = vsel %vm1197_vm0, %v3717_v63, 0.0 }
 0x14a   : > { %v2521_v33 = vadd.f32 %v2393_v55, %v2129_v14  ;;  %v1330_v41 = vsel %vm1198_vm1, %v3717_v63, 0.0  ;;  %vm1461_vm2 = vcmp.eq.s32.totalorder %v936_v26, %v3708_v60  ;;  %vm1462_vm3 = vcmp.eq.s32.totalorder %v937_v32, %v3708_v60 }
 0x14b   : > { %v2522_v42 = vadd.f32 %v2394_v1, %v2130_v29  ;;  %v1593_v34 = vsel %vm1461_vm2, %v3730_v20, 0.0  ;;  %v1594_v56 = vsel %vm1462_vm3, %v3730_v20, 0.0  ;;  %vm1853_vm4 = vcmp.eq.s32.totalorder %v936_v26, %v3720_v0 }
 0x14c   : > { %v1721_v21 = vadd.f32 %v1593_v34, %v1329_v39  ;;  %v1722_v22 = vadd.f32 %v1594_v56, %v1330_v41  ;;  %vm1854_vm5 = vcmp.eq.s32.totalorder %v937_v32, %v3720_v0  ;;  %v1985_v57 = vsel %vm1853_vm4, %v3736_v37, 0.0 }
 0x14d   : > { %v2609_v58 = vpack.c.bf16 %v2522_v42, %v2521_v33  ;;  %v1986_v61 = vsel %vm1854_vm5, %v3736_v37, 0.0  ;;  %vm2245_vm6 = vcmp.eq.s32.totalorder %v936_v26, %v3723_v3  ;;  %vm2246_vm7 = vcmp.eq.s32.totalorder %v937_v32, %v3723_v3 }
 0x14e   : > { %v2113_v6 = vadd.f32 %v1985_v57, %v1721_v21  ;;  %v2114_v62 = vadd.f32 %v1986_v61, %v1722_v22  ;;  %v2377_v35 = vsel %vm2245_vm6, %v3740_v44, 0.0  ;;  %v2378_v4 = vsel %vm2246_vm7, %v3740_v44, 0.0 }
 0x14f   : > { %3062 = vmatprep.subr.bf16.mxu1 %v2609_v58  ;;  %v923_v23 = vadd.s32 408, %v3537_v2  ;;  %vm1183_vm8 = vcmp.eq.s32.totalorder %v4577_v18, %v3705_v59  ;;  %vm1447_vm9 = vcmp.eq.s32.totalorder %v4577_v18, %v3708_v60  ;;  %vm1839_vm10 = vcmp.eq.s32.totalorder %v4577_v18, %v3720_v0 }
 0x150   : > { %v2505_v24 = vadd.f32 %v2377_v35, %v2113_v6  ;;  %v2506_v11 = vadd.f32 %v2378_v4, %v2114_v62  ;;  %v1315_v12 = vsel %vm1183_vm8, %v3717_v63, 0.0  ;;  %v1579_v27 = vsel %vm1447_vm9, %v3730_v20, 0.0 }
 0x151   : > { %vm1184_vm11 = vcmp.eq.s32.totalorder %v923_v23, %v3705_v59  ;;  %vm1448_vm12 = vcmp.eq.s32.totalorder %v923_v23, %v3708_v60  ;;  %v1707_v36 = vadd.f32 %v1579_v27, %v1315_v12  ;;  %vm1840_vm13 = vcmp.eq.s32.totalorder %v923_v23, %v3720_v0 }
 0x152   : > { %v2601_v15 = vpack.c.bf16 %v2506_v11, %v2505_v24  ;;  %v1316_v5 = vsel %vm1184_vm11, %v3717_v63, 0.0  ;;  %v1580_v19 = vsel %vm1448_vm12, %v3730_v20, 0.0  ;;  %v1971_v30 = vsel %vm1839_vm10, %v3736_v37, 0.0 }
 0x153   : > { %v1708_v28 = vadd.f32 %v1580_v19, %v1316_v5  ;;  %v1972_v45 = vsel %vm1840_vm13, %v3736_v37, 0.0  ;;  %v2099_v16 = vadd.f32 %v1971_v30, %v1707_v36  ;;  %vm2231_vm14 = vcmp.eq.s32.totalorder %v4577_v18, %v3723_v3 }
 0x154   : > { %3063 = vmatpush3.bf16.msra.mxu1 %v2601_v15  ;;  %vm2232_vm15 = vcmp.eq.s32.totalorder %v923_v23, %v3723_v3  ;;  %v2363_v46 = vsel %vm2231_vm14, %v3740_v44, 0.0  ;;  %v906_v10 = vadd.s32 272, %v3537_v2  ;;  %v907_v47 = vadd.s32 280, %v3537_v2 }
 0x155   : > { %v2100_v43 = vadd.f32 %v1972_v45, %v1708_v28  ;;  %v2364_v48 = vsel %vm2232_vm15, %v3740_v44, 0.0  ;;  %v2491_v7 = vadd.f32 %v2363_v46, %v2099_v16  ;;  %v954_v49 = vadd.s32 656, %v3537_v2 }
 0x156   : > { %vm1167_vm0 = vcmp.eq.s32.totalorder %v906_v10, %v3705_v59  ;;  %vm1168_vm1 = vcmp.eq.s32.totalorder %v907_v47, %v3705_v59  ;;  %vm1431_vm2 = vcmp.eq.s32.totalorder %v906_v10, %v3708_v60  ;;  %vm1432_vm3 = vcmp.eq.s32.totalorder %v907_v47, %v3708_v60 }
 0x157   : > { %v2492_v50 = vadd.f32 %v2364_v48, %v2100_v43  ;;  %v1299_v40 = vsel %vm1167_vm0, %v3717_v63, 0.0  ;;  %v1300_v26 = vsel %vm1168_vm1, %v3717_v63, 0.0  ;;  %v1563_v31 = vsel %vm1431_vm2, %v3730_v20, 0.0 }
 0x158   : > { %v1564_v25 = vsel %vm1432_vm3, %v3730_v20, 0.0  ;;  %v1691_v32 = vadd.f32 %v1563_v31, %v1299_v40  ;;  %vm1823_vm4 = vcmp.eq.s32.totalorder %v906_v10, %v3720_v0  ;;  %vm1824_vm5 = vcmp.eq.s32.totalorder %v907_v47, %v3720_v0 }
 0x159   : > { %v2594_v18 = vpack.c.bf16 %v2492_v50, %v2491_v7  ;;  %v1692_v52 = vadd.f32 %v1564_v25, %v1300_v26  ;;  %v1955_v51 = vsel %vm1823_vm4, %v3736_v37, 0.0  ;;  %v1956_v17 = vsel %vm1824_vm5, %v3736_v37, 0.0 }
 0x15a   : > { %v2083_v53 = vadd.f32 %v1955_v51, %v1691_v32  ;;  %vm2215_vm6 = vcmp.eq.s32.totalorder %v906_v10, %v3723_v3  ;;  %vm2216_vm7 = vcmp.eq.s32.totalorder %v907_v47, %v3723_v3  ;;  %v955_v54 = vadd.s32 664, %v3537_v2 }
 0x15b   : > { %3042 = vmatprep.subr.bf16.mxu0 %v2594_v18  ;;  %v2084_v38 = vadd.f32 %v1956_v17, %v1692_v52  ;;  %v2347_v8 = vsel %vm2215_vm6, %v3740_v44, 0.0  ;;  %v2348_v9 = vsel %vm2216_vm7, %v3740_v44, 0.0  ;;  %vm1215_vm8 = vcmp.eq.s32.totalorder %v954_v49, %v3705_v59 }
 0x15c   : > { %v2475_v13 = vadd.f32 %v2347_v8, %v2083_v53  ;;  %vm1216_vm9 = vcmp.eq.s32.totalorder %v955_v54, %v3705_v59  ;;  %v1347_v14 = vsel %vm1215_vm8, %v3717_v63, 0.0  ;;  %vm1479_vm10 = vcmp.eq.s32.totalorder %v954_v49, %v3708_v60 }
 0x15d   : > { %v2476_v55 = vadd.f32 %v2348_v9, %v2084_v38  ;;  %v1348_v29 = vsel %vm1216_vm9, %v3717_v63, 0.0  ;;  %vm1480_vm11 = vcmp.eq.s32.totalorder %v955_v54, %v3708_v60  ;;  %v1611_v1 = vsel %vm1479_vm10, %v3730_v20, 0.0 }
 0x15e   : > { %v1612_v39 = vsel %vm1480_vm11, %v3730_v20, 0.0  ;;  %v1739_v33 = vadd.f32 %v1611_v1, %v1347_v14  ;;  %vm1871_vm12 = vcmp.eq.s32.totalorder %v954_v49, %v3720_v0  ;;  %vm1872_vm13 = vcmp.eq.s32.totalorder %v955_v54, %v3720_v0 }
 0x15f   : > { %v2586_v41 = vpack.c.bf16 %v2476_v55, %v2475_v13  ;;  %v1740_v42 = vadd.f32 %v1612_v39, %v1348_v29  ;;  %v2003_v34 = vsel %vm1871_vm12, %v3736_v37, 0.0  ;;  %v2004_v56 = vsel %vm1872_vm13, %v3736_v37, 0.0 }
 0x160   : > { %v2131_v21 = vadd.f32 %v2003_v34, %v1739_v33  ;;  %vm2263_vm14 = vcmp.eq.s32.totalorder %v954_v49, %v3723_v3  ;;  %vm2264_vm15 = vcmp.eq.s32.totalorder %v955_v54, %v3723_v3  ;;  %v938_v22 = vadd.s32 528, %v3537_v2 }
 0x161   : > { %3043 = vmatpush3.bf16.msra.mxu0 %v2586_v41  ;;  %v2132_v57 = vadd.f32 %v2004_v56, %v1740_v42  ;;  %v2395_v58 = vsel %vm2263_vm14, %v3740_v44, 0.0  ;;  %v2396_v61 = vsel %vm2264_vm15, %v3740_v44, 0.0  ;;  %v939_v6 = vadd.s32 536, %v3537_v2 }
 0x162   : > { %v2523_v62 = vadd.f32 %v2395_v58, %v2131_v21  ;;  %vm1199_vm0 = vcmp.eq.s32.totalorder %v938_v22, %v3705_v59  ;;  %vm1463_vm1 = vcmp.eq.s32.totalorder %v938_v22, %v3708_v60  ;;  %vm1855_vm2 = vcmp.eq.s32.totalorder %v938_v22, %v3720_v0 }
 0x163   : > { %v2524_v35 = vadd.f32 %v2396_v61, %v2132_v57  ;;  %vm1200_vm3 = vcmp.eq.s32.totalorder %v939_v6, %v3705_v59  ;;  %v1331_v4 = vsel %vm1199_vm0, %v3717_v63, 0.0  ;;  %vm1464_vm4 = vcmp.eq.s32.totalorder %v939_v6, %v3708_v60 }
 0x164   : > { %v1332_v23 = vsel %vm1200_vm3, %v3717_v63, 0.0  ;;  %v1595_v24 = vsel %vm1463_vm1, %v3730_v20, 0.0  ;;  %v1596_v11 = vsel %vm1464_vm4, %v3730_v20, 0.0  ;;  %vm1856_vm5 = vcmp.eq.s32.totalorder %v939_v6, %v3720_v0 }
 0x165   : > { %v2610_v12 = vpack.c.bf16 %v2524_v35, %v2523_v62  ;;  %v1723_v27 = vadd.f32 %v1595_v24, %v1331_v4  ;;  %v1724_v36 = vadd.f32 %v1596_v11, %v1332_v23  ;;  %v1987_v15 = vsel %vm1855_vm2, %v3736_v37, 0.0 }
 0x166   : > { %v1988_v5 = vsel %vm1856_vm5, %v3736_v37, 0.0  ;;  %vm2247_vm6 = vcmp.eq.s32.totalorder %v938_v22, %v3723_v3  ;;  %vm2248_vm7 = vcmp.eq.s32.totalorder %v939_v6, %v3723_v3  ;;  %v924_v19 = vadd.s32 416, %v3537_v2 }
 0x167   : > { %3064 = vmatprep.subr.bf16.mxu1 %v2610_v12  ;;  %v2115_v30 = vadd.f32 %v1987_v15, %v1723_v27  ;;  %v2116_v28 = vadd.f32 %v1988_v5, %v1724_v36  ;;  %v2379_v45 = vsel %vm2247_vm6, %v3740_v44, 0.0  ;;  %v2380_v16 = vsel %vm2248_vm7, %v3740_v44, 0.0 }
 0x168   : > { %v925_v46 = vadd.s32 424, %v3537_v2  ;;  %vm1185_vm8 = vcmp.eq.s32.totalorder %v924_v19, %v3705_v59  ;;  %vm1449_vm9 = vcmp.eq.s32.totalorder %v924_v19, %v3708_v60  ;;  %vm1841_vm10 = vcmp.eq.s32.totalorder %v924_v19, %v3720_v0 }
 0x169   : > { %v2507_v10 = vadd.f32 %v2379_v45, %v2115_v30  ;;  %v2508_v47 = vadd.f32 %v2380_v16, %v2116_v28  ;;  %v1317_v43 = vsel %vm1185_vm8, %v3717_v63, 0.0  ;;  %v1581_v48 = vsel %vm1449_vm9, %v3730_v20, 0.0 }
 0x16a   : > { %vm1186_vm11 = vcmp.eq.s32.totalorder %v925_v46, %v3705_v59  ;;  %vm1450_vm12 = vcmp.eq.s32.totalorder %v925_v46, %v3708_v60  ;;  %v1709_v7 = vadd.f32 %v1581_v48, %v1317_v43  ;;  %vm1842_vm13 = vcmp.eq.s32.totalorder %v925_v46, %v3720_v0 }
 0x16b   : > { %v2602_v49 = vpack.c.bf16 %v2508_v47, %v2507_v10  ;;  %v1318_v50 = vsel %vm1186_vm11, %v3717_v63, 0.0  ;;  %v1582_v40 = vsel %vm1450_vm12, %v3730_v20, 0.0  ;;  %v1973_v26 = vsel %vm1841_vm10, %v3736_v37, 0.0 }
 0x16c   : > { %v1710_v31 = vadd.f32 %v1582_v40, %v1318_v50  ;;  %v1974_v25 = vsel %vm1842_vm13, %v3736_v37, 0.0  ;;  %v2101_v32 = vadd.f32 %v1973_v26, %v1709_v7  ;;  %vm2233_vm14 = vcmp.eq.s32.totalorder %v924_v19, %v3723_v3 }
 0x16d   : > { %3065 = vmatpush3.bf16.msra.mxu1 %v2602_v49  ;;  %vm2234_vm15 = vcmp.eq.s32.totalorder %v925_v46, %v3723_v3  ;;  %v2365_v18 = vsel %vm2233_vm14, %v3740_v44, 0.0  ;;  %v908_v52 = vadd.s32 288, %v3537_v2  ;;  %v909_v51 = vadd.s32 296, %v3537_v2 }
 0x16e   : > { %v2102_v17 = vadd.f32 %v1974_v25, %v1710_v31  ;;  %v2366_v53 = vsel %vm2234_vm15, %v3740_v44, 0.0  ;;  %v2493_v54 = vadd.f32 %v2365_v18, %v2101_v32  ;;  %v956_v38 = vadd.s32 672, %v3537_v2 }
 0x16f   : > { %vm1169_vm0 = vcmp.eq.s32.totalorder %v908_v52, %v3705_v59  ;;  %vm1170_vm1 = vcmp.eq.s32.totalorder %v909_v51, %v3705_v59  ;;  %vm1433_vm2 = vcmp.eq.s32.totalorder %v908_v52, %v3708_v60  ;;  %vm1434_vm3 = vcmp.eq.s32.totalorder %v909_v51, %v3708_v60 }
 0x170   : > { %v2494_v8 = vadd.f32 %v2366_v53, %v2102_v17  ;;  %v1301_v9 = vsel %vm1169_vm0, %v3717_v63, 0.0  ;;  %v1302_v13 = vsel %vm1170_vm1, %v3717_v63, 0.0  ;;  %v1565_v14 = vsel %vm1433_vm2, %v3730_v20, 0.0 }
 0x171   : > { %v1566_v55 = vsel %vm1434_vm3, %v3730_v20, 0.0  ;;  %v1693_v29 = vadd.f32 %v1565_v14, %v1301_v9  ;;  %vm1825_vm4 = vcmp.eq.s32.totalorder %v908_v52, %v3720_v0  ;;  %vm1826_vm5 = vcmp.eq.s32.totalorder %v909_v51, %v3720_v0 }
 0x172   : > { %v2595_v1 = vpack.c.bf16 %v2494_v8, %v2493_v54  ;;  %v1694_v39 = vadd.f32 %v1566_v55, %v1302_v13  ;;  %v1957_v33 = vsel %vm1825_vm4, %v3736_v37, 0.0  ;;  %v1958_v41 = vsel %vm1826_vm5, %v3736_v37, 0.0 }
 0x173   : > { %v2085_v42 = vadd.f32 %v1957_v33, %v1693_v29  ;;  %vm2217_vm6 = vcmp.eq.s32.totalorder %v908_v52, %v3723_v3  ;;  %vm2218_vm7 = vcmp.eq.s32.totalorder %v909_v51, %v3723_v3  ;;  %v957_v34 = vadd.s32 680, %v3537_v2 }
 0x174   : > { %3044 = vmatprep.subr.bf16.mxu0 %v2595_v1  ;;  %v2086_v56 = vadd.f32 %v1958_v41, %v1694_v39  ;;  %v2349_v21 = vsel %vm2217_vm6, %v3740_v44, 0.0  ;;  %v2350_v22 = vsel %vm2218_vm7, %v3740_v44, 0.0  ;;  %vm1217_vm8 = vcmp.eq.s32.totalorder %v956_v38, %v3705_v59 }
 0x175   : > { %v2477_v57 = vadd.f32 %v2349_v21, %v2085_v42  ;;  %vm1218_vm9 = vcmp.eq.s32.totalorder %v957_v34, %v3705_v59  ;;  %v1349_v58 = vsel %vm1217_vm8, %v3717_v63, 0.0  ;;  %vm1481_vm10 = vcmp.eq.s32.totalorder %v956_v38, %v3708_v60 }
 0x176   : > { %v2478_v61 = vadd.f32 %v2350_v22, %v2086_v56  ;;  %v1350_v6 = vsel %vm1218_vm9, %v3717_v63, 0.0  ;;  %vm1482_vm11 = vcmp.eq.s32.totalorder %v957_v34, %v3708_v60  ;;  %v1613_v62 = vsel %vm1481_vm10, %v3730_v20, 0.0 }
 0x177   : > { %v1614_v35 = vsel %vm1482_vm11, %v3730_v20, 0.0  ;;  %v1741_v4 = vadd.f32 %v1613_v62, %v1349_v58  ;;  %vm1873_vm12 = vcmp.eq.s32.totalorder %v956_v38, %v3720_v0  ;;  %vm1874_vm13 = vcmp.eq.s32.totalorder %v957_v34, %v3720_v0 }
 0x178   : > { %v2587_v23 = vpack.c.bf16 %v2478_v61, %v2477_v57  ;;  %v1742_v24 = vadd.f32 %v1614_v35, %v1350_v6  ;;  %v2005_v11 = vsel %vm1873_vm12, %v3736_v37, 0.0  ;;  %v2006_v12 = vsel %vm1874_vm13, %v3736_v37, 0.0 }
 0x179   : > { %v2133_v27 = vadd.f32 %v2005_v11, %v1741_v4  ;;  %vm2265_vm14 = vcmp.eq.s32.totalorder %v956_v38, %v3723_v3  ;;  %vm2266_vm15 = vcmp.eq.s32.totalorder %v957_v34, %v3723_v3  ;;  %v940_v36 = vadd.s32 544, %v3537_v2 }
 0x17a   : > { %3045 = vmatpush3.bf16.msra.mxu0 %v2587_v23  ;;  %v2134_v15 = vadd.f32 %v2006_v12, %v1742_v24  ;;  %v2397_v5 = vsel %vm2265_vm14, %v3740_v44, 0.0  ;;  %v2398_v19 = vsel %vm2266_vm15, %v3740_v44, 0.0  ;;  %v941_v30 = vadd.s32 552, %v3537_v2 }
 0x17b   : > { %v2525_v28 = vadd.f32 %v2397_v5, %v2133_v27  ;;  %vm1201_vm0 = vcmp.eq.s32.totalorder %v940_v36, %v3705_v59  ;;  %vm1465_vm1 = vcmp.eq.s32.totalorder %v940_v36, %v3708_v60  ;;  %vm1857_vm2 = vcmp.eq.s32.totalorder %v940_v36, %v3720_v0 }
 0x17c   : > { %v2526_v45 = vadd.f32 %v2398_v19, %v2134_v15  ;;  %vm1202_vm3 = vcmp.eq.s32.totalorder %v941_v30, %v3705_v59  ;;  %v1333_v16 = vsel %vm1201_vm0, %v3717_v63, 0.0  ;;  %vm1466_vm4 = vcmp.eq.s32.totalorder %v941_v30, %v3708_v60 }
 0x17d   : > { %v1334_v46 = vsel %vm1202_vm3, %v3717_v63, 0.0  ;;  %v1597_v10 = vsel %vm1465_vm1, %v3730_v20, 0.0  ;;  %v1598_v47 = vsel %vm1466_vm4, %v3730_v20, 0.0  ;;  %vm1858_vm5 = vcmp.eq.s32.totalorder %v941_v30, %v3720_v0 }
 0x17e   : > { %v2611_v43 = vpack.c.bf16 %v2526_v45, %v2525_v28  ;;  %v1725_v48 = vadd.f32 %v1597_v10, %v1333_v16  ;;  %v1726_v7 = vadd.f32 %v1598_v47, %v1334_v46  ;;  %v1989_v49 = vsel %vm1857_vm2, %v3736_v37, 0.0 }
 0x17f   : > { %v1990_v50 = vsel %vm1858_vm5, %v3736_v37, 0.0  ;;  %vm2249_vm6 = vcmp.eq.s32.totalorder %v940_v36, %v3723_v3  ;;  %vm2250_vm7 = vcmp.eq.s32.totalorder %v941_v30, %v3723_v3  ;;  %v926_v40 = vadd.s32 432, %v3537_v2 }
 0x180   : > { %3066 = vmatprep.subr.bf16.mxu1 %v2611_v43  ;;  %v2117_v26 = vadd.f32 %v1989_v49, %v1725_v48  ;;  %v2118_v31 = vadd.f32 %v1990_v50, %v1726_v7  ;;  %v2381_v25 = vsel %vm2249_vm6, %v3740_v44, 0.0  ;;  %v2382_v32 = vsel %vm2250_vm7, %v3740_v44, 0.0 }
 0x181   : > { %v927_v18 = vadd.s32 440, %v3537_v2  ;;  %vm1187_vm8 = vcmp.eq.s32.totalorder %v926_v40, %v3705_v59  ;;  %vm1451_vm9 = vcmp.eq.s32.totalorder %v926_v40, %v3708_v60  ;;  %vm1843_vm10 = vcmp.eq.s32.totalorder %v926_v40, %v3720_v0 }
 0x182   : > { %v2509_v52 = vadd.f32 %v2381_v25, %v2117_v26  ;;  %v2510_v51 = vadd.f32 %v2382_v32, %v2118_v31  ;;  %v1319_v17 = vsel %vm1187_vm8, %v3717_v63, 0.0  ;;  %v1583_v53 = vsel %vm1451_vm9, %v3730_v20, 0.0 }
 0x183   : > { %vm1188_vm11 = vcmp.eq.s32.totalorder %v927_v18, %v3705_v59  ;;  %vm1452_vm12 = vcmp.eq.s32.totalorder %v927_v18, %v3708_v60  ;;  %v1711_v54 = vadd.f32 %v1583_v53, %v1319_v17  ;;  %vm1844_vm13 = vcmp.eq.s32.totalorder %v927_v18, %v3720_v0 }
 0x184   : > { %v2603_v38 = vpack.c.bf16 %v2510_v51, %v2509_v52  ;;  %v1320_v8 = vsel %vm1188_vm11, %v3717_v63, 0.0  ;;  %v1584_v9 = vsel %vm1452_vm12, %v3730_v20, 0.0  ;;  %v1975_v13 = vsel %vm1843_vm10, %v3736_v37, 0.0 }
 0x185   : > { %v1712_v14 = vadd.f32 %v1584_v9, %v1320_v8  ;;  %v1976_v55 = vsel %vm1844_vm13, %v3736_v37, 0.0  ;;  %v2103_v29 = vadd.f32 %v1975_v13, %v1711_v54  ;;  %vm2235_vm14 = vcmp.eq.s32.totalorder %v926_v40, %v3723_v3 }
 0x186   : > { %3067 = vmatpush3.bf16.msra.mxu1 %v2603_v38  ;;  %vm2236_vm15 = vcmp.eq.s32.totalorder %v927_v18, %v3723_v3  ;;  %v2367_v1 = vsel %vm2235_vm14, %v3740_v44, 0.0  ;;  %v910_v39 = vadd.s32 304, %v3537_v2  ;;  %v911_v33 = vadd.s32 312, %v3537_v2 }
 0x187   : > { %v2104_v41 = vadd.f32 %v1976_v55, %v1712_v14  ;;  %v2368_v42 = vsel %vm2236_vm15, %v3740_v44, 0.0  ;;  %v2495_v34 = vadd.f32 %v2367_v1, %v2103_v29  ;;  %v958_v56 = vadd.s32 688, %v3537_v2 }
 0x188   : > { %vm1171_vm0 = vcmp.eq.s32.totalorder %v910_v39, %v3705_v59  ;;  %vm1172_vm1 = vcmp.eq.s32.totalorder %v911_v33, %v3705_v59  ;;  %vm1435_vm2 = vcmp.eq.s32.totalorder %v910_v39, %v3708_v60  ;;  %vm1436_vm3 = vcmp.eq.s32.totalorder %v911_v33, %v3708_v60 }
 0x189   : > { %v2496_v21 = vadd.f32 %v2368_v42, %v2104_v41  ;;  %v1303_v22 = vsel %vm1171_vm0, %v3717_v63, 0.0  ;;  %v1304_v57 = vsel %vm1172_vm1, %v3717_v63, 0.0  ;;  %v1567_v58 = vsel %vm1435_vm2, %v3730_v20, 0.0 }
 0x18a   : > { %v1568_v61 = vsel %vm1436_vm3, %v3730_v20, 0.0  ;;  %v1695_v6 = vadd.f32 %v1567_v58, %v1303_v22  ;;  %vm1827_vm4 = vcmp.eq.s32.totalorder %v910_v39, %v3720_v0  ;;  %vm1828_vm5 = vcmp.eq.s32.totalorder %v911_v33, %v3720_v0 }
 0x18b   : > { %v2596_v62 = vpack.c.bf16 %v2496_v21, %v2495_v34  ;;  %v1696_v35 = vadd.f32 %v1568_v61, %v1304_v57  ;;  %v1959_v4 = vsel %vm1827_vm4, %v3736_v37, 0.0  ;;  %v1960_v23 = vsel %vm1828_vm5, %v3736_v37, 0.0 }
 0x18c   : > { %v2087_v24 = vadd.f32 %v1959_v4, %v1695_v6  ;;  %vm2219_vm6 = vcmp.eq.s32.totalorder %v910_v39, %v3723_v3  ;;  %vm2220_vm7 = vcmp.eq.s32.totalorder %v911_v33, %v3723_v3  ;;  %v959_v11 = vadd.s32 696, %v3537_v2 }
 0x18d   : > { %3046 = vmatprep.subr.bf16.mxu0 %v2596_v62  ;;  %v2088_v12 = vadd.f32 %v1960_v23, %v1696_v35  ;;  %v2351_v27 = vsel %vm2219_vm6, %v3740_v44, 0.0  ;;  %v2352_v36 = vsel %vm2220_vm7, %v3740_v44, 0.0  ;;  %vm1219_vm8 = vcmp.eq.s32.totalorder %v958_v56, %v3705_v59 }
 0x18e   : > { %v2479_v15 = vadd.f32 %v2351_v27, %v2087_v24  ;;  %vm1220_vm9 = vcmp.eq.s32.totalorder %v959_v11, %v3705_v59  ;;  %v1351_v5 = vsel %vm1219_vm8, %v3717_v63, 0.0  ;;  %vm1483_vm10 = vcmp.eq.s32.totalorder %v958_v56, %v3708_v60 }
 0x18f   : > { %v2480_v19 = vadd.f32 %v2352_v36, %v2088_v12  ;;  %v1352_v30 = vsel %vm1220_vm9, %v3717_v63, 0.0  ;;  %vm1484_vm11 = vcmp.eq.s32.totalorder %v959_v11, %v3708_v60  ;;  %v1615_v28 = vsel %vm1483_vm10, %v3730_v20, 0.0 }
 0x190   : > { %v1616_v45 = vsel %vm1484_vm11, %v3730_v20, 0.0  ;;  %v1743_v16 = vadd.f32 %v1615_v28, %v1351_v5  ;;  %vm1875_vm12 = vcmp.eq.s32.totalorder %v958_v56, %v3720_v0  ;;  %vm1876_vm13 = vcmp.eq.s32.totalorder %v959_v11, %v3720_v0 }
 0x191   : > { %v2588_v46 = vpack.c.bf16 %v2480_v19, %v2479_v15  ;;  %v1744_v10 = vadd.f32 %v1616_v45, %v1352_v30  ;;  %v2007_v47 = vsel %vm1875_vm12, %v3736_v37, 0.0  ;;  %v2008_v43 = vsel %vm1876_vm13, %v3736_v37, 0.0 }
 0x192   : > { %v2135_v48 = vadd.f32 %v2007_v47, %v1743_v16  ;;  %vm2267_vm14 = vcmp.eq.s32.totalorder %v958_v56, %v3723_v3  ;;  %vm2268_vm15 = vcmp.eq.s32.totalorder %v959_v11, %v3723_v3  ;;  %v942_v7 = vadd.s32 560, %v3537_v2 }
 0x193   : > { %3047 = vmatpush3.bf16.msra.mxu0 %v2588_v46  ;;  %v2136_v49 = vadd.f32 %v2008_v43, %v1744_v10  ;;  %v2399_v50 = vsel %vm2267_vm14, %v3740_v44, 0.0  ;;  %v2400_v40 = vsel %vm2268_vm15, %v3740_v44, 0.0  ;;  %v943_v26 = vadd.s32 568, %v3537_v2 }
 0x194   : > { %v2527_v31 = vadd.f32 %v2399_v50, %v2135_v48  ;;  %vm1203_vm0 = vcmp.eq.s32.totalorder %v942_v7, %v3705_v59  ;;  %vm1467_vm1 = vcmp.eq.s32.totalorder %v942_v7, %v3708_v60  ;;  %vm1859_vm2 = vcmp.eq.s32.totalorder %v942_v7, %v3720_v0 }
 0x195   : > { %v2528_v25 = vadd.f32 %v2400_v40, %v2136_v49  ;;  %vm1204_vm3 = vcmp.eq.s32.totalorder %v943_v26, %v3705_v59  ;;  %v1335_v32 = vsel %vm1203_vm0, %v3717_v63, 0.0  ;;  %vm1468_vm4 = vcmp.eq.s32.totalorder %v943_v26, %v3708_v60 }
 0x196   : > { %v1336_v18 = vsel %vm1204_vm3, %v3717_v63, 0.0  ;;  %v1599_v52 = vsel %vm1467_vm1, %v3730_v20, 0.0  ;;  %v1600_v51 = vsel %vm1468_vm4, %v3730_v20, 0.0  ;;  %vm1860_vm5 = vcmp.eq.s32.totalorder %v943_v26, %v3720_v0 }
 0x197   : > { %v2612_v17 = vpack.c.bf16 %v2528_v25, %v2527_v31  ;;  %v1727_v53 = vadd.f32 %v1599_v52, %v1335_v32  ;;  %v1728_v54 = vadd.f32 %v1600_v51, %v1336_v18  ;;  %v1991_v38 = vsel %vm1859_vm2, %v3736_v37, 0.0 }
 0x198   : > { %v1992_v8 = vsel %vm1860_vm5, %v3736_v37, 0.0  ;;  %vm2251_vm6 = vcmp.eq.s32.totalorder %v942_v7, %v3723_v3  ;;  %vm2252_vm7 = vcmp.eq.s32.totalorder %v943_v26, %v3723_v3  ;;  %v928_v9 = vadd.s32 448, %v3537_v2 }
 0x199   : > { %3068 = vmatprep.subr.bf16.mxu1 %v2612_v17  ;;  %v2119_v13 = vadd.f32 %v1991_v38, %v1727_v53  ;;  %v2120_v14 = vadd.f32 %v1992_v8, %v1728_v54  ;;  %v2383_v55 = vsel %vm2251_vm6, %v3740_v44, 0.0  ;;  %v2384_v29 = vsel %vm2252_vm7, %v3740_v44, 0.0 }
 0x19a   : > { %v929_v1 = vadd.s32 456, %v3537_v2  ;;  %vm1189_vm8 = vcmp.eq.s32.totalorder %v928_v9, %v3705_v59  ;;  %vm1453_vm9 = vcmp.eq.s32.totalorder %v928_v9, %v3708_v60  ;;  %vm1845_vm10 = vcmp.eq.s32.totalorder %v928_v9, %v3720_v0 }
 0x19b   : > { %v2511_v39 = vadd.f32 %v2383_v55, %v2119_v13  ;;  %v2512_v33 = vadd.f32 %v2384_v29, %v2120_v14  ;;  %v1321_v41 = vsel %vm1189_vm8, %v3717_v63, 0.0  ;;  %v1585_v42 = vsel %vm1453_vm9, %v3730_v20, 0.0 }
 0x19c   : > { %vm1190_vm11 = vcmp.eq.s32.totalorder %v929_v1, %v3705_v59  ;;  %vm1454_vm12 = vcmp.eq.s32.totalorder %v929_v1, %v3708_v60  ;;  %v1713_v34 = vadd.f32 %v1585_v42, %v1321_v41  ;;  %vm1846_vm13 = vcmp.eq.s32.totalorder %v929_v1, %v3720_v0 }
 0x19d   : > { %v2604_v56 = vpack.c.bf16 %v2512_v33, %v2511_v39  ;;  %v1322_v21 = vsel %vm1190_vm11, %v3717_v63, 0.0  ;;  %v1586_v22 = vsel %vm1454_vm12, %v3730_v20, 0.0  ;;  %v1977_v57 = vsel %vm1845_vm10, %v3736_v37, 0.0 }
 0x19e   : > { %v1714_v58 = vadd.f32 %v1586_v22, %v1322_v21  ;;  %v1978_v61 = vsel %vm1846_vm13, %v3736_v37, 0.0  ;;  %v2105_v6 = vadd.f32 %v1977_v57, %v1713_v34  ;;  %vm2237_vm14 = vcmp.eq.s32.totalorder %v928_v9, %v3723_v3 }
 0x19f   : > { %3069 = vmatpush3.bf16.msra.mxu1 %v2604_v56  ;;  %vm2238_vm15 = vcmp.eq.s32.totalorder %v929_v1, %v3723_v3  ;;  %v2369_v62 = vsel %vm2237_vm14, %v3740_v44, 0.0  ;;  %v912_v35 = vadd.s32 320, %v3537_v2  ;;  %v913_v4 = vadd.s32 328, %v3537_v2 }
 0x1a0   : > { %v2106_v23 = vadd.f32 %v1978_v61, %v1714_v58  ;;  %v2370_v24 = vsel %vm2238_vm15, %v3740_v44, 0.0  ;;  %v2497_v11 = vadd.f32 %v2369_v62, %v2105_v6  ;;  %v960_v12 = vadd.s32 704, %v3537_v2 }
 0x1a1   : > { %vm1173_vm0 = vcmp.eq.s32.totalorder %v912_v35, %v3705_v59  ;;  %vm1174_vm1 = vcmp.eq.s32.totalorder %v913_v4, %v3705_v59  ;;  %vm1437_vm2 = vcmp.eq.s32.totalorder %v912_v35, %v3708_v60  ;;  %vm1438_vm3 = vcmp.eq.s32.totalorder %v913_v4, %v3708_v60 }
 0x1a2   : > { %v2498_v27 = vadd.f32 %v2370_v24, %v2106_v23  ;;  %v1305_v36 = vsel %vm1173_vm0, %v3717_v63, 0.0  ;;  %v1306_v15 = vsel %vm1174_vm1, %v3717_v63, 0.0  ;;  %v1569_v5 = vsel %vm1437_vm2, %v3730_v20, 0.0 }
 0x1a3   : > { %v1570_v19 = vsel %vm1438_vm3, %v3730_v20, 0.0  ;;  %v1697_v30 = vadd.f32 %v1569_v5, %v1305_v36  ;;  %vm1829_vm4 = vcmp.eq.s32.totalorder %v912_v35, %v3720_v0  ;;  %vm1830_vm5 = vcmp.eq.s32.totalorder %v913_v4, %v3720_v0 }
 0x1a4   : > { %v2597_v28 = vpack.c.bf16 %v2498_v27, %v2497_v11  ;;  %v1698_v45 = vadd.f32 %v1570_v19, %v1306_v15  ;;  %v1961_v16 = vsel %vm1829_vm4, %v3736_v37, 0.0  ;;  %v1962_v46 = vsel %vm1830_vm5, %v3736_v37, 0.0 }
 0x1a5   : > { %v2089_v10 = vadd.f32 %v1961_v16, %v1697_v30  ;;  %vm2221_vm6 = vcmp.eq.s32.totalorder %v912_v35, %v3723_v3  ;;  %vm2222_vm7 = vcmp.eq.s32.totalorder %v913_v4, %v3723_v3  ;;  %v961_v47 = vadd.s32 712, %v3537_v2 }
 0x1a6   : > { %3048 = vmatprep.subr.bf16.mxu0 %v2597_v28  ;;  %v2090_v43 = vadd.f32 %v1962_v46, %v1698_v45  ;;  %v2353_v48 = vsel %vm2221_vm6, %v3740_v44, 0.0  ;;  %v2354_v7 = vsel %vm2222_vm7, %v3740_v44, 0.0  ;;  %vm1221_vm8 = vcmp.eq.s32.totalorder %v960_v12, %v3705_v59 }
 0x1a7   : > { %v2481_v49 = vadd.f32 %v2353_v48, %v2089_v10  ;;  %vm1222_vm9 = vcmp.eq.s32.totalorder %v961_v47, %v3705_v59  ;;  %v1353_v50 = vsel %vm1221_vm8, %v3717_v63, 0.0  ;;  %vm1485_vm10 = vcmp.eq.s32.totalorder %v960_v12, %v3708_v60 }
 0x1a8   : > { %v2482_v40 = vadd.f32 %v2354_v7, %v2090_v43  ;;  %v1354_v26 = vsel %vm1222_vm9, %v3717_v63, 0.0  ;;  %vm1486_vm11 = vcmp.eq.s32.totalorder %v961_v47, %v3708_v60  ;;  %v1617_v31 = vsel %vm1485_vm10, %v3730_v20, 0.0 }
 0x1a9   : > { %v1618_v25 = vsel %vm1486_vm11, %v3730_v20, 0.0  ;;  %v1745_v32 = vadd.f32 %v1617_v31, %v1353_v50  ;;  %vm1877_vm12 = vcmp.eq.s32.totalorder %v960_v12, %v3720_v0  ;;  %vm1878_vm13 = vcmp.eq.s32.totalorder %v961_v47, %v3720_v0 }
 0x1aa   : > { %v2589_v18 = vpack.c.bf16 %v2482_v40, %v2481_v49  ;;  %v1746_v52 = vadd.f32 %v1618_v25, %v1354_v26  ;;  %v2009_v51 = vsel %vm1877_vm12, %v3736_v37, 0.0  ;;  %v2010_v17 = vsel %vm1878_vm13, %v3736_v37, 0.0 }
 0x1ab   : > { %v2137_v53 = vadd.f32 %v2009_v51, %v1745_v32  ;;  %vm2269_vm14 = vcmp.eq.s32.totalorder %v960_v12, %v3723_v3  ;;  %vm2270_vm15 = vcmp.eq.s32.totalorder %v961_v47, %v3723_v3  ;;  %v944_v54 = vadd.s32 576, %v3537_v2 }
 0x1ac   : > { %3049 = vmatpush3.bf16.msra.mxu0 %v2589_v18  ;;  %v2138_v38 = vadd.f32 %v2010_v17, %v1746_v52  ;;  %v2401_v8 = vsel %vm2269_vm14, %v3740_v44, 0.0  ;;  %v2402_v9 = vsel %vm2270_vm15, %v3740_v44, 0.0  ;;  %v945_v13 = vadd.s32 584, %v3537_v2 }
 0x1ad   : > { %v2529_v14 = vadd.f32 %v2401_v8, %v2137_v53  ;;  %vm1205_vm0 = vcmp.eq.s32.totalorder %v944_v54, %v3705_v59  ;;  %vm1469_vm1 = vcmp.eq.s32.totalorder %v944_v54, %v3708_v60  ;;  %vm1861_vm2 = vcmp.eq.s32.totalorder %v944_v54, %v3720_v0 }
 0x1ae   : > { %v2530_v55 = vadd.f32 %v2402_v9, %v2138_v38  ;;  %vm1206_vm3 = vcmp.eq.s32.totalorder %v945_v13, %v3705_v59  ;;  %v1337_v29 = vsel %vm1205_vm0, %v3717_v63, 0.0  ;;  %vm1470_vm4 = vcmp.eq.s32.totalorder %v945_v13, %v3708_v60 }
 0x1af   : > { %v1338_v1 = vsel %vm1206_vm3, %v3717_v63, 0.0  ;;  %v1601_v39 = vsel %vm1469_vm1, %v3730_v20, 0.0  ;;  %v1602_v33 = vsel %vm1470_vm4, %v3730_v20, 0.0  ;;  %vm1862_vm5 = vcmp.eq.s32.totalorder %v945_v13, %v3720_v0 }
 0x1b0   : > { %v2613_v41 = vpack.c.bf16 %v2530_v55, %v2529_v14  ;;  %v1729_v42 = vadd.f32 %v1601_v39, %v1337_v29  ;;  %v1730_v34 = vadd.f32 %v1602_v33, %v1338_v1  ;;  %v1993_v56 = vsel %vm1861_vm2, %v3736_v37, 0.0 }
 0x1b1   : > { %v1994_v21 = vsel %vm1862_vm5, %v3736_v37, 0.0  ;;  %vm2253_vm6 = vcmp.eq.s32.totalorder %v944_v54, %v3723_v3  ;;  %vm2254_vm7 = vcmp.eq.s32.totalorder %v945_v13, %v3723_v3  ;;  %v930_v22 = vadd.s32 464, %v3537_v2 }
 0x1b2   : > { %3070 = vmatprep.subr.bf16.mxu1 %v2613_v41  ;;  %v2121_v57 = vadd.f32 %v1993_v56, %v1729_v42  ;;  %v2122_v58 = vadd.f32 %v1994_v21, %v1730_v34  ;;  %v2385_v61 = vsel %vm2253_vm6, %v3740_v44, 0.0  ;;  %v2386_v6 = vsel %vm2254_vm7, %v3740_v44, 0.0 }
 0x1b3   : > { %v931_v62 = vadd.s32 472, %v3537_v2  ;;  %vm1191_vm8 = vcmp.eq.s32.totalorder %v930_v22, %v3705_v59  ;;  %vm1455_vm9 = vcmp.eq.s32.totalorder %v930_v22, %v3708_v60  ;;  %vm1847_vm10 = vcmp.eq.s32.totalorder %v930_v22, %v3720_v0 }
 0x1b4   : > { %v2513_v35 = vadd.f32 %v2385_v61, %v2121_v57  ;;  %v2514_v4 = vadd.f32 %v2386_v6, %v2122_v58  ;;  %v1323_v23 = vsel %vm1191_vm8, %v3717_v63, 0.0  ;;  %v1587_v24 = vsel %vm1455_vm9, %v3730_v20, 0.0 }
 0x1b5   : > { %vm1192_vm11 = vcmp.eq.s32.totalorder %v931_v62, %v3705_v59  ;;  %vm1456_vm12 = vcmp.eq.s32.totalorder %v931_v62, %v3708_v60  ;;  %v1715_v11 = vadd.f32 %v1587_v24, %v1323_v23  ;;  %vm1848_vm13 = vcmp.eq.s32.totalorder %v931_v62, %v3720_v0 }
 0x1b6   : > { %v2605_v12 = vpack.c.bf16 %v2514_v4, %v2513_v35  ;;  %v1324_v27 = vsel %vm1192_vm11, %v3717_v63, 0.0  ;;  %v1588_v36 = vsel %vm1456_vm12, %v3730_v20, 0.0  ;;  %v1979_v15 = vsel %vm1847_vm10, %v3736_v37, 0.0 }
 0x1b7   : > { %v1716_v5 = vadd.f32 %v1588_v36, %v1324_v27  ;;  %v1980_v19 = vsel %vm1848_vm13, %v3736_v37, 0.0  ;;  %v2107_v30 = vadd.f32 %v1979_v15, %v1715_v11  ;;  %vm2239_vm14 = vcmp.eq.s32.totalorder %v930_v22, %v3723_v3 }
 0x1b8   : > { %3071 = vmatpush3.bf16.msra.mxu1 %v2605_v12  ;;  %vm2240_vm15 = vcmp.eq.s32.totalorder %v931_v62, %v3723_v3  ;;  %v2371_v28 = vsel %vm2239_vm14, %v3740_v44, 0.0  ;;  %v914_v45 = vadd.s32 336, %v3537_v2  ;;  %v915_v16 = vadd.s32 344, %v3537_v2 }
 0x1b9   : > { %v2108_v46 = vadd.f32 %v1980_v19, %v1716_v5  ;;  %v2372_v10 = vsel %vm2240_vm15, %v3740_v44, 0.0  ;;  %v2499_v47 = vadd.f32 %v2371_v28, %v2107_v30  ;;  %v962_v43 = vadd.s32 720, %v3537_v2 }
 0x1ba   : > { %vm1175_vm0 = vcmp.eq.s32.totalorder %v914_v45, %v3705_v59  ;;  %vm1176_vm1 = vcmp.eq.s32.totalorder %v915_v16, %v3705_v59  ;;  %vm1439_vm2 = vcmp.eq.s32.totalorder %v914_v45, %v3708_v60  ;;  %vm1440_vm3 = vcmp.eq.s32.totalorder %v915_v16, %v3708_v60 }
 0x1bb   : > { %v2500_v48 = vadd.f32 %v2372_v10, %v2108_v46  ;;  %v1307_v7 = vsel %vm1175_vm0, %v3717_v63, 0.0  ;;  %v1308_v49 = vsel %vm1176_vm1, %v3717_v63, 0.0  ;;  %v1571_v50 = vsel %vm1439_vm2, %v3730_v20, 0.0 }
 0x1bc   : > { %v1572_v40 = vsel %vm1440_vm3, %v3730_v20, 0.0  ;;  %v1699_v26 = vadd.f32 %v1571_v50, %v1307_v7  ;;  %vm1831_vm4 = vcmp.eq.s32.totalorder %v914_v45, %v3720_v0  ;;  %vm1832_vm5 = vcmp.eq.s32.totalorder %v915_v16, %v3720_v0 }
 0x1bd   : > { %v2598_v31 = vpack.c.bf16 %v2500_v48, %v2499_v47  ;;  %v1700_v25 = vadd.f32 %v1572_v40, %v1308_v49  ;;  %v1963_v32 = vsel %vm1831_vm4, %v3736_v37, 0.0  ;;  %v1964_v18 = vsel %vm1832_vm5, %v3736_v37, 0.0 }
 0x1be   : > { %v2091_v52 = vadd.f32 %v1963_v32, %v1699_v26  ;;  %vm2223_vm6 = vcmp.eq.s32.totalorder %v914_v45, %v3723_v3  ;;  %vm2224_vm7 = vcmp.eq.s32.totalorder %v915_v16, %v3723_v3  ;;  %v963_v51 = vadd.s32 728, %v3537_v2 }
 0x1bf   : > { %3050 = vmatprep.subr.bf16.mxu0 %v2598_v31  ;;  %v2092_v17 = vadd.f32 %v1964_v18, %v1700_v25  ;;  %v2355_v53 = vsel %vm2223_vm6, %v3740_v44, 0.0  ;;  %v2356_v54 = vsel %vm2224_vm7, %v3740_v44, 0.0  ;;  %vm1223_vm8 = vcmp.eq.s32.totalorder %v962_v43, %v3705_v59 }
 0x1c0   : > { %v2483_v38 = vadd.f32 %v2355_v53, %v2091_v52  ;;  %vm1224_vm9 = vcmp.eq.s32.totalorder %v963_v51, %v3705_v59  ;;  %v1355_v8 = vsel %vm1223_vm8, %v3717_v63, 0.0  ;;  %vm1487_vm10 = vcmp.eq.s32.totalorder %v962_v43, %v3708_v60 }
 0x1c1   : > { %v2484_v9 = vadd.f32 %v2356_v54, %v2092_v17  ;;  %v1356_v13 = vsel %vm1224_vm9, %v3717_v63, 0.0  ;;  %vm1488_vm11 = vcmp.eq.s32.totalorder %v963_v51, %v3708_v60  ;;  %v1619_v14 = vsel %vm1487_vm10, %v3730_v20, 0.0 }
 0x1c2   : > { %v1620_v55 = vsel %vm1488_vm11, %v3730_v20, 0.0  ;;  %v1747_v29 = vadd.f32 %v1619_v14, %v1355_v8  ;;  %vm1879_vm12 = vcmp.eq.s32.totalorder %v962_v43, %v3720_v0  ;;  %vm1880_vm13 = vcmp.eq.s32.totalorder %v963_v51, %v3720_v0 }
 0x1c3   : > { %v2590_v1 = vpack.c.bf16 %v2484_v9, %v2483_v38  ;;  %v1748_v39 = vadd.f32 %v1620_v55, %v1356_v13  ;;  %v2011_v33 = vsel %vm1879_vm12, %v3736_v37, 0.0  ;;  %v2012_v41 = vsel %vm1880_vm13, %v3736_v37, 0.0 }
 0x1c4   : > { %v2139_v42 = vadd.f32 %v2011_v33, %v1747_v29  ;;  %vm2271_vm14 = vcmp.eq.s32.totalorder %v962_v43, %v3723_v3  ;;  %vm2272_vm15 = vcmp.eq.s32.totalorder %v963_v51, %v3723_v3  ;;  %v946_v34 = vadd.s32 592, %v3537_v2 }
 0x1c5   : > { %3051 = vmatpush3.bf16.msra.mxu0 %v2590_v1  ;;  %v2140_v56 = vadd.f32 %v2012_v41, %v1748_v39  ;;  %v2403_v21 = vsel %vm2271_vm14, %v3740_v44, 0.0  ;;  %v2404_v22 = vsel %vm2272_vm15, %v3740_v44, 0.0  ;;  %v947_v57 = vadd.s32 600, %v3537_v2 }
 0x1c6   : > { %v2531_v58 = vadd.f32 %v2403_v21, %v2139_v42  ;;  %vm1207_vm0 = vcmp.eq.s32.totalorder %v946_v34, %v3705_v59  ;;  %vm1471_vm1 = vcmp.eq.s32.totalorder %v946_v34, %v3708_v60  ;;  %vm1863_vm2 = vcmp.eq.s32.totalorder %v946_v34, %v3720_v0 }
 0x1c7   : > { %v2532_v61 = vadd.f32 %v2404_v22, %v2140_v56  ;;  %vm1208_vm3 = vcmp.eq.s32.totalorder %v947_v57, %v3705_v59  ;;  %v1339_v6 = vsel %vm1207_vm0, %v3717_v63, 0.0  ;;  %vm1472_vm4 = vcmp.eq.s32.totalorder %v947_v57, %v3708_v60 }
 0x1c8   : > { %v1340_v62 = vsel %vm1208_vm3, %v3717_v63, 0.0  ;;  %v1603_v35 = vsel %vm1471_vm1, %v3730_v20, 0.0  ;;  %v1604_v4 = vsel %vm1472_vm4, %v3730_v20, 0.0  ;;  %vm1864_vm5 = vcmp.eq.s32.totalorder %v947_v57, %v3720_v0 }
 0x1c9   : > { %v2614_v23 = vpack.c.bf16 %v2532_v61, %v2531_v58  ;;  %v1731_v24 = vadd.f32 %v1603_v35, %v1339_v6  ;;  %v1732_v11 = vadd.f32 %v1604_v4, %v1340_v62  ;;  %v1995_v12 = vsel %vm1863_vm2, %v3736_v37, 0.0 }
 0x1ca   : > { %v1996_v27 = vsel %vm1864_vm5, %v3736_v37, 0.0  ;;  %vm2255_vm6 = vcmp.eq.s32.totalorder %v946_v34, %v3723_v3  ;;  %vm2256_vm7 = vcmp.eq.s32.totalorder %v947_v57, %v3723_v3  ;;  %v932_v36 = vadd.s32 480, %v3537_v2 }
 0x1cb   : > { %3072 = vmatprep.subr.bf16.mxu1 %v2614_v23  ;;  %v2123_v15 = vadd.f32 %v1995_v12, %v1731_v24  ;;  %v2124_v5 = vadd.f32 %v1996_v27, %v1732_v11  ;;  %v2387_v19 = vsel %vm2255_vm6, %v3740_v44, 0.0  ;;  %v2388_v30 = vsel %vm2256_vm7, %v3740_v44, 0.0 }
 0x1cc   : > { %v933_v28 = vadd.s32 488, %v3537_v2  ;;  %vm1193_vm8 = vcmp.eq.s32.totalorder %v932_v36, %v3705_v59  ;;  %vm1457_vm9 = vcmp.eq.s32.totalorder %v932_v36, %v3708_v60  ;;  %vm1849_vm10 = vcmp.eq.s32.totalorder %v932_v36, %v3720_v0 }
 0x1cd   : > { %v2515_v45 = vadd.f32 %v2387_v19, %v2123_v15  ;;  %v2516_v16 = vadd.f32 %v2388_v30, %v2124_v5  ;;  %v1325_v46 = vsel %vm1193_vm8, %v3717_v63, 0.0  ;;  %v1589_v10 = vsel %vm1457_vm9, %v3730_v20, 0.0 }
 0x1ce   : > { %vm1194_vm11 = vcmp.eq.s32.totalorder %v933_v28, %v3705_v59  ;;  %vm1458_vm12 = vcmp.eq.s32.totalorder %v933_v28, %v3708_v60  ;;  %v1717_v47 = vadd.f32 %v1589_v10, %v1325_v46  ;;  %vm1850_vm13 = vcmp.eq.s32.totalorder %v933_v28, %v3720_v0 }
 0x1cf   : > { %v2606_v43 = vpack.c.bf16 %v2516_v16, %v2515_v45  ;;  %v1326_v48 = vsel %vm1194_vm11, %v3717_v63, 0.0  ;;  %v1590_v7 = vsel %vm1458_vm12, %v3730_v20, 0.0  ;;  %v1981_v49 = vsel %vm1849_vm10, %v3736_v37, 0.0 }
 0x1d0   : > { %v1718_v50 = vadd.f32 %v1590_v7, %v1326_v48  ;;  %v1982_v40 = vsel %vm1850_vm13, %v3736_v37, 0.0  ;;  %v2109_v26 = vadd.f32 %v1981_v49, %v1717_v47  ;;  %vm2241_vm14 = vcmp.eq.s32.totalorder %v932_v36, %v3723_v3 }
 0x1d1   : > { %3073 = vmatpush3.bf16.msra.mxu1 %v2606_v43  ;;  %vm2242_vm15 = vcmp.eq.s32.totalorder %v933_v28, %v3723_v3  ;;  %v2373_v31 = vsel %vm2241_vm14, %v3740_v44, 0.0  ;;  %v916_v25 = vadd.s32 352, %v3537_v2  ;;  %v917_v32 = vadd.s32 360, %v3537_v2 }
 0x1d2   : > { %v2110_v18 = vadd.f32 %v1982_v40, %v1718_v50  ;;  %v2374_v52 = vsel %vm2242_vm15, %v3740_v44, 0.0  ;;  %v2501_v51 = vadd.f32 %v2373_v31, %v2109_v26  ;;  %v964_v17 = vadd.s32 736, %v3537_v2 }
 0x1d3   : > { %vm1177_vm0 = vcmp.eq.s32.totalorder %v916_v25, %v3705_v59  ;;  %vm1178_vm1 = vcmp.eq.s32.totalorder %v917_v32, %v3705_v59  ;;  %vm1441_vm2 = vcmp.eq.s32.totalorder %v916_v25, %v3708_v60  ;;  %vm1442_vm3 = vcmp.eq.s32.totalorder %v917_v32, %v3708_v60 }
 0x1d4   : > { %v2502_v53 = vadd.f32 %v2374_v52, %v2110_v18  ;;  %v1309_v54 = vsel %vm1177_vm0, %v3717_v63, 0.0  ;;  %v1310_v38 = vsel %vm1178_vm1, %v3717_v63, 0.0  ;;  %v1573_v8 = vsel %vm1441_vm2, %v3730_v20, 0.0 }
 0x1d5   : > { %v1574_v9 = vsel %vm1442_vm3, %v3730_v20, 0.0  ;;  %v1701_v13 = vadd.f32 %v1573_v8, %v1309_v54  ;;  %vm1833_vm4 = vcmp.eq.s32.totalorder %v916_v25, %v3720_v0  ;;  %vm1834_vm5 = vcmp.eq.s32.totalorder %v917_v32, %v3720_v0 }
 0x1d6   : > { %v2599_v14 = vpack.c.bf16 %v2502_v53, %v2501_v51  ;;  %v1702_v55 = vadd.f32 %v1574_v9, %v1310_v38  ;;  %v1965_v29 = vsel %vm1833_vm4, %v3736_v37, 0.0  ;;  %v1966_v1 = vsel %vm1834_vm5, %v3736_v37, 0.0 }
 0x1d7   : > { %v2093_v39 = vadd.f32 %v1965_v29, %v1701_v13  ;;  %vm2225_vm6 = vcmp.eq.s32.totalorder %v916_v25, %v3723_v3  ;;  %vm2226_vm7 = vcmp.eq.s32.totalorder %v917_v32, %v3723_v3  ;;  %v965_v33 = vadd.s32 744, %v3537_v2 }
 0x1d8   : > { %3052 = vmatprep.subr.bf16.mxu0 %v2599_v14  ;;  %v2094_v41 = vadd.f32 %v1966_v1, %v1702_v55  ;;  %v2357_v42 = vsel %vm2225_vm6, %v3740_v44, 0.0  ;;  %v2358_v34 = vsel %vm2226_vm7, %v3740_v44, 0.0  ;;  %vm1225_vm8 = vcmp.eq.s32.totalorder %v964_v17, %v3705_v59 }
 0x1d9   : > { %v2485_v56 = vadd.f32 %v2357_v42, %v2093_v39  ;;  %vm1226_vm9 = vcmp.eq.s32.totalorder %v965_v33, %v3705_v59  ;;  %v1357_v21 = vsel %vm1225_vm8, %v3717_v63, 0.0  ;;  %vm1489_vm10 = vcmp.eq.s32.totalorder %v964_v17, %v3708_v60  ;;  %v771_v42 = vld [vmem:[%s5503_s3] sm:$0xff] }
 0x1da   : > { %v2486_v22 = vadd.f32 %v2358_v34, %v2094_v41  ;;  %v1358_v57 = vsel %vm1226_vm9, %v3717_v63, 0.0  ;;  %vm1490_vm11 = vcmp.eq.s32.totalorder %v965_v33, %v3708_v60  ;;  %v1621_v58 = vsel %vm1489_vm10, %v3730_v20, 0.0  ;;  %774 = vperm.xlu0 %3178, %v771_v42  }
 0x1db   : > { %v1622_v61 = vsel %vm1490_vm11, %v3730_v20, 0.0  ;;  %v1749_v6 = vadd.f32 %v1621_v58, %v1357_v21  ;;  %vm1881_vm12 = vcmp.eq.s32.totalorder %v964_v17, %v3720_v0  ;;  %vm1882_vm13 = vcmp.eq.s32.totalorder %v965_v33, %v3720_v0 }
 0x1dc   : > { %v2591_v62 = vpack.c.bf16 %v2486_v22, %v2485_v56  ;;  %v1750_v35 = vadd.f32 %v1622_v61, %v1358_v57  ;;  %v2013_v4 = vsel %vm1881_vm12, %v3736_v37, 0.0  ;;  %v2014_v23 = vsel %vm1882_vm13, %v3736_v37, 0.0 }
 0x1dd   : > { %v2141_v24 = vadd.f32 %v2013_v4, %v1749_v6  ;;  %vm2273_vm14 = vcmp.eq.s32.totalorder %v964_v17, %v3723_v3  ;;  %vm2274_vm15 = vcmp.eq.s32.totalorder %v965_v33, %v3723_v3  ;;  %v948_v11 = vadd.s32 608, %v3537_v2 }
 0x1de   : > { %3053 = vmatpush3.bf16.msra.mxu0 %v2591_v62  ;;  %v2142_v12 = vadd.f32 %v2014_v23, %v1750_v35  ;;  %v2405_v27 = vsel %vm2273_vm14, %v3740_v44, 0.0  ;;  %v2406_v36 = vsel %vm2274_vm15, %v3740_v44, 0.0  ;;  %v949_v15 = vadd.s32 616, %v3537_v2 }
 0x1df   : > { %v2533_v5 = vadd.f32 %v2405_v27, %v2141_v24  ;;  %vm1209_vm0 = vcmp.eq.s32.totalorder %v948_v11, %v3705_v59  ;;  %vm1473_vm1 = vcmp.eq.s32.totalorder %v948_v11, %v3708_v60  ;;  %vm1865_vm2 = vcmp.eq.s32.totalorder %v948_v11, %v3720_v0 }
 0x1e0   : > { %v2534_v19 = vadd.f32 %v2406_v36, %v2142_v12  ;;  %vm1210_vm3 = vcmp.eq.s32.totalorder %v949_v15, %v3705_v59  ;;  %v1341_v30 = vsel %vm1209_vm0, %v3717_v63, 0.0  ;;  %vm1474_vm4 = vcmp.eq.s32.totalorder %v949_v15, %v3708_v60 }
 0x1e1   : > { %v1342_v28 = vsel %vm1210_vm3, %v3717_v63, 0.0  ;;  %v1605_v45 = vsel %vm1473_vm1, %v3730_v20, 0.0  ;;  %v1606_v16 = vsel %vm1474_vm4, %v3730_v20, 0.0  ;;  %vm1866_vm5 = vcmp.eq.s32.totalorder %v949_v15, %v3720_v0 }
 0x1e2   : > { %v2615_v46 = vpack.c.bf16 %v2534_v19, %v2533_v5  ;;  %v1733_v10 = vadd.f32 %v1605_v45, %v1341_v30  ;;  %v1734_v47 = vadd.f32 %v1606_v16, %v1342_v28  ;;  %v1997_v43 = vsel %vm1865_vm2, %v3736_v37, 0.0  ;;  %v2635_v30 = vld [vmem:[%s3528_s6 + $0x8] sm:$0xff] }
 0x1e3   : > { %v1998_v48 = vsel %vm1866_vm5, %v3736_v37, 0.0  ;;  %vm2257_vm6 = vcmp.eq.s32.totalorder %v948_v11, %v3723_v3  ;;  %vm2258_vm7 = vcmp.eq.s32.totalorder %v949_v15, %v3723_v3  ;;  %v934_v7 = vadd.s32 496, %v3537_v2 }
 0x1e4   : > { %3074 = vmatprep.subr.bf16.mxu1 %v2615_v46  ;;  %v2125_v49 = vadd.f32 %v1997_v43, %v1733_v10  ;;  %v2126_v50 = vadd.f32 %v1998_v48, %v1734_v47  ;;  %v2389_v40 = vsel %vm2257_vm6, %v3740_v44, 0.0  ;;  %v2390_v26 = vsel %vm2258_vm7, %v3740_v44, 0.0 }
 0x1e5   : > { %v935_v31 = vadd.s32 504, %v3537_v2  ;;  %vm1195_vm8 = vcmp.eq.s32.totalorder %v934_v7, %v3705_v59  ;;  %vm1459_vm9 = vcmp.eq.s32.totalorder %v934_v7, %v3708_v60  ;;  %vm1851_vm10 = vcmp.eq.s32.totalorder %v934_v7, %v3720_v0 }
 0x1e6   : > { %v2517_v25 = vadd.f32 %v2389_v40, %v2125_v49  ;;  %v2518_v32 = vadd.f32 %v2390_v26, %v2126_v50  ;;  %v1327_v18 = vsel %vm1195_vm8, %v3717_v63, 0.0  ;;  %v1591_v52 = vsel %vm1459_vm9, %v3730_v20, 0.0 }
 0x1e7   : > { %vm1196_vm11 = vcmp.eq.s32.totalorder %v935_v31, %v3705_v59  ;;  %vm1460_vm12 = vcmp.eq.s32.totalorder %v935_v31, %v3708_v60  ;;  %v1719_v51 = vadd.f32 %v1591_v52, %v1327_v18  ;;  %vm1852_vm13 = vcmp.eq.s32.totalorder %v935_v31, %v3720_v0 }
 0x1e8   : > { %v2607_v17 = vpack.c.bf16 %v2518_v32, %v2517_v25  ;;  %v1328_v53 = vsel %vm1196_vm11, %v3717_v63, 0.0  ;;  %v1592_v54 = vsel %vm1460_vm12, %v3730_v20, 0.0  ;;  %v1983_v38 = vsel %vm1851_vm10, %v3736_v37, 0.0 }
 0x1e9   : > { %v1720_v8 = vadd.f32 %v1592_v54, %v1328_v53  ;;  %v1984_v9 = vsel %vm1852_vm13, %v3736_v37, 0.0  ;;  %v2111_v13 = vadd.f32 %v1983_v38, %v1719_v51  ;;  %vm2243_vm14 = vcmp.eq.s32.totalorder %v934_v7, %v3723_v3  ;;  %v5103_v7 = vld [vmem:[%s3528_s6 + $0x10] sm:$0xff] }
 0x1ea   : > { %3075 = vmatpush3.bf16.msra.mxu1 %v2607_v17  ;;  %vm2244_vm15 = vcmp.eq.s32.totalorder %v935_v31, %v3723_v3  ;;  %v2375_v14 = vsel %vm2243_vm14, %v3740_v44, 0.0  ;;  %v918_v55 = vadd.s32 368, %v3537_v2  ;;  %v919_v29 = vadd.s32 376, %v3537_v2 }
 0x1eb   : > { %v2112_v1 = vadd.f32 %v1984_v9, %v1720_v8  ;;  %v2376_v39 = vsel %vm2244_vm15, %v3740_v44, 0.0  ;;  %v2503_v33 = vadd.f32 %v2375_v14, %v2111_v13  ;;  %v966_v41 = vadd.s32 752, %v3537_v2 }
 0x1ec   : > { %vm1179_vm0 = vcmp.eq.s32.totalorder %v918_v55, %v3705_v59  ;;  %vm1180_vm1 = vcmp.eq.s32.totalorder %v919_v29, %v3705_v59  ;;  %vm1443_vm2 = vcmp.eq.s32.totalorder %v918_v55, %v3708_v60  ;;  %vm1444_vm3 = vcmp.eq.s32.totalorder %v919_v29, %v3708_v60 }
 0x1ed   : > { %v2504_v34 = vadd.f32 %v2376_v39, %v2112_v1  ;;  %v1311_v56 = vsel %vm1179_vm0, %v3717_v63, 0.0  ;;  %v1312_v21 = vsel %vm1180_vm1, %v3717_v63, 0.0  ;;  %v1575_v22 = vsel %vm1443_vm2, %v3730_v20, 0.0 }
 0x1ee   : > { %v1576_v57 = vsel %vm1444_vm3, %v3730_v20, 0.0  ;;  %v1703_v58 = vadd.f32 %v1575_v22, %v1311_v56  ;;  %vm1835_vm4 = vcmp.eq.s32.totalorder %v918_v55, %v3720_v0  ;;  %vm1836_vm5 = vcmp.eq.s32.totalorder %v919_v29, %v3720_v0 }
 0x1ef   : > { %v2600_v61 = vpack.c.bf16 %v2504_v34, %v2503_v33  ;;  %v1704_v6 = vadd.f32 %v1576_v57, %v1312_v21  ;;  %v1967_v62 = vsel %vm1835_vm4, %v3736_v37, 0.0  ;;  %v1968_v35 = vsel %vm1836_vm5, %v3736_v37, 0.0 }
 0x1f0   : > { %v2095_v4 = vadd.f32 %v1967_v62, %v1703_v58  ;;  %vm2227_vm6 = vcmp.eq.s32.totalorder %v918_v55, %v3723_v3  ;;  %vm2228_vm7 = vcmp.eq.s32.totalorder %v919_v29, %v3723_v3  ;;  %v967_v23 = vadd.s32 760, %v3537_v2 }
 0x1f1   : > { %3054 = vmatprep.subr.bf16.mxu0 %v2600_v61  ;;  %v2096_v24 = vadd.f32 %v1968_v35, %v1704_v6  ;;  %v2359_v11 = vsel %vm2227_vm6, %v3740_v44, 0.0  ;;  %v2360_v12 = vsel %vm2228_vm7, %v3740_v44, 0.0  ;;  %vm1227_vm8 = vcmp.eq.s32.totalorder %v966_v41, %v3705_v59 }
 0x1f2   : > { %v2487_v27 = vadd.f32 %v2359_v11, %v2095_v4  ;;  %vm1228_vm9 = vcmp.eq.s32.totalorder %v967_v23, %v3705_v59  ;;  %v1359_v36 = vsel %vm1227_vm8, %v3717_v63, 0.0  ;;  %vm1491_vm10 = vcmp.eq.s32.totalorder %v966_v41, %v3708_v60 }
 0x1f3   : > { %v2488_v15 = vadd.f32 %v2360_v12, %v2096_v24  ;;  %v1360_v5 = vsel %vm1228_vm9, %v3717_v63, 0.0  ;;  %vm1492_vm11 = vcmp.eq.s32.totalorder %v967_v23, %v3708_v60  ;;  %v1623_v19 = vsel %vm1491_vm10, %v3730_v20, 0.0 }
 0x1f4   : > { %v1624_v28 = vsel %vm1492_vm11, %v3730_v20, 0.0  ;;  %v1751_v45 = vadd.f32 %v1623_v19, %v1359_v36  ;;  %vm1883_vm12 = vcmp.eq.s32.totalorder %v966_v41, %v3720_v0  ;;  %vm1884_vm13 = vcmp.eq.s32.totalorder %v967_v23, %v3720_v0 }
 0x1f5   : > { %v2592_v16 = vpack.c.bf16 %v2488_v15, %v2487_v27  ;;  %v1752_v46 = vadd.f32 %v1624_v28, %v1360_v5  ;;  %v2015_v10 = vsel %vm1883_vm12, %v3736_v37, 0.0  ;;  %v2016_v47 = vsel %vm1884_vm13, %v3736_v37, 0.0 }
 0x1f6   : > { %v2143_v43 = vadd.f32 %v2015_v10, %v1751_v45  ;;  %vm2275_vm14 = vcmp.eq.s32.totalorder %v966_v41, %v3723_v3  ;;  %vm2276_vm15 = vcmp.eq.s32.totalorder %v967_v23, %v3723_v3  ;;  %v2984_v48 = vcombine.low %v2635_v30, %v2635_v30 }
 0x1f7   : > { %3055 = vmatpush3.bf16.msra.mxu0 %v2592_v16  ;;  %v2144_v49 = vadd.f32 %v2016_v47, %v1752_v46  ;;  %v2407_v50 = vsel %vm2275_vm14, %v3740_v44, 0.0  ;;  %v2408_v40 = vsel %vm2276_vm15, %v3740_v44, 0.0  ;;  %v2985_v26 = vcombine.high %v2635_v30, %v2635_v30 }
 0x1f8   : > { %v2535_v31 = vadd.f32 %v2407_v50, %v2143_v43  ;;  %v950_v25 = vadd.s32 624, %v3537_v2  ;;  %v951_v32 = vadd.s32 632, %v3537_v2  ;;  %v984_v18 = vadd.s32 896, %v3537_v2 }
 0x1f9   : > { %v2536_v52 = vadd.f32 %v2408_v40, %v2144_v49  ;;  %2738 = vmatprep.mubr.bf16.mxu0 %v2985_v26  ;;  %v985_v51 = vadd.s32 904, %v3537_v2  ;;  %v2986_v17 = vcombine.low %v5103_v7, %v5103_v7  ;;  %v2987_v53 = vcombine.high %v5103_v7, %v5103_v7 }
 0x1fa   : > { %vm1211_vm0 = vcmp.eq.s32.totalorder %v950_v25, %v3705_v59  ;;  %vm1212_vm1 = vcmp.eq.s32.totalorder %v951_v32, %v3705_v59  ;;  %vm1475_vm2 = vcmp.eq.s32.totalorder %v950_v25, %v3708_v60  ;;  %vm1476_vm3 = vcmp.eq.s32.totalorder %v951_v32, %v3708_v60  ;;  %2739 = vmatmul.mubr.bf16.vlgmr.msra.gmra.mrb[4].mxu0 %v2984_v48 }
 0x1fb   : > { %v2616_v54 = vpack.c.bf16 %v2536_v52, %v2535_v31  ;;  %v1343_v38 = vsel %vm1211_vm0, %v3717_v63, 0.0  ;;  %v1344_v8 = vsel %vm1212_vm1, %v3717_v63, 0.0  ;;  %v1607_v9 = vsel %vm1475_vm2, %v3730_v20, 0.0  ;;  %2778 = vmatprep.mubr.bf16.mxu1 %v2987_v53 }
 0x1fc   : > { %v1608_v13 = vsel %vm1476_vm3, %v3730_v20, 0.0  ;;  %v1735_v14 = vadd.f32 %v1607_v9, %v1343_v38  ;;  %vm1867_vm4 = vcmp.eq.s32.totalorder %v950_v25, %v3720_v0  ;;  %vm1868_vm5 = vcmp.eq.s32.totalorder %v951_v32, %v3720_v0 }
 0x1fd   : > { %3076 = vmatprep.subr.bf16.mxu1 %v2616_v54  ;;  %v1736_v55 = vadd.f32 %v1608_v13, %v1344_v8  ;;  %v1999_v29 = vsel %vm1867_vm4, %v3736_v37, 0.0  ;;  %v2000_v1 = vsel %vm1868_vm5, %v3736_v37, 0.0  ;;  %vm2259_vm6 = vcmp.eq.s32.totalorder %v950_v25, %v3723_v3 }
 0x1fe   : > { %v2127_v39 = vadd.f32 %v1999_v29, %v1735_v14  ;;  %vm2260_vm7 = vcmp.eq.s32.totalorder %v951_v32, %v3723_v3  ;;  %v2391_v33 = vsel %vm2259_vm6, %v3740_v44, 0.0  ;;  %vm1245_vm8 = vcmp.eq.s32.totalorder %v984_v18, %v3705_v59 }
 0x1ff   : > { %v2128_v41 = vadd.f32 %v2000_v1, %v1736_v55  ;;  %v2392_v42 = vsel %vm2260_vm7, %v3740_v44, 0.0  ;;  %vm1246_vm9 = vcmp.eq.s32.totalorder %v985_v51, %v3705_v59  ;;  %v1377_v34 = vsel %vm1245_vm8, %v3717_v63, 0.0 }
 0x200   : > { %v2519_v56 = vadd.f32 %v2391_v33, %v2127_v39  ;;  %v1378_v21 = vsel %vm1246_vm9, %v3717_v63, 0.0  ;;  %vm1509_vm10 = vcmp.eq.s32.totalorder %v984_v18, %v3708_v60  ;;  %vm1510_vm11 = vcmp.eq.s32.totalorder %v985_v51, %v3708_v60 }
 0x201   : > { %v2520_v22 = vadd.f32 %v2392_v42, %v2128_v41  ;;  %v1641_v57 = vsel %vm1509_vm10, %v3730_v20, 0.0  ;;  %v1642_v58 = vsel %vm1510_vm11, %v3730_v20, 0.0  ;;  %vm1901_vm12 = vcmp.eq.s32.totalorder %v984_v18, %v3720_v0 }
 0x202   : > { %v1769_v61 = vadd.f32 %v1641_v57, %v1377_v34  ;;  %v1770_v6 = vadd.f32 %v1642_v58, %v1378_v21  ;;  %vm1902_vm13 = vcmp.eq.s32.totalorder %v985_v51, %v3720_v0  ;;  %v2033_v62 = vsel %vm1901_vm12, %v3736_v37, 0.0 }
 0x203   : > { %v2608_v35 = vpack.c.bf16 %v2520_v22, %v2519_v56  ;;  %v2034_v4 = vsel %vm1902_vm13, %v3736_v37, 0.0  ;;  %vm2293_vm14 = vcmp.eq.s32.totalorder %v984_v18, %v3723_v3  ;;  %vm2294_vm15 = vcmp.eq.s32.totalorder %v985_v51, %v3723_v3 }
 0x204   : > { %v2161_v23 = vadd.f32 %v2033_v62, %v1769_v61  ;;  %v2162_v24 = vadd.f32 %v2034_v4, %v1770_v6  ;;  %v2425_v11 = vsel %vm2293_vm14, %v3740_v44, 0.0  ;;  %v2426_v12 = vsel %vm2294_vm15, %v3740_v44, 0.0 }
 0x205   : > { %3077 = vmatpush3.bf16.msra.mxu1 %v2608_v35  ;;  %v968_v27 = vadd.s32 768, %v3537_v2  ;;  %v969_v36 = vadd.s32 776, %v3537_v2  ;;  %v986_v15 = vadd.s32 912, %v3537_v2  ;;  %v987_v5 = vadd.s32 920, %v3537_v2  ;;  %v5151_v19 = vpop.f32.mrb[0].mxu0 }
 0x206   : > { %v2553_v30 = vadd.f32 %v2425_v11, %v2161_v23  ;;  %v2554_v28 = vadd.f32 %v2426_v12, %v2162_v24  ;;  %v5154_v45 = vadd.s32 784, %v3537_v2  ;;  %v5157_v16 = vadd.s32 792, %v3537_v2  ;;  %v5159_v46 = vpop.f32.mrb[1].mxu0 }
 0x207   : > { %vm1229_vm0 = vcmp.eq.s32.totalorder %v968_v27, %v3705_v59  ;;  %vm1230_vm1 = vcmp.eq.s32.totalorder %v969_v36, %v3705_v59  ;;  %vm1493_vm2 = vcmp.eq.s32.totalorder %v968_v27, %v3708_v60  ;;  %vm1494_vm3 = vcmp.eq.s32.totalorder %v969_v36, %v3708_v60  ;;  %v3015_v10 = vpop.f32.mrb[2].mxu0 }
 0x208   : > { %v2625_v47 = vpack.c.bf16 %v2554_v28, %v2553_v30  ;;  %v1361_v43 = vsel %vm1229_vm0, %v3717_v63, 0.0  ;;  %v1362_v48 = vsel %vm1230_vm1, %v3717_v63, 0.0  ;;  %v1625_v49 = vsel %vm1493_vm2, %v3730_v20, 0.0  ;;  %2779 = vmatmul.mubr.bf16.vlgmr.msra.gmra.mrb[4].mxu1 %v2986_v17  ;;  %v3016_v50 = vpop.f32.mrb[3].mxu0 }
 0x209   : > { %v1626_v40 = vsel %vm1494_vm3, %v3730_v20, 0.0  ;;  %v1753_v26 = vadd.f32 %v1625_v49, %v1361_v43  ;;  %vm1885_vm4 = vcmp.eq.s32.totalorder %v968_v27, %v3720_v0  ;;  %vm1886_vm5 = vcmp.eq.s32.totalorder %v969_v36, %v3720_v0 }
 0x20a   : > { %3084 = vmatprep.subr.bf16.mxu0 %v2625_v47  ;;  %v1754_v31 = vadd.f32 %v1626_v40, %v1362_v48  ;;  %v2017_v25 = vsel %vm1885_vm4, %v3736_v37, 0.0  ;;  %v2018_v32 = vsel %vm1886_vm5, %v3736_v37, 0.0  ;;  %vm2277_vm6 = vcmp.eq.s32.totalorder %v968_v27, %v3723_v3 }
 0x20b   : > { %v2145_v18 = vadd.f32 %v2017_v25, %v1753_v26  ;;  %vm2278_vm7 = vcmp.eq.s32.totalorder %v969_v36, %v3723_v3  ;;  %v2409_v7 = vsel %vm2277_vm6, %v3740_v44, 0.0  ;;  %vm1247_vm8 = vcmp.eq.s32.totalorder %v986_v15, %v3705_v59 }
 0x20c   : > { %v2146_v52 = vadd.f32 %v2018_v32, %v1754_v31  ;;  %v2410_v51 = vsel %vm2278_vm7, %v3740_v44, 0.0  ;;  %vm1248_vm9 = vcmp.eq.s32.totalorder %v987_v5, %v3705_v59  ;;  %v1379_v17 = vsel %vm1247_vm8, %v3717_v63, 0.0 }
 0x20d   : > { %v2537_v53 = vadd.f32 %v2409_v7, %v2145_v18  ;;  %v1380_v54 = vsel %vm1248_vm9, %v3717_v63, 0.0  ;;  %vm1511_vm10 = vcmp.eq.s32.totalorder %v986_v15, %v3708_v60  ;;  %vm1512_vm11 = vcmp.eq.s32.totalorder %v987_v5, %v3708_v60 }
 0x20e   : > { %v2538_v38 = vadd.f32 %v2410_v51, %v2146_v52  ;;  %v1643_v8 = vsel %vm1511_vm10, %v3730_v20, 0.0  ;;  %v1644_v9 = vsel %vm1512_vm11, %v3730_v20, 0.0  ;;  %vm1903_vm12 = vcmp.eq.s32.totalorder %v986_v15, %v3720_v0 }
 0x20f   : > { %v1771_v13 = vadd.f32 %v1643_v8, %v1379_v17  ;;  %v1772_v14 = vadd.f32 %v1644_v9, %v1380_v54  ;;  %vm1904_vm13 = vcmp.eq.s32.totalorder %v987_v5, %v3720_v0  ;;  %v2035_v55 = vsel %vm1903_vm12, %v3736_v37, 0.0 }
 0x210   : > { %v2617_v29 = vpack.c.bf16 %v2538_v38, %v2537_v53  ;;  %v2036_v1 = vsel %vm1904_vm13, %v3736_v37, 0.0  ;;  %vm2295_vm14 = vcmp.eq.s32.totalorder %v986_v15, %v3723_v3  ;;  %vm2296_vm15 = vcmp.eq.s32.totalorder %v987_v5, %v3723_v3 }
 0x211   : > { %v2163_v39 = vadd.f32 %v2035_v55, %v1771_v13  ;;  %v2164_v33 = vadd.f32 %v2036_v1, %v1772_v14  ;;  %v2427_v41 = vsel %vm2295_vm14, %v3740_v44, 0.0  ;;  %v2428_v42 = vsel %vm2296_vm15, %v3740_v44, 0.0 }
 0x212   : > { %3085 = vmatpush3.bf16.msra.mxu0 %v2617_v29  ;;  %vm1231_vm0 = vcmp.eq.s32.totalorder %v5154_v45, %v3705_v59  ;;  %vm1232_vm1 = vcmp.eq.s32.totalorder %v5157_v16, %v3705_v59  ;;  %vm1495_vm2 = vcmp.eq.s32.totalorder %v5154_v45, %v3708_v60  ;;  %vm1496_vm3 = vcmp.eq.s32.totalorder %v5157_v16, %v3708_v60 }
 0x213   : > { %v2555_v34 = vadd.f32 %v2427_v41, %v2163_v39  ;;  %v2556_v56 = vadd.f32 %v2428_v42, %v2164_v33  ;;  %v1363_v21 = vsel %vm1231_vm0, %v3717_v63, 0.0  ;;  %v1364_v22 = vsel %vm1232_vm1, %v3717_v63, 0.0 }
 0x214   : > { %v1627_v57 = vsel %vm1495_vm2, %v3730_v20, 0.0  ;;  %v1628_v58 = vsel %vm1496_vm3, %v3730_v20, 0.0  ;;  %vm1887_vm4 = vcmp.eq.s32.totalorder %v5154_v45, %v3720_v0  ;;  %vm1888_vm5 = vcmp.eq.s32.totalorder %v5157_v16, %v3720_v0 }
 0x215   : > { %v2626_v61 = vpack.c.bf16 %v2556_v56, %v2555_v34  ;;  %v1755_v6 = vadd.f32 %v1627_v57, %v1363_v21  ;;  %v1756_v62 = vadd.f32 %v1628_v58, %v1364_v22  ;;  %v2019_v35 = vsel %vm1887_vm4, %v3736_v37, 0.0 }
 0x216   : > { %v2020_v4 = vsel %vm1888_vm5, %v3736_v37, 0.0  ;;  %vm2279_vm6 = vcmp.eq.s32.totalorder %v5154_v45, %v3723_v3  ;;  %vm2280_vm7 = vcmp.eq.s32.totalorder %v5157_v16, %v3723_v3  ;;  %v988_v23 = vadd.s32 928, %v3537_v2 }
 0x217   : > { %3086 = vmatprep.subr.bf16.mxu0 %v2626_v61  ;;  %v2147_v24 = vadd.f32 %v2019_v35, %v1755_v6  ;;  %v2148_v11 = vadd.f32 %v2020_v4, %v1756_v62  ;;  %v2411_v12 = vsel %vm2279_vm6, %v3740_v44, 0.0  ;;  %v2412_v27 = vsel %vm2280_vm7, %v3740_v44, 0.0 }
 0x218   : > { %v989_v36 = vadd.s32 936, %v3537_v2  ;;  %vm1249_vm8 = vcmp.eq.s32.totalorder %v988_v23, %v3705_v59  ;;  %vm1513_vm9 = vcmp.eq.s32.totalorder %v988_v23, %v3708_v60  ;;  %vm1905_vm10 = vcmp.eq.s32.totalorder %v988_v23, %v3720_v0  ;;  %v5225_v15 = vpop.f32.mrb[0].mxu1 }
 0x219   : > { %v2539_v5 = vadd.f32 %v2411_v12, %v2147_v24  ;;  %v2540_v30 = vadd.f32 %v2412_v27, %v2148_v11  ;;  %v1381_v28 = vsel %vm1249_vm8, %v3717_v63, 0.0  ;;  %v1645_v45 = vsel %vm1513_vm9, %v3730_v20, 0.0  ;;  %v5229_v16 = vpop.f32.mrb[1].mxu1 }
 0x21a   : > { %vm1250_vm11 = vcmp.eq.s32.totalorder %v989_v36, %v3705_v59  ;;  %vm1514_vm12 = vcmp.eq.s32.totalorder %v989_v36, %v3708_v60  ;;  %v1773_v10 = vadd.f32 %v1645_v45, %v1381_v28  ;;  %vm1906_vm13 = vcmp.eq.s32.totalorder %v989_v36, %v3720_v0  ;;  %v3037_v47 = vpop.f32.mrb[2].mxu1 }
 0x21b   : > { %v2618_v43 = vpack.c.bf16 %v2540_v30, %v2539_v5  ;;  %v1382_v48 = vsel %vm1250_vm11, %v3717_v63, 0.0  ;;  %v1646_v49 = vsel %vm1514_vm12, %v3730_v20, 0.0  ;;  %v2037_v50 = vsel %vm1905_vm10, %v3736_v37, 0.0  ;;  %v3038_v40 = vpop.f32.mrb[3].mxu1 }
 0x21c   : > { %v1774_v26 = vadd.f32 %v1646_v49, %v1382_v48  ;;  %v2038_v31 = vsel %vm1906_vm13, %v3736_v37, 0.0  ;;  %v2165_v25 = vadd.f32 %v2037_v50, %v1773_v10  ;;  %vm2297_vm14 = vcmp.eq.s32.totalorder %v988_v23, %v3723_v3 }
 0x21d   : > { %3087 = vmatpush3.bf16.msra.mxu0 %v2618_v43  ;;  %vm2298_vm15 = vcmp.eq.s32.totalorder %v989_v36, %v3723_v3  ;;  %v2429_v32 = vsel %vm2297_vm14, %v3740_v44, 0.0  ;;  %v972_v18 = vadd.s32 800, %v3537_v2  ;;  %v973_v7 = vadd.s32 808, %v3537_v2 }
 0x21e   : > { %v2166_v52 = vadd.f32 %v2038_v31, %v1774_v26  ;;  %v2430_v51 = vsel %vm2298_vm15, %v3740_v44, 0.0  ;;  %v2557_v17 = vadd.f32 %v2429_v32, %v2165_v25  ;;  %v990_v53 = vadd.s32 944, %v3537_v2 }
 0x21f   : > { %vm1233_vm0 = vcmp.eq.s32.totalorder %v972_v18, %v3705_v59  ;;  %vm1234_vm1 = vcmp.eq.s32.totalorder %v973_v7, %v3705_v59  ;;  %vm1497_vm2 = vcmp.eq.s32.totalorder %v972_v18, %v3708_v60  ;;  %vm1498_vm3 = vcmp.eq.s32.totalorder %v973_v7, %v3708_v60 }
 0x220   : > { %v2558_v54 = vadd.f32 %v2430_v51, %v2166_v52  ;;  %v1365_v38 = vsel %vm1233_vm0, %v3717_v63, 0.0  ;;  %v1366_v8 = vsel %vm1234_vm1, %v3717_v63, 0.0  ;;  %v1629_v9 = vsel %vm1497_vm2, %v3730_v20, 0.0 }
 0x221   : > { %v1630_v13 = vsel %vm1498_vm3, %v3730_v20, 0.0  ;;  %v1757_v14 = vadd.f32 %v1629_v9, %v1365_v38  ;;  %vm1889_vm4 = vcmp.eq.s32.totalorder %v972_v18, %v3720_v0  ;;  %vm1890_vm5 = vcmp.eq.s32.totalorder %v973_v7, %v3720_v0 }
 0x222   : > { %v2627_v55 = vpack.c.bf16 %v2558_v54, %v2557_v17  ;;  %v1758_v29 = vadd.f32 %v1630_v13, %v1366_v8  ;;  %v2021_v1 = vsel %vm1889_vm4, %v3736_v37, 0.0  ;;  %v2022_v39 = vsel %vm1890_vm5, %v3736_v37, 0.0 }
 0x223   : > { %v2149_v33 = vadd.f32 %v2021_v1, %v1757_v14  ;;  %vm2281_vm6 = vcmp.eq.s32.totalorder %v972_v18, %v3723_v3  ;;  %vm2282_vm7 = vcmp.eq.s32.totalorder %v973_v7, %v3723_v3  ;;  %v991_v41 = vadd.s32 952, %v3537_v2 }
 0x224   : > { %3088 = vmatprep.subr.bf16.mxu0 %v2627_v55  ;;  %v2150_v42 = vadd.f32 %v2022_v39, %v1758_v29  ;;  %v2413_v34 = vsel %vm2281_vm6, %v3740_v44, 0.0  ;;  %v2414_v56 = vsel %vm2282_vm7, %v3740_v44, 0.0  ;;  %vm1251_vm8 = vcmp.eq.s32.totalorder %v990_v53, %v3705_v59 }
 0x225   : > { %v2541_v21 = vadd.f32 %v2413_v34, %v2149_v33  ;;  %vm1252_vm9 = vcmp.eq.s32.totalorder %v991_v41, %v3705_v59  ;;  %v1383_v22 = vsel %vm1251_vm8, %v3717_v63, 0.0  ;;  %vm1515_vm10 = vcmp.eq.s32.totalorder %v990_v53, %v3708_v60 }
 0x226   : > { %v2542_v57 = vadd.f32 %v2414_v56, %v2150_v42  ;;  %v1384_v58 = vsel %vm1252_vm9, %v3717_v63, 0.0  ;;  %vm1516_vm11 = vcmp.eq.s32.totalorder %v991_v41, %v3708_v60  ;;  %v1647_v61 = vsel %vm1515_vm10, %v3730_v20, 0.0 }
 0x227   : > { %v1648_v6 = vsel %vm1516_vm11, %v3730_v20, 0.0  ;;  %v1775_v62 = vadd.f32 %v1647_v61, %v1383_v22  ;;  %vm1907_vm12 = vcmp.eq.s32.totalorder %v990_v53, %v3720_v0  ;;  %vm1908_vm13 = vcmp.eq.s32.totalorder %v991_v41, %v3720_v0 }
 0x228   : > { %v2619_v35 = vpack.c.bf16 %v2542_v57, %v2541_v21  ;;  %v1776_v4 = vadd.f32 %v1648_v6, %v1384_v58  ;;  %v2039_v23 = vsel %vm1907_vm12, %v3736_v37, 0.0  ;;  %v2040_v24 = vsel %vm1908_vm13, %v3736_v37, 0.0 }
 0x229   : > { %v2167_v11 = vadd.f32 %v2039_v23, %v1775_v62  ;;  %vm2299_vm14 = vcmp.eq.s32.totalorder %v990_v53, %v3723_v3  ;;  %vm2300_vm15 = vcmp.eq.s32.totalorder %v991_v41, %v3723_v3  ;;  %v974_v12 = vadd.s32 816, %v3537_v2 }
 0x22a   : > { %3089 = vmatpush3.bf16.msra.mxu0 %v2619_v35  ;;  %v2168_v27 = vadd.f32 %v2040_v24, %v1776_v4  ;;  %v2431_v36 = vsel %vm2299_vm14, %v3740_v44, 0.0  ;;  %v2432_v5 = vsel %vm2300_vm15, %v3740_v44, 0.0  ;;  %v975_v30 = vadd.s32 824, %v3537_v2 }
 0x22b   : > { %v2559_v28 = vadd.f32 %v2431_v36, %v2167_v11  ;;  %vm1235_vm0 = vcmp.eq.s32.totalorder %v974_v12, %v3705_v59  ;;  %vm1499_vm1 = vcmp.eq.s32.totalorder %v974_v12, %v3708_v60  ;;  %vm1891_vm2 = vcmp.eq.s32.totalorder %v974_v12, %v3720_v0 }
 0x22c   : > { %v2560_v45 = vadd.f32 %v2432_v5, %v2168_v27  ;;  %vm1236_vm3 = vcmp.eq.s32.totalorder %v975_v30, %v3705_v59  ;;  %v1367_v10 = vsel %vm1235_vm0, %v3717_v63, 0.0  ;;  %vm1500_vm4 = vcmp.eq.s32.totalorder %v975_v30, %v3708_v60 }
 0x22d   : > { %v1368_v47 = vsel %vm1236_vm3, %v3717_v63, 0.0  ;;  %v1631_v43 = vsel %vm1499_vm1, %v3730_v20, 0.0  ;;  %v1632_v48 = vsel %vm1500_vm4, %v3730_v20, 0.0  ;;  %vm1892_vm5 = vcmp.eq.s32.totalorder %v975_v30, %v3720_v0 }
 0x22e   : > { %v2628_v49 = vpack.c.bf16 %v2560_v45, %v2559_v28  ;;  %v1759_v50 = vadd.f32 %v1631_v43, %v1367_v10  ;;  %v1760_v40 = vadd.f32 %v1632_v48, %v1368_v47  ;;  %v2023_v26 = vsel %vm1891_vm2, %v3736_v37, 0.0 }
 0x22f   : > { %v2024_v31 = vsel %vm1892_vm5, %v3736_v37, 0.0  ;;  %vm2283_vm6 = vcmp.eq.s32.totalorder %v974_v12, %v3723_v3  ;;  %vm2284_vm7 = vcmp.eq.s32.totalorder %v975_v30, %v3723_v3  ;;  %v992_v25 = vadd.s32 960, %v3537_v2 }
 0x230   : > { %3090 = vmatprep.subr.bf16.mxu0 %v2628_v49  ;;  %v2151_v32 = vadd.f32 %v2023_v26, %v1759_v50  ;;  %v2152_v18 = vadd.f32 %v2024_v31, %v1760_v40  ;;  %v2415_v7 = vsel %vm2283_vm6, %v3740_v44, 0.0  ;;  %v2416_v52 = vsel %vm2284_vm7, %v3740_v44, 0.0 }
 0x231   : > { %v993_v51 = vadd.s32 968, %v3537_v2  ;;  %vm1253_vm8 = vcmp.eq.s32.totalorder %v992_v25, %v3705_v59  ;;  %vm1517_vm9 = vcmp.eq.s32.totalorder %v992_v25, %v3708_v60  ;;  %vm1909_vm10 = vcmp.eq.s32.totalorder %v992_v25, %v3720_v0 }
 0x232   : > { %v2543_v17 = vadd.f32 %v2415_v7, %v2151_v32  ;;  %v2544_v53 = vadd.f32 %v2416_v52, %v2152_v18  ;;  %v1385_v54 = vsel %vm1253_vm8, %v3717_v63, 0.0  ;;  %v1649_v38 = vsel %vm1517_vm9, %v3730_v20, 0.0 }
 0x233   : > { %vm1254_vm11 = vcmp.eq.s32.totalorder %v993_v51, %v3705_v59  ;;  %vm1518_vm12 = vcmp.eq.s32.totalorder %v993_v51, %v3708_v60  ;;  %v1777_v8 = vadd.f32 %v1649_v38, %v1385_v54  ;;  %vm1910_vm13 = vcmp.eq.s32.totalorder %v993_v51, %v3720_v0 }
 0x234   : > { %v2620_v9 = vpack.c.bf16 %v2544_v53, %v2543_v17  ;;  %v1386_v13 = vsel %vm1254_vm11, %v3717_v63, 0.0  ;;  %v1650_v14 = vsel %vm1518_vm12, %v3730_v20, 0.0  ;;  %v2041_v55 = vsel %vm1909_vm10, %v3736_v37, 0.0 }
 0x235   : > { %v1778_v29 = vadd.f32 %v1650_v14, %v1386_v13  ;;  %v2042_v1 = vsel %vm1910_vm13, %v3736_v37, 0.0  ;;  %v2169_v39 = vadd.f32 %v2041_v55, %v1777_v8  ;;  %vm2301_vm14 = vcmp.eq.s32.totalorder %v992_v25, %v3723_v3 }
 0x236   : > { %3091 = vmatpush3.bf16.msra.mxu0 %v2620_v9  ;;  %vm2302_vm15 = vcmp.eq.s32.totalorder %v993_v51, %v3723_v3  ;;  %v2433_v33 = vsel %vm2301_vm14, %v3740_v44, 0.0  ;;  %v976_v41 = vadd.s32 832, %v3537_v2  ;;  %v977_v42 = vadd.s32 840, %v3537_v2 }
 0x237   : > { %v2170_v34 = vadd.f32 %v2042_v1, %v1778_v29  ;;  %v2434_v56 = vsel %vm2302_vm15, %v3740_v44, 0.0  ;;  %v2561_v21 = vadd.f32 %v2433_v33, %v2169_v39  ;;  %v994_v22 = vadd.s32 976, %v3537_v2 }
 0x238   : > { %vm1237_vm0 = vcmp.eq.s32.totalorder %v976_v41, %v3705_v59  ;;  %vm1238_vm1 = vcmp.eq.s32.totalorder %v977_v42, %v3705_v59  ;;  %vm1501_vm2 = vcmp.eq.s32.totalorder %v976_v41, %v3708_v60  ;;  %vm1502_vm3 = vcmp.eq.s32.totalorder %v977_v42, %v3708_v60 }
 0x239   : > { %v2562_v57 = vadd.f32 %v2434_v56, %v2170_v34  ;;  %v1369_v58 = vsel %vm1237_vm0, %v3717_v63, 0.0  ;;  %v1370_v61 = vsel %vm1238_vm1, %v3717_v63, 0.0  ;;  %v1633_v6 = vsel %vm1501_vm2, %v3730_v20, 0.0 }
 0x23a   : > { %v1634_v62 = vsel %vm1502_vm3, %v3730_v20, 0.0  ;;  %v1761_v35 = vadd.f32 %v1633_v6, %v1369_v58  ;;  %vm1893_vm4 = vcmp.eq.s32.totalorder %v976_v41, %v3720_v0  ;;  %vm1894_vm5 = vcmp.eq.s32.totalorder %v977_v42, %v3720_v0 }
 0x23b   : > { %v2629_v4 = vpack.c.bf16 %v2562_v57, %v2561_v21  ;;  %v1762_v23 = vadd.f32 %v1634_v62, %v1370_v61  ;;  %v2025_v24 = vsel %vm1893_vm4, %v3736_v37, 0.0  ;;  %v2026_v11 = vsel %vm1894_vm5, %v3736_v37, 0.0 }
 0x23c   : > { %v2153_v12 = vadd.f32 %v2025_v24, %v1761_v35  ;;  %vm2285_vm6 = vcmp.eq.s32.totalorder %v976_v41, %v3723_v3  ;;  %vm2286_vm7 = vcmp.eq.s32.totalorder %v977_v42, %v3723_v3  ;;  %v995_v27 = vadd.s32 984, %v3537_v2 }
 0x23d   : > { %3092 = vmatprep.subr.bf16.mxu0 %v2629_v4  ;;  %v2154_v36 = vadd.f32 %v2026_v11, %v1762_v23  ;;  %v2417_v5 = vsel %vm2285_vm6, %v3740_v44, 0.0  ;;  %v2418_v30 = vsel %vm2286_vm7, %v3740_v44, 0.0  ;;  %vm1255_vm8 = vcmp.eq.s32.totalorder %v994_v22, %v3705_v59 }
 0x23e   : > { %v2545_v28 = vadd.f32 %v2417_v5, %v2153_v12  ;;  %vm1256_vm9 = vcmp.eq.s32.totalorder %v995_v27, %v3705_v59  ;;  %v1387_v45 = vsel %vm1255_vm8, %v3717_v63, 0.0  ;;  %vm1519_vm10 = vcmp.eq.s32.totalorder %v994_v22, %v3708_v60 }
 0x23f   : > { %v2546_v10 = vadd.f32 %v2418_v30, %v2154_v36  ;;  %v1388_v47 = vsel %vm1256_vm9, %v3717_v63, 0.0  ;;  %vm1520_vm11 = vcmp.eq.s32.totalorder %v995_v27, %v3708_v60  ;;  %v1651_v43 = vsel %vm1519_vm10, %v3730_v20, 0.0 }
 0x240   : > { %v1652_v48 = vsel %vm1520_vm11, %v3730_v20, 0.0  ;;  %v1779_v49 = vadd.f32 %v1651_v43, %v1387_v45  ;;  %vm1911_vm12 = vcmp.eq.s32.totalorder %v994_v22, %v3720_v0  ;;  %vm1912_vm13 = vcmp.eq.s32.totalorder %v995_v27, %v3720_v0 }
 0x241   : > { %v2621_v50 = vpack.c.bf16 %v2546_v10, %v2545_v28  ;;  %v1780_v40 = vadd.f32 %v1652_v48, %v1388_v47  ;;  %v2043_v26 = vsel %vm1911_vm12, %v3736_v37, 0.0  ;;  %v2044_v31 = vsel %vm1912_vm13, %v3736_v37, 0.0 }
 0x242   : > { %v2171_v25 = vadd.f32 %v2043_v26, %v1779_v49  ;;  %vm2303_vm14 = vcmp.eq.s32.totalorder %v994_v22, %v3723_v3  ;;  %vm2304_vm15 = vcmp.eq.s32.totalorder %v995_v27, %v3723_v3  ;;  %v978_v32 = vadd.s32 848, %v3537_v2 }
 0x243   : > { %3093 = vmatpush3.bf16.msra.mxu0 %v2621_v50  ;;  %v2172_v18 = vadd.f32 %v2044_v31, %v1780_v40  ;;  %v2435_v7 = vsel %vm2303_vm14, %v3740_v44, 0.0  ;;  %v2436_v52 = vsel %vm2304_vm15, %v3740_v44, 0.0  ;;  %v979_v51 = vadd.s32 856, %v3537_v2 }
 0x244   : > { %v2563_v17 = vadd.f32 %v2435_v7, %v2171_v25  ;;  %vm1239_vm0 = vcmp.eq.s32.totalorder %v978_v32, %v3705_v59  ;;  %vm1503_vm1 = vcmp.eq.s32.totalorder %v978_v32, %v3708_v60  ;;  %vm1895_vm2 = vcmp.eq.s32.totalorder %v978_v32, %v3720_v0 }
 0x245   : > { %v2564_v53 = vadd.f32 %v2436_v52, %v2172_v18  ;;  %vm1240_vm3 = vcmp.eq.s32.totalorder %v979_v51, %v3705_v59  ;;  %v1371_v54 = vsel %vm1239_vm0, %v3717_v63, 0.0  ;;  %vm1504_vm4 = vcmp.eq.s32.totalorder %v979_v51, %v3708_v60 }
 0x246   : > { %v1372_v38 = vsel %vm1240_vm3, %v3717_v63, 0.0  ;;  %v1635_v8 = vsel %vm1503_vm1, %v3730_v20, 0.0  ;;  %v1636_v9 = vsel %vm1504_vm4, %v3730_v20, 0.0  ;;  %vm1896_vm5 = vcmp.eq.s32.totalorder %v979_v51, %v3720_v0 }
 0x247   : > { %v2630_v13 = vpack.c.bf16 %v2564_v53, %v2563_v17  ;;  %v1763_v14 = vadd.f32 %v1635_v8, %v1371_v54  ;;  %v1764_v55 = vadd.f32 %v1636_v9, %v1372_v38  ;;  %v2027_v29 = vsel %vm1895_vm2, %v3736_v37, 0.0 }
 0x248   : > { %v2028_v1 = vsel %vm1896_vm5, %v3736_v37, 0.0  ;;  %vm2287_vm6 = vcmp.eq.s32.totalorder %v978_v32, %v3723_v3  ;;  %vm2288_vm7 = vcmp.eq.s32.totalorder %v979_v51, %v3723_v3  ;;  %v996_v39 = vadd.s32 992, %v3537_v2 }
 0x249   : > { %3094 = vmatprep.subr.bf16.mxu0 %v2630_v13  ;;  %v2155_v33 = vadd.f32 %v2027_v29, %v1763_v14  ;;  %v2156_v41 = vadd.f32 %v2028_v1, %v1764_v55  ;;  %v2419_v42 = vsel %vm2287_vm6, %v3740_v44, 0.0  ;;  %v2420_v34 = vsel %vm2288_vm7, %v3740_v44, 0.0 }
 0x24a   : > { %v997_v56 = vadd.s32 1000, %v3537_v2  ;;  %vm1257_vm8 = vcmp.eq.s32.totalorder %v996_v39, %v3705_v59  ;;  %vm1521_vm9 = vcmp.eq.s32.totalorder %v996_v39, %v3708_v60  ;;  %vm1913_vm10 = vcmp.eq.s32.totalorder %v996_v39, %v3720_v0 }
 0x24b   : > { %v2547_v21 = vadd.f32 %v2419_v42, %v2155_v33  ;;  %v2548_v22 = vadd.f32 %v2420_v34, %v2156_v41  ;;  %v1389_v57 = vsel %vm1257_vm8, %v3717_v63, 0.0  ;;  %v1653_v58 = vsel %vm1521_vm9, %v3730_v20, 0.0 }
 0x24c   : > { %vm1258_vm11 = vcmp.eq.s32.totalorder %v997_v56, %v3705_v59  ;;  %vm1522_vm12 = vcmp.eq.s32.totalorder %v997_v56, %v3708_v60  ;;  %v1781_v61 = vadd.f32 %v1653_v58, %v1389_v57  ;;  %vm1914_vm13 = vcmp.eq.s32.totalorder %v997_v56, %v3720_v0 }
 0x24d   : > { %v2622_v6 = vpack.c.bf16 %v2548_v22, %v2547_v21  ;;  %v1390_v62 = vsel %vm1258_vm11, %v3717_v63, 0.0  ;;  %v1654_v35 = vsel %vm1522_vm12, %v3730_v20, 0.0  ;;  %v2045_v4 = vsel %vm1913_vm10, %v3736_v37, 0.0 }
 0x24e   : > { %v1782_v23 = vadd.f32 %v1654_v35, %v1390_v62  ;;  %v2046_v24 = vsel %vm1914_vm13, %v3736_v37, 0.0  ;;  %v2173_v11 = vadd.f32 %v2045_v4, %v1781_v61  ;;  %vm2305_vm14 = vcmp.eq.s32.totalorder %v996_v39, %v3723_v3 }
 0x24f   : > { %3095 = vmatpush3.bf16.msra.mxu0 %v2622_v6  ;;  %vm2306_vm15 = vcmp.eq.s32.totalorder %v997_v56, %v3723_v3  ;;  %v2437_v12 = vsel %vm2305_vm14, %v3740_v44, 0.0  ;;  %v980_v27 = vadd.s32 864, %v3537_v2  ;;  %v981_v36 = vadd.s32 872, %v3537_v2 }
 0x250   : > { %v2174_v5 = vadd.f32 %v2046_v24, %v1782_v23  ;;  %v2438_v30 = vsel %vm2306_vm15, %v3740_v44, 0.0  ;;  %v2565_v28 = vadd.f32 %v2437_v12, %v2173_v11  ;;  %v998_v45 = vadd.s32 1008, %v3537_v2  ;;  %v2637_v23 = vld [vmem:[%s3528_s6 + $0x18] sm:$0xff]  ;;  %s2834_s6 = scalar_lea.sflag [#allocation5], %s3514_s12 }
 0x251   : > { %vm1241_vm0 = vcmp.eq.s32.totalorder %v980_v27, %v3705_v59  ;;  %vm1242_vm1 = vcmp.eq.s32.totalorder %v981_v36, %v3705_v59  ;;  %vm1505_vm2 = vcmp.eq.s32.totalorder %v980_v27, %v3708_v60  ;;  %vm1506_vm3 = vcmp.eq.s32.totalorder %v981_v36, %v3708_v60 }
 0x252   : > { %v2566_v10 = vadd.f32 %v2438_v30, %v2174_v5  ;;  %v1373_v47 = vsel %vm1241_vm0, %v3717_v63, 0.0  ;;  %v1374_v43 = vsel %vm1242_vm1, %v3717_v63, 0.0  ;;  %v1637_v48 = vsel %vm1505_vm2, %v3730_v20, 0.0 }
 0x253   : > { %v1638_v49 = vsel %vm1506_vm3, %v3730_v20, 0.0  ;;  %v1765_v50 = vadd.f32 %v1637_v48, %v1373_v47  ;;  %vm1897_vm4 = vcmp.eq.s32.totalorder %v980_v27, %v3720_v0  ;;  %vm1898_vm5 = vcmp.eq.s32.totalorder %v981_v36, %v3720_v0 }
 0x254   : > { %v2631_v40 = vpack.c.bf16 %v2566_v10, %v2565_v28  ;;  %v1766_v26 = vadd.f32 %v1638_v49, %v1374_v43  ;;  %v2029_v31 = vsel %vm1897_vm4, %v3736_v37, 0.0  ;;  %v2030_v25 = vsel %vm1898_vm5, %v3736_v37, 0.0 }
 0x255   : > { %v2157_v32 = vadd.f32 %v2029_v31, %v1765_v50  ;;  %vm2289_vm6 = vcmp.eq.s32.totalorder %v980_v27, %v3723_v3  ;;  %vm2290_vm7 = vcmp.eq.s32.totalorder %v981_v36, %v3723_v3  ;;  %v999_v18 = vadd.s32 1016, %v3537_v2 }
 0x256   : > { %3096 = vmatprep.subr.bf16.mxu0 %v2631_v40  ;;  %v2158_v7 = vadd.f32 %v2030_v25, %v1766_v26  ;;  %v2421_v52 = vsel %vm2289_vm6, %v3740_v44, 0.0  ;;  %v2422_v51 = vsel %vm2290_vm7, %v3740_v44, 0.0  ;;  %vm1259_vm8 = vcmp.eq.s32.totalorder %v998_v45, %v3705_v59 }
 0x257   : > { %v2549_v17 = vadd.f32 %v2421_v52, %v2157_v32  ;;  %vm1260_vm9 = vcmp.eq.s32.totalorder %v999_v18, %v3705_v59  ;;  %v1391_v53 = vsel %vm1259_vm8, %v3717_v63, 0.0  ;;  %vm1523_vm10 = vcmp.eq.s32.totalorder %v998_v45, %v3708_v60 }
 0x258   : > { %v2550_v54 = vadd.f32 %v2422_v51, %v2158_v7  ;;  %v1392_v38 = vsel %vm1260_vm9, %v3717_v63, 0.0  ;;  %vm1524_vm11 = vcmp.eq.s32.totalorder %v999_v18, %v3708_v60  ;;  %v1655_v8 = vsel %vm1523_vm10, %v3730_v20, 0.0 }
 0x259   : > { %v1656_v9 = vsel %vm1524_vm11, %v3730_v20, 0.0  ;;  %v1783_v13 = vadd.f32 %v1655_v8, %v1391_v53  ;;  %vm1915_vm12 = vcmp.eq.s32.totalorder %v998_v45, %v3720_v0  ;;  %vm1916_vm13 = vcmp.eq.s32.totalorder %v999_v18, %v3720_v0  ;;  %v775_v49 = vpop.permute.xlu0 %774 }
 0x25a   : > { %v2623_v14 = vpack.c.bf16 %v2550_v54, %v2549_v17  ;;  %v1784_v55 = vadd.f32 %v1656_v9, %v1392_v38  ;;  %v2047_v29 = vsel %vm1915_vm12, %v3736_v37, 0.0  ;;  %v2048_v1 = vsel %vm1916_vm13, %v3736_v37, 0.0 }
 0x25b   : > { %v2175_v39 = vadd.f32 %v2047_v29, %v1783_v13  ;;  %vm2307_vm14 = vcmp.eq.s32.totalorder %v998_v45, %v3723_v3  ;;  %vm2308_vm15 = vcmp.eq.s32.totalorder %v999_v18, %v3723_v3  ;;  %v982_v33 = vadd.s32 880, %v3537_v2 }
 0x25c   : > { %3097 = vmatpush3.bf16.msra.mxu0 %v2623_v14  ;;  %v2176_v41 = vadd.f32 %v2048_v1, %v1784_v55  ;;  %v2439_v42 = vsel %vm2307_vm14, %v3740_v44, 0.0  ;;  %v2440_v34 = vsel %vm2308_vm15, %v3740_v44, 0.0  ;;  %v983_v56 = vadd.s32 888, %v3537_v2 }
 0x25d   : > { %v2567_v21 = vadd.f32 %v2439_v42, %v2175_v39  ;;  %vm1243_vm0 = vcmp.eq.s32.totalorder %v982_v33, %v3705_v59  ;;  %vm1507_vm1 = vcmp.eq.s32.totalorder %v982_v33, %v3708_v60  ;;  %vm1899_vm2 = vcmp.eq.s32.totalorder %v982_v33, %v3720_v0 }
 0x25e   : > { %v2568_v22 = vadd.f32 %v2440_v34, %v2176_v41  ;;  %vm1244_vm3 = vcmp.eq.s32.totalorder %v983_v56, %v3705_v59  ;;  %v1375_v57 = vsel %vm1243_vm0, %v3717_v63, 0.0  ;;  %vm1508_vm4 = vcmp.eq.s32.totalorder %v983_v56, %v3708_v60 }
 0x25f   : > { %v1376_v58 = vsel %vm1244_vm3, %v3717_v63, 0.0  ;;  %v1639_v61 = vsel %vm1507_vm1, %v3730_v20, 0.0  ;;  %v1640_v2 = vsel %vm1508_vm4, %v3730_v20, 0.0  ;;  %vm1900_vm5 = vcmp.eq.s32.totalorder %v983_v56, %v3720_v0 }
 0x260   : > { %v2632_v6 = vpack.c.bf16 %v2568_v22, %v2567_v21  ;;  %v1767_v62 = vadd.f32 %v1639_v61, %v1375_v57  ;;  %v1768_v35 = vadd.f32 %v1640_v2, %v1376_v58  ;;  %v2031_v4 = vsel %vm1899_vm2, %v3736_v37, 0.0 }
 0x261   : > { %v2032_v59 = vsel %vm1900_vm5, %v3736_v37, 0.0  ;;  %vm2291_vm6 = vcmp.eq.s32.totalorder %v982_v33, %v3723_v3  ;;  %vm2292_vm7 = vcmp.eq.s32.totalorder %v983_v56, %v3723_v3  ;;  %v2989_v0 = vcombine.high %v2637_v23, %v2637_v23 }
 0x262   : > { %3098 = vmatprep.subr.bf16.mxu0 %v2632_v6  ;;  %v2159_v60 = vadd.f32 %v2031_v4, %v1767_v62  ;;  %v2160_v63 = vadd.f32 %v2032_v59, %v1768_v35  ;;  %v2423_v24 = vsel %vm2291_vm6, %v3740_v44, 0.0  ;;  %v2424_v20 = vsel %vm2292_vm7, %v3740_v44, 0.0 }
 0x263   : > { %v3014_v11 = vadd.f32 %v5159_v46, %v5151_v19  ;;  %v3036_v12 = vadd.f32 %v5229_v16, %v5225_v15  ;;  %2818 = vmatprep.mubr.bf16.mxu0 %v2989_v0  ;;  %v2988_v5 = vcombine.low %v2637_v23, %v2637_v23 }
 0x264   : > { %v2551_v27 = vadd.f32 %v2423_v24, %v2159_v60  ;;  %v2552_v37 = vadd.f32 %v2424_v20, %v2160_v63 }
 0x265   : > { %v819_v25 = vadd.f32 %v3014_v11, %v775_v49 }
 0x266   : > { %v2624_v36 = vpack.c.bf16 %v2552_v37, %v2551_v27 }
 0x268   : > { %3099 = vmatpush3.bf16.msra.mxu0 %v2624_v36 }
 0x26b   : > { %2819 = vmatmul.mubr.bf16.vlgmr.msra.gmra.mrb[8].mxu0 %v2988_v5 }
 0x2cd   : > { %v3056_v3 = vpop.f32.mrb[4].mxu0 }
 0x2ce   : > { %v3057_v30 = vpop.f32.mrb[5].mxu0 }
 0x2cf   : > { %v3058_v28 = vadd.f32 %v3057_v30, %v3056_v3  ;;  %v3059_v45 = vpop.f32.mrb[6].mxu0 }
 0x2d0   : > { %v3060_v44 = vpop.f32.mrb[7].mxu0 }
 0x2d1   : > { %v2741_v10 = vadd.f32 %v3058_v28, %v3036_v12 }
 0x2db   : > { %v3078_v47 = vpop.f32.mrb[4].mxu1 }
 0x2dc   : > { %v3079_v19 = vpop.f32.mrb[5].mxu1 }
 0x2dd   : > { %v3080_v46 = vadd.f32 %v3079_v19, %v3078_v47  ;;  %v3081_v43 = vpop.f32.mrb[6].mxu1 }
 0x2de   : > { %v3082_v15 = vpop.f32.mrb[7].mxu1 }
 0x2df   : > { %v2781_v16 = vadd.f32 %v3080_v46, %v2741_v10 }
 0x33e   : > { %v3100_v48 = vpop.f32.mrb[8].mxu0 }
 0x33f   : > { %v3101_v50 = vpop.f32.mrb[9].mxu0 }
 0x340   : > { %v3102_v40 = vadd.f32 %v3101_v50, %v3100_v48  ;;  %v3103_v26 = vpop.f32.mrb[10].mxu0 }
 0x341   : > { %v3104_v31 = vpop.f32.mrb[11].mxu0 }
 0x342   : > { %v2821_v32 = vadd.f32 %v3102_v40, %v2781_v16 }
 0x344   : > { %v2826_v18 = vadd.f32 %v2821_v32, %v819_v25 }
 0x346   : > { %2832 = vst [vmem:[%s280_s7] sm:$0xff] %v2826_v18 }
 0x347   : > { %3262 = shalt.err (!%p3259_p9)
}
 0x348   : > { %s3263_s12 = scalar_lea.hbm %s5451_s21, 128  ;;  %s3267_s5 = scalar_lea.hbm %s5504_s4, 256 }
 0x349   : > { %p3264_p11 = scmp.ne.s32.totalorder %s5451_s21, %s3263_s12  ;;  %p3268_p13 = scmp.lt.u32.totalorder %s5451_s21, %s5504_s4 }
 0x34a   : > { %p3269_p8 = scmp.lt.u32.totalorder %s3267_s5, %s3263_s12  ;;  %p3271_p5 = scmp.lt.u32.totalorder %s3263_s12, %s5451_s21 }
 0x34b   : > { %p3265_p3 = pnand %p3264_p11, %p5527_p7 }
 0x34c   : > { %p3270_p0 = por %p3269_p8, %p3268_p13 }
 0x34d   : > { %p3266_p6 = pneg %p3265_p3 }
 0x34e   : > { %p3272_p4 = por %p3271_p5, %p3270_p0 }
 0x350   : > { %p3273_p10 = pnand %p3272_p4, %p3266_p6 }
 0x352   : > { %3276 = shalt.err (!%p3273_p10)
}
 0x353   : > { %3114 = dma.vmem_to_hbm [thread:$0]  (%p5527_p7), %s5453_s9, 128, %s5451_s21, %s2834_s6  }
 0x354 PF: > { %s2859_s26 = sand.u32 1, %s3315_s15   ;;  %p5528_p12 = scmp.ne.s32.totalorder %s5510_s30, 0 }
 0x355   : > { %p5529_p1 = scmp.ge.s32.totalorder %s3335_s20, 2  ;;  %s2860_s7 = scalar_lea.sflag [#allocation5], %s2859_s26 }
 0x357   : > { %p3124_p2 = pnand %p5529_p1, %p5528_p12 }
 0x359   : > { %3310 = dma.done.wait (!%p3124_p2), %s2860_s7, 128  }
 0x35a   : > { %3312 = vsyncadd (!%p3124_p2), %s2860_s7, 4294967168  ;;  %s23_s20 = sadd.s32 1, %s3335_s20   ;;  %s5530_s15 = smov %s3319_s16 }
 0x35b   : > { %p20_p9 = scmp.ge.s32.totalorder %s23_s20, 4   ;;  %s5531_s16 = smov %s3323_s17 }
 0x35c   : > { %s5532_s17 = smov %s3422_s29  ;;  %s5533_s18 = smov %s3331_s19 }
 0x35d   : > { %s5534_s19 = smov %s5536_s23  ;;  %22 = sbr.rel (!%p20_p9) target bundleno = 8 (0x8), region = 105 }
 0x364   :  { %2865 = vsyncpa [#allocation4], 1 }
 0x365   :  { %2867 = vsyncpa [#allocation4 + $0x1], 1 }
 0x366   :  { %2868 = vsyncpa [#allocation7], 1 }
 0x367   :  { %2870 = vsyncpa [#allocation7 + $0x1], 1 }
 0x368   :  { %2871 = vsyncpa [#allocation5], 1 }
 0x369   :  { %2873 = vsyncpa [#allocation5 + $0x1], 1 }

</bundles_post_ra>
